<compile_context>
chip_gen: v5e
topology: v5e:2x2
jax: 0.10.0
libtpu: 0.0.40
codegen_flags: <defaults>
</compile_context>

<pallas_src>
import numpy as np
import jax
import jax.numpy as jnp
from jax import lax
from jax.experimental import pallas as pl
from jax.experimental.pallas import tpu as pltpu


def _round_up(x, m):
    return (x + m - 1) // m * m


# ----------------------------- LSTM recurrence kernel ------------------------

def _bilstm_chunk_kernel(gates_ref, whh_ref, lens_ref, out_ref, h_sc, c_sc):
    """One time-chunk of one direction of a bi-LSTM layer.

    gates_ref: (TC, Bp, 4Hp) bf16  precomputed x @ W_ih + b for this direction
    whh_ref:   (Hp, 4Hp)     bf16  recurrent weights (resident per direction)
    lens_ref:  (Bp, 1)       int32 sentence lengths
    out_ref:   (TC, Bp, Hp)  f32   hidden states (zeros at padded steps)
    """
    d = pl.program_id(0)                 # 0 = forward, 1 = backward
    c = pl.program_id(1)                 # chunk counter (grid order)
    nc = pl.num_programs(1)

    @pl.when(c == 0)
    def _():
        h_sc[...] = jnp.zeros_like(h_sc)
        c_sc[...] = jnp.zeros_like(c_sc)

    TC = gates_ref.shape[0]
    Hp = h_sc.shape[1]
    whh = whh_ref[...]                   # bf16, loaded once per chunk
    lens = lens_ref[...]                 # (Bp, 1) int32
    chunk = c + d * (nc - 1 - 2 * c)     # actual time-chunk (reversed for bwd)
    t0 = chunk * TC

    def step(s, carry):
        lt = s + d * (TC - 1 - 2 * s)    # local time inside the chunk
        # bf16 x bf16 -> f32 MXU matmul on the serial critical path.
        g = gates_ref[lt].astype(jnp.float32) + jnp.dot(
            h_sc[...].astype(jnp.bfloat16), whh,
            preferred_element_type=jnp.float32)
        # PyTorch gate order i, f, g, o; gate slices are 128-lane aligned.
        i_g = jax.nn.sigmoid(g[:, 0 * Hp:1 * Hp])
        f_g = jax.nn.sigmoid(g[:, 1 * Hp:2 * Hp])
        g_g = jnp.tanh(g[:, 2 * Hp:3 * Hp])
        o_g = jax.nn.sigmoid(g[:, 3 * Hp:4 * Hp])
        c_new = f_g * c_sc[...] + i_g * g_g
        h_new = o_g * jnp.tanh(c_new)
        # packed-sequence semantics: freeze state / emit 0 at padded steps.
        m = (t0 + lt) < lens                        # (Bp, 1) bool, one compare
        c_sc[...] = jnp.where(m, c_new, c_sc[...])  # selects, not mul-blends
        h_sc[...] = jnp.where(m, h_new, h_sc[...])
        out_ref[lt] = jnp.where(m, h_new, 0.0)      # lane-dense (Bp, Hp) store
        return carry

    # Partial unroll -> LLO can overlap store / gate math with the next MXU push.
    lax.fori_loop(0, TC, step, 0, unroll=min(8, TC))


def bilstm_layer(gates, whh, lens_col, *, time_chunk, vmem_limit_bytes):
    """gates: (Tp, Bp, 8Hp) bf16 ([fwd 4Hp | bwd 4Hp]); whh: (2, Hp, 4Hp) bf16;
    lens_col: (Bp, 1) int32.  Returns (Tp, Bp, 2Hp) f32 ([fwd Hp | bwd Hp])."""
    Tp, Bp, G2 = gates.shape
    G = G2 // 2                          # 4*Hp
    Hp = G // 4
    assert Tp % time_chunk == 0
    nc = Tp // time_chunk
    # same (time_block, 0, direction_block) map for the gates stream and output
    tmap = lambda d, c: (c + d * (nc - 1 - 2 * c), 0, d)

    return pl.pallas_call(
        _bilstm_chunk_kernel,
        out_shape=jax.ShapeDtypeStruct((Tp, Bp, 2 * Hp), jnp.float32),
        grid_spec=pltpu.PrefetchScalarGridSpec(
            num_scalar_prefetch=0,
            grid=(2, nc),
            in_specs=[
                pl.BlockSpec((time_chunk, Bp, G), tmap),
                pl.BlockSpec((None, Hp, G), lambda d, c: (d, 0, 0)),
                pl.BlockSpec((Bp, 1), lambda d, c: (0, 0)),
            ],
            out_specs=pl.BlockSpec((time_chunk, Bp, Hp), tmap),
            scratch_shapes=[pltpu.VMEM((Bp, Hp), jnp.float32),
                            pltpu.VMEM((Bp, Hp), jnp.float32)],
        ),
        # direction axis parallel -> fwd/bwd on separate TensorCores on v7x
        compiler_params=pltpu.CompilerParams(
            dimension_semantics=("parallel", "arbitrary"),
            vmem_limit_bytes=int(vmem_limit_bytes)),
    )(gates, whh, lens_col)


# ------------------------------- span kernel ---------------------------------

def _span_pair_kernel(ti_ref, tj_ref, xi_ref, xj_ref, out_ref):
    """One upper-triangular (i-tile, j-tile) block of span features.
    xi/xj: (2, tile, H), [0] = fwd rows, [1] = bwd rows (already +1-shifted).
    out:   (2, tile, tile, H); both direction slabs start at lane 0."""
    del ti_ref, tj_ref
    f_i = xi_ref[0]
    b_i = xi_ref[1]
    f_j = xj_ref[0]
    b_j = xj_ref[1]
    out_ref[0] = f_j[None, :, :] - f_i[:, None, :]   # fwd[j] - fwd[i]
    out_ref[1] = b_i[:, None, :] - b_j[None, :, :]   # bwd[i+1] - bwd[j+1]


def span_pairs_upper(x_cat, *, tile):
    """x_cat: (B, 2, L1p, H) f32 ([:,0]=fwd[:L1], [:,1]=bwd[1:T]), L1p % tile == 0.
    Emits ONLY j-tile >= i-tile blocks of the dense span features as
    (2, B, L1p, L1p, H); strictly-lower tiles stay unwritten (never read)."""
    B, _, L1p, H = x_cat.shape
    nt = L1p // tile
    pairs = [(i, j) for i in range(nt) for j in range(i, nt)]
    ti_idx = jnp.asarray([p[0] for p in pairs], jnp.int32)
    tj_idx = jnp.asarray([p[1] for p in pairs], jnp.int32)

    return pl.pallas_call(
        _span_pair_kernel,
        out_shape=jax.ShapeDtypeStruct((2, B, L1p, L1p, H), jnp.float32),
        grid_spec=pltpu.PrefetchScalarGridSpec(
            num_scalar_prefetch=2,                   # tile-pair index tables
            grid=(B, len(pairs)),
            in_specs=[
                pl.BlockSpec((None, 2, tile, H),
                             lambda b, p, ti, tj: (b, 0, ti[p], 0)),
                pl.BlockSpec((None, 2, tile, H),
                             lambda b, p, ti, tj: (b, 0, tj[p], 0)),
            ],
            out_specs=pl.BlockSpec((2, None, tile, tile, H),
                                   lambda b, p, ti, tj: (0, b, ti[p], tj[p], 0)),
        ),
        compiler_params=pltpu.CompilerParams(
            dimension_semantics=("parallel", "arbitrary")),
    )(ti_idx, tj_idx, x_cat, x_cat)


# ------------------------ parameter padding helpers --------------------------

def _pad_gate_cols(w, H, Hp):
    """(..., 4H) -> (..., 4Hp): gate k (i,f,g,o) placed at cols [k*Hp, k*Hp+H)."""
    pad = [(0, 0)] * (w.ndim - 1) + [(0, Hp - H)]
    return jnp.concatenate(
        [jnp.pad(w[..., k * H:(k + 1) * H], pad) for k in range(4)], -1)


def _pad_hidden_rows(w, H, Hp):
    """(H, 4Hp) -> (Hp, 4Hp)."""
    return jnp.pad(w, ((0, Hp - H), (0, 0)))


def _pad_bidir_rows(w, H, Hp):
    """(2H, 4Hp) -> (2Hp, 4Hp): fwd rows at 0:H, bwd rows at Hp:Hp+H."""
    return jnp.concatenate([jnp.pad(w[:H], ((0, Hp - H), (0, 0))),
                            jnp.pad(w[H:], ((0, Hp - H), (0, 0)))], 0)


def _input_proj_fused(x, w_fused_bf16, bias_f32):
    """Hoisted input projection for BOTH directions: one bf16 MXU matmul over
    the whole padded sequence (f32 accumulation), emitted as bf16."""
    Tp, Bp, In = x.shape
    g = jnp.dot(x.reshape(Tp * Bp, In).astype(jnp.bfloat16), w_fused_bf16,
                preferred_element_type=jnp.float32)
    return (g.reshape(Tp, Bp, -1) + bias_f32).astype(jnp.bfloat16)


def _pick_time_chunk(T, Bp, Hp, requested):
    """Largest time chunk <= requested whose double-buffered blocks fit a
    ~40 MiB VMEM budget (headroom on v7x's 64 MiB physical VMEM)."""
    def need(tc):
        gates = 2 * tc * Bp * 4 * Hp * 2     # bf16 gates chunk, double-buffered
        out = 2 * tc * Bp * Hp * 4           # f32 output chunk, double-buffered
        whh = 2 * Hp * 4 * Hp * 2            # bf16 W_hh, double-buffered
        scratch = 2 * Bp * Hp * 4            # h/c state
        return gates + out + whh + scratch
    tc = min(_round_up(requested, 8), _round_up(T, 8))
    while tc > 8 and need(tc) > (40 << 20):
        tc -= 8
    return tc, need(tc)


# ------------------------------- model ---------------------------------------

def init_params(key, cfg):
    H = cfg["lstm_dim"] // 2
    E = (cfg["word_dim"] + cfg["pos_dim"] + cfg["dep_dim"]
         + cfg["ent_dim"] + cfg["ent_iob_dim"])
    ks = jax.random.split(key, 5 + 6 * cfg["lstm_layer"])
    p = {}
    p["ext_emb"] = 0.1 * jax.random.normal(ks[0], (cfg["num_ext_word"], cfg["word_dim"]), jnp.float32)
    # reset_parameters(): word_embedding.weight zeroed
    p["word_emb"] = jnp.zeros((cfg["num_train_word"], cfg["word_dim"]), jnp.float32)
    p["pos_emb"] = jax.random.normal(ks[1], (cfg["num_pos"], cfg["pos_dim"]), jnp.float32)
    p["dep_emb"] = jax.random.normal(ks[2], (cfg["num_dep"], cfg["dep_dim"]), jnp.float32)
    p["ent_emb"] = jax.random.normal(ks[3], (cfg["num_ent"], cfg["ent_dim"]), jnp.float32)
    p["ent_iob_emb"] = jax.random.normal(ks[4], (cfg["num_ent_iob"], cfg["ent_iob_dim"]), jnp.float32)

    std = 1.0 / np.sqrt(H)
    layers = []
    ki = 5
    for l in range(cfg["lstm_layer"]):
        in_dim = E if l == 0 else 2 * H
        layer = {}
        for name in ("fwd", "bwd"):
            w_ih = jax.random.uniform(ks[ki], (in_dim, 4 * H), jnp.float32, -std, std); ki += 1
            w_hh = jax.random.uniform(ks[ki], (H, 4 * H), jnp.float32, -std, std); ki += 1
            bias = jax.random.uniform(ks[ki], (1, 4 * H), jnp.float32, -std, std); ki += 1
            layer[name] = (w_ih, w_hh, bias)
        layers.append(layer)
    p["lstm"] = layers
    return p


def lstm_encoder_forward(params, cfg, word_idxs, pos_idxs, dep_idxs,
                         ent_idxs, ent_iob_idxs, *, time_chunk=32,
                         return_internals=False):
    PAD, UNK, STOP = cfg["PAD"], cfg["UNK"], cfg["STOP"]
    H = cfg["lstm_dim"] // 2
    Hp = _round_up(H, 128)

    word_idxs = jnp.asarray(word_idxs, jnp.int32)
    pos_idxs = jnp.asarray(pos_idxs, jnp.int32)
    dep_idxs = jnp.asarray(dep_idxs, jnp.int32)
    ent_idxs = jnp.asarray(ent_idxs, jnp.int32)
    ent_iob_idxs = jnp.asarray(ent_iob_idxs, jnp.int32)

    # --- sequence / span lengths: ONE host sync for both dynamic widths ---
    pad_mask_full = word_idxs != PAD
    sen_lens = pad_mask_full.sum(1).astype(jnp.int32)
    max_len_dev = jnp.max(sen_lens)
    word_f_full = jnp.where(word_idxs >= cfg["num_train_word"], UNK, word_idxs)
    valid_full = pad_mask_full & (word_f_full != STOP)
    j_iota = jnp.arange(word_idxs.shape[1], dtype=jnp.int32)
    span_cnt = jnp.sum(
        jnp.where(valid_full & (j_iota[None, :] < max_len_dev - 1),
                  j_iota[None, :], 0), axis=1)
    # TODO(synk): bucket max_len / S to a few static sizes to avoid a recompile
    # per distinct value; exact values kept here to match torch semantics.
    max_len, S = (int(v) for v in jax.device_get([max_len_dev, jnp.max(span_cnt)]))
    T = max_len

    word_t = word_idxs[:, :T]
    word_f = word_f_full[:, :T]

    # --- embeddings (glue) ---
    word_emb = params["ext_emb"][word_t] + params["word_emb"][word_f]
    emb = jnp.concatenate(
        [word_emb,
         params["pos_emb"][pos_idxs[:, :T]],
         params["dep_emb"][dep_idxs[:, :T]],
         params["ent_emb"][ent_idxs[:, :T]],
         params["ent_iob_emb"][ent_iob_idxs[:, :T]]], -1)
    # TODO(synk): emb_drop / lstm_drop dropout implemented as eval-mode identity only.

    B = word_t.shape[0]
    Bp = _round_up(B, 8)
    TC, lstm_need = _pick_time_chunk(T, Bp, Hp, time_chunk)
    Tp = _round_up(T, TC)
    vmem_limit = min(max(2 * lstm_need, 32 << 20), 64 << 20)

    x_tbe = jnp.transpose(emb, (1, 0, 2)).astype(jnp.float32)          # (T, B, E)
    x0 = jnp.pad(x_tbe, ((0, Tp - T), (0, Bp - B), (0, 0)))            # (Tp, Bp, E)
    lens_col = jnp.pad(sen_lens, (0, Bp - B))[:, None].astype(jnp.int32)

    # --- bidirectional multi-layer LSTM (Pallas) ---
    h_in = x0
    for li, layer in enumerate(params["lstm"]):
        w_cols, b_cols, whhs = [], [], []
        for name in ("fwd", "bwd"):
            w_ih, w_hh, bias = layer[name]
            w_ih_p = _pad_gate_cols(w_ih, H, Hp)
            if li > 0:
                w_ih_p = _pad_bidir_rows(w_ih_p, H, Hp)
            w_cols.append(w_ih_p)
            b_cols.append(_pad_gate_cols(bias, H, Hp))
            whhs.append(_pad_hidden_rows(_pad_gate_cols(w_hh, H, Hp), H, Hp))
        w_fused = jnp.concatenate(w_cols, -1).astype(jnp.bfloat16)      # (In, 8Hp)
        b_fused = jnp.concatenate(b_cols, -1)                           # (1, 8Hp) f32
        whh = jnp.stack(whhs).astype(jnp.bfloat16)                      # (2, Hp, 4Hp)
        gates = _input_proj_fused(h_in, w_fused, b_fused)               # (Tp,Bp,8Hp) bf16
        h_in = bilstm_layer(gates, whh, lens_col, time_chunk=TC,
                            vmem_limit_bytes=vmem_limit)                # (Tp,Bp,2Hp) f32

    fwd_h = h_in[:T, :B, :H]                                            # (T, B, H)
    bwd_h = h_in[:T, :B, Hp:Hp + H]

    # --- span features (Pallas, upper-triangular tiles only) ---
    L1 = T - 1
    # cap the (2, tile, tile, H) f32 double-buffered output block to ~24 MiB
    tile_cap = max(8, (int(np.sqrt((24 << 20) / (16 * H))) // 8) * 8)
    tile = min(128, _round_up(L1, 8), tile_cap)
    L1p = _round_up(L1, tile)

    fwd_bt = jnp.transpose(fwd_h, (1, 0, 2))                            # (B, T, H)
    bwd_bt = jnp.transpose(bwd_h, (1, 0, 2))
    f_rows = jnp.pad(fwd_bt[:, :L1], ((0, 0), (0, L1p - L1), (0, 0)))
    b_rows = jnp.pad(bwd_bt[:, 1:T], ((0, 0), (0, L1p - L1), (0, 0)))
    x_cat = jnp.stack([f_rows, b_rows], axis=1)                         # (B, 2, L1p, H)
    dense = span_pairs_upper(x_cat, tile=tile)                          # (2,B,L1p,L1p,H)

    # --- pack valid spans (j > i, token j valid) in row-major (i, j) order ---
    valid = valid_full[:, :L1]                                          # (B, L1)
    valid_p = jnp.pad(valid, ((0, 0), (0, L1p - L1)))
    triu = jnp.triu(jnp.ones((L1p, L1p), dtype=bool), 1)
    mask2 = valid_p[:, None, :] & triu[None]                            # (B,L1p,L1p)
    N = L1p * L1p
    flat_mask = mask2.reshape(B, N)
    dest = jnp.cumsum(flat_mask.astype(jnp.int32), axis=1) - 1          # target slot
    dest = jnp.where(flat_mask, dest, S)                                # invalid -> discarded
    bidx = jnp.arange(B)[:, None]

    def _pack(slab):                        # (B, L1p, L1p, H) -> (B, S, H)
        flat = slab.reshape(B, N, H)
        vals = jnp.where(flat_mask[:, :, None], flat, 0.0)
        out = jnp.zeros((B, S + 1, H), flat.dtype).at[bidx, dest].set(vals)
        return out[:, :S]

    x_span = jnp.concatenate([_pack(dense[0]), _pack(dense[1])], axis=-1)

    outputs = (x_span, sen_lens - 2)
    if return_internals:
        lstm_out = jnp.concatenate([fwd_h, bwd_h], -1)                  # (T, B, 2H)
        return outputs, (x_tbe, lstm_out, valid)
    return outputs


# ----------------------- pure-JAX reference (for check) ----------------------

def _ref_bilstm(x, sen_lens, lstm_layers, H):
    """Plain-JAX bi-LSTM mirroring the kernel's numerics exactly (bf16 matmul
    operands / bf16 hoisted gates, f32 accumulation and state), so the check
    isolates logic errors (masking, gate order, direction handling) from the
    deliberate bf16 precision choice."""
    T, B, _ = x.shape
    step_mask = (jnp.arange(T)[:, None] < sen_lens[None, :])[:, :, None]
    inp = x
    for layer in lstm_layers:
        dir_outs = []
        for name, reverse in (("fwd", False), ("bwd", True)):
            w_ih, w_hh, bias = layer[name]
            gates = (jnp.dot(inp.reshape(T * B, -1).astype(jnp.bfloat16),
                             w_ih.astype(jnp.bfloat16),
                             preferred_element_type=jnp.float32)
                     .reshape(T, B, -1) + bias[0]).astype(jnp.bfloat16)
            w_hh_b = w_hh.astype(jnp.bfloat16)
            h = jnp.zeros((B, H), jnp.float32)
            c = jnp.zeros((B, H), jnp.float32)
            out = [None] * T
            t_order = range(T - 1, -1, -1) if reverse else range(T)
            for t in t_order:
                m = step_mask[t]
                g = gates[t].astype(jnp.float32) + jnp.dot(
                    h.astype(jnp.bfloat16), w_hh_b,
                    preferred_element_type=jnp.float32)
                i_g = jax.nn.sigmoid(g[:, 0 * H:1 * H])
                f_g = jax.nn.sigmoid(g[:, 1 * H:2 * H])
                g_g = jnp.tanh(g[:, 2 * H:3 * H])
                o_g = jax.nn.sigmoid(g[:, 3 * H:4 * H])
                c_new = f_g * c + i_g * g_g
                h_new = o_g * jnp.tanh(c_new)
                c = jnp.where(m, c_new, c)
                h = jnp.where(m, h_new, h)
                out[t] = jnp.where(m, h_new, 0.0)
            dir_outs.append(jnp.stack(out, 0))
        inp = jnp.concatenate(dir_outs, -1)
    return inp


# --------------------------------- main ---------------------------------------

if __name__ == "__main__":
    cfg = dict(
        num_ext_word=50, num_train_word=20, num_pos=10, num_dep=12,
        num_ent=8, num_ent_iob=4,
        word_dim=16, pos_dim=8, dep_dim=8, ent_dim=8, ent_iob_dim=8,
        lstm_dim=32, lstm_layer=2,
        PAD=0, UNK=1, STOP=2,
    )
    key = jax.random.PRNGKey(0)
    pkey, dkey = jax.random.split(key)
    params = init_params(pkey, cfg)

    B, T = 2, 9
    # seq0: len 8 (ends with STOP=2); seq1: len 5 with one OOV id (30 >= 20)
    word_idxs = jnp.array([[3, 5, 7, 9, 11, 4, 6, 2, 0],
                           [3, 8, 30, 5, 2, 0, 0, 0, 0]], jnp.int32)
    ks = jax.random.split(dkey, 4)
    pos_idxs = jax.random.randint(ks[0], (B, T), 0, cfg["num_pos"], jnp.int32)
    dep_idxs = jax.random.randint(ks[1], (B, T), 0, cfg["num_dep"], jnp.int32)
    ent_idxs = jax.random.randint(ks[2], (B, T), 0, cfg["num_ent"], jnp.int32)
    ent_iob_idxs = jax.random.randint(ks[3], (B, T), 0, cfg["num_ent_iob"], jnp.int32)

    (x_span, span_lens), (x_tbe, lstm_out, valid) = lstm_encoder_forward(
        params, cfg, word_idxs, pos_idxs, dep_idxs, ent_idxs, ent_iob_idxs,
        return_internals=True)

    jax.block_until_ready(x_span)
    jax.block_until_ready(span_lens)

    H = cfg["lstm_dim"] // 2
    sen_lens = span_lens + 2

    # 1) Pallas bi-LSTM vs numerics-matched JAX reference
    ref_out = _ref_bilstm(x_tbe, sen_lens, params["lstm"], H)
    np.testing.assert_allclose(np.asarray(lstm_out), np.asarray(ref_out),
                               rtol=2e-2, atol=2e-2)

    # 2) span kernel + on-device packing vs direct numpy replication of torch
    lstm_np = np.asarray(lstm_out)                 # (T', B, 2H)
    valid_np = np.asarray(valid)                   # (B, L1)
    Tm = lstm_np.shape[0]
    L1 = Tm - 1
    S = x_span.shape[1]
    fwd_np, bwd_np = lstm_np[..., :H], lstm_np[..., H:]
    x_span_ref = np.zeros((B, S, 2 * H), np.float32)
    for b in range(B):
        rows = []
        for i in range(L1):
            for j in range(L1):
                if j > i and valid_np[b, j]:
                    rows.append(np.concatenate(
                        [fwd_np[j, b] - fwd_np[i, b],
                         bwd_np[i + 1, b] - bwd_np[j + 1, b]]))
        if rows:
            x_span_ref[b, :len(rows)] = np.stack(rows)
    np.testing.assert_allclose(np.asarray(x_span), x_span_ref, rtol=1e-5, atol=1e-5)

    assert x_span.shape == (B, 21, cfg["lstm_dim"])
    assert span_lens.shape == (B,)
    np.testing.assert_array_equal(np.asarray(span_lens), np.array([6, 3]))
    print("KERNEL_OK")
</pallas_src>

<mosaic_0001>
module attributes {stable_mosaic.version = 11 : i64} {
  func.func @_bilstm_chunk_kernel(%arg0: i32, %arg1: i32, %arg2: memref<8x8x512xbf16, #tpu.memory_space<vmem>>, %arg3: memref<1x128x512xbf16, #tpu.memory_space<vmem>>, %arg4: memref<8x1xi32, #tpu.memory_space<vmem>>, %arg5: memref<8x8x128xf32, #tpu.memory_space<vmem>>, %arg6: memref<8x128xf32, #tpu.memory_space<vmem>>, %arg7: memref<8x128xf32, #tpu.memory_space<vmem>>) attributes {dimension_semantics = [#tpu.dimension_semantics<parallel>, #tpu.dimension_semantics<arbitrary>], iteration_bounds = array<i64: 2, 1>, scalar_prefetch = 0 : i64, scratch_operands = 2 : i64, tpu.core_type = #tpu.core_type<tc>, window_params = [{transform_indices = @transform_0, window_bounds = array<i64: 8, 8, 512>}, {transform_indices = @transform_1, window_bounds = array<i64: 1, 128, 512>}, {pipeline_mode = #tpu.pipeline_mode<synchronous>, transform_indices = @transform_2, window_bounds = array<i64: 8, 1>}, {transform_indices = @transform_3, window_bounds = array<i64: 8, 8, 128>}]} {
    %c0_i32 = arith.constant 0 : i32
    %0 = arith.cmpi eq, %arg1, %c0_i32 : i32
    %1 = arith.extui %0 : i1 to i32
    %c0_i32_0 = arith.constant 0 : i32
    %2 = arith.cmpi ne, %1, %c0_i32_0 : i32
    scf.if %2 {
      %cst_192 = arith.constant 0.000000e+00 : f32
      %483 = vector.broadcast %cst_192 : f32 to vector<8x128xf32>
      %c0_193 = arith.constant 0 : index
      %c0_194 = arith.constant 0 : index
      %484 = vector.load %arg6[%c0_193, %c0_194] : memref<8x128xf32, #tpu.memory_space<vmem>>, vector<8x128xf32>
      tpu.vector_store %arg6[%c0_193, %c0_194], %483 {strides = array<i32>} : memref<8x128xf32, #tpu.memory_space<vmem>>, vector<8x128xf32>,
      %cst_195 = arith.constant 0.000000e+00 : f32
      %485 = vector.broadcast %cst_195 : f32 to vector<8x128xf32>
      %c0_196 = arith.constant 0 : index
      %c0_197 = arith.constant 0 : index
      %486 = vector.load %arg7[%c0_196, %c0_197] : memref<8x128xf32, #tpu.memory_space<vmem>>, vector<8x128xf32>
      tpu.vector_store %arg7[%c0_196, %c0_197], %485 {strides = array<i32>} : memref<8x128xf32, #tpu.memory_space<vmem>>, vector<8x128xf32>,
    } else {
    }
    %c0 = arith.constant 0 : index
    %c0_1 = arith.constant 0 : index
    %c0_2 = arith.constant 0 : index
    %3 = vector.load %arg3[%c0, %c0_1, %c0_2] : memref<1x128x512xbf16, #tpu.memory_space<vmem>>, vector<1x128x512xbf16>
    %4 = vector.shape_cast %3 : vector<1x128x512xbf16> to vector<128x512xbf16>
    %c0_3 = arith.constant 0 : index
    %c0_4 = arith.constant 0 : index
    %5 = vector.load %arg4[%c0_3, %c0_4] : memref<8x1xi32, #tpu.memory_space<vmem>>, vector<8x1xi32>
    %c2_i32 = arith.constant 2 : i32
    %6 = arith.muli %c2_i32, %arg1 : i32
    %c0_i32_5 = arith.constant 0 : i32
    %7 = arith.subi %c0_i32_5, %6 : i32
    %8 = arith.muli %arg0, %7 : i32
    %9 = arith.addi %arg1, %8 : i32
    %c8_i32 = arith.constant 8 : i32
    %10 = arith.muli %9, %c8_i32 : i32
    %c0_i32_6 = arith.constant 0 : i32
    %c2_i32_7 = arith.constant 2 : i32
    %11 = arith.muli %c2_i32_7, %c0_i32_6 : i32
    %c7_i32 = arith.constant 7 : i32
    %12 = arith.subi %c7_i32, %11 : i32
    %13 = arith.muli %arg0, %12 : i32
    %14 = arith.addi %c0_i32_6, %13 : i32
    %15 = arith.index_cast %14 : i32 to index
    %c0_8 = arith.constant 0 : index
    %c0_9 = arith.constant 0 : index
    %16 = vector.load %arg2[%15, %c0_8, %c0_9] : memref<8x8x512xbf16, #tpu.memory_space<vmem>>, vector<1x8x512xbf16>
    %17 = vector.shape_cast %16 : vector<1x8x512xbf16> to vector<8x512xbf16>
    %18 = arith.extf %17 : vector<8x512xbf16> to vector<8x512xf32>
    %c0_10 = arith.constant 0 : index
    %c0_11 = arith.constant 0 : index
    %19 = vector.load %arg6[%c0_10, %c0_11] : memref<8x128xf32, #tpu.memory_space<vmem>>, vector<8x128xf32>
    %20 = arith.truncf %19 : vector<8x128xf32> to vector<8x128xbf16>
    %cst = arith.constant dense<0.000000e+00> : vector<8x512xf32>
    %21 = tpu.matmul %20, %4, %cst {dimension_numbers = #tpu.dot_dimension_numbers<[1], [0], [0], [1], [0, 0, 1, 1], [], []>} : vector<8x128xbf16>, vector<128x512xbf16>, vector<8x512xf32> -> vector<8x512xf32>
    %22 = arith.addf %18, %21 : vector<8x512xf32>
    %23 = vector.extract_strided_slice %22 {offsets = [0, 0], sizes = [8, 128], strides = [1, 1]} : vector<8x512xf32> to vector<8x128xf32>
    %24 = arith.negf %23 : vector<8x128xf32>
    %25 = math.exp %24 : vector<8x128xf32>
    %cst_12 = arith.constant 1.000000e+00 : f32
    %26 = vector.broadcast %cst_12 : f32 to vector<8x128xf32>
    %27 = arith.addf %26, %25 : vector<8x128xf32>
    %28 = arith.divf %26, %27 : vector<8x128xf32>
    %29 = vector.extract_strided_slice %22 {offsets = [0, 128], sizes = [8, 128], strides = [1, 1]} : vector<8x512xf32> to vector<8x128xf32>
    %30 = arith.negf %29 : vector<8x128xf32>
    %31 = math.exp %30 : vector<8x128xf32>
    %cst_13 = arith.constant 1.000000e+00 : f32
    %32 = vector.broadcast %cst_13 : f32 to vector<8x128xf32>
    %33 = arith.addf %32, %31 : vector<8x128xf32>
    %34 = arith.divf %32, %33 : vector<8x128xf32>
    %35 = vector.extract_strided_slice %22 {offsets = [0, 256], sizes = [8, 128], strides = [1, 1]} : vector<8x512xf32> to vector<8x128xf32>
    %36 = math.tanh %35 : vector<8x128xf32>
    %37 = vector.extract_strided_slice %22 {offsets = [0, 384], sizes = [8, 128], strides = [1, 1]} : vector<8x512xf32> to vector<8x128xf32>
    %38 = arith.negf %37 : vector<8x128xf32>
    %39 = math.exp %38 : vector<8x128xf32>
    %cst_14 = arith.constant 1.000000e+00 : f32
    %40 = vector.broadcast %cst_14 : f32 to vector<8x128xf32>
    %41 = arith.addf %40, %39 : vector<8x128xf32>
    %42 = arith.divf %40, %41 : vector<8x128xf32>
    %c0_15 = arith.constant 0 : index
    %c0_16 = arith.constant 0 : index
    %43 = vector.load %arg7[%c0_15, %c0_16] : memref<8x128xf32, #tpu.memory_space<vmem>>, vector<8x128xf32>
    %44 = arith.mulf %34, %43 : vector<8x128xf32>
    %45 = arith.mulf %28, %36 : vector<8x128xf32>
    %46 = arith.addf %44, %45 : vector<8x128xf32>
    %47 = math.tanh %46 : vector<8x128xf32>
    %48 = arith.mulf %42, %47 : vector<8x128xf32>
    %49 = arith.addi %10, %14 : i32
    %50 = vector.broadcast %49 : i32 to vector<8x1xi32>
    %51 = arith.cmpi slt, %50, %5 : vector<8x1xi32>
    %c0_17 = arith.constant 0 : index
    %c0_18 = arith.constant 0 : index
    %52 = vector.load %arg7[%c0_17, %c0_18] : memref<8x128xf32, #tpu.memory_space<vmem>>, vector<8x128xf32>
    %53 = vector.shape_cast %51 : vector<8x1xi1> to vector<8x1xi1>
    %54 = vector.broadcast %53 : vector<8x1xi1> to vector<8x128xi1>
    %55 = arith.select %54, %46, %52 : vector<8x128xi1>, vector<8x128xf32>
    %c0_19 = arith.constant 0 : index
    %c0_20 = arith.constant 0 : index
    %56 = vector.load %arg7[%c0_19, %c0_20] : memref<8x128xf32, #tpu.memory_space<vmem>>, vector<8x128xf32>
    tpu.vector_store %arg7[%c0_19, %c0_20], %55 {strides = array<i32>} : memref<8x128xf32, #tpu.memory_space<vmem>>, vector<8x128xf32>,
    %c0_21 = arith.constant 0 : index
    %c0_22 = arith.constant 0 : index
    %57 = vector.load %arg6[%c0_21, %c0_22] : memref<8x128xf32, #tpu.memory_space<vmem>>, vector<8x128xf32>
    %58 = vector.shape_cast %51 : vector<8x1xi1> to vector<8x1xi1>
    %59 = vector.broadcast %58 : vector<8x1xi1> to vector<8x128xi1>
    %60 = arith.select %59, %48, %57 : vector<8x128xi1>, vector<8x128xf32>
    %c0_23 = arith.constant 0 : index
    %c0_24 = arith.constant 0 : index
    %61 = vector.load %arg6[%c0_23, %c0_24] : memref<8x128xf32, #tpu.memory_space<vmem>>, vector<8x128xf32>
    tpu.vector_store %arg6[%c0_23, %c0_24], %60 {strides = array<i32>} : memref<8x128xf32, #tpu.memory_space<vmem>>, vector<8x128xf32>,
    %cst_25 = arith.constant 0.000000e+00 : f32
    %62 = vector.shape_cast %51 : vector<8x1xi1> to vector<8x1xi1>
    %63 = vector.broadcast %62 : vector<8x1xi1> to vector<8x128xi1>
    %64 = vector.broadcast %cst_25 : f32 to vector<8x128xf32>
    %65 = arith.select %63, %48, %64 : vector<8x128xi1>, vector<8x128xf32>
    %66 = arith.index_cast %14 : i32 to index
    %c0_26 = arith.constant 0 : index
    %c0_27 = arith.constant 0 : index
    %67 = vector.load %arg5[%66, %c0_26, %c0_27] : memref<8x8x128xf32, #tpu.memory_space<vmem>>, vector<1x8x128xf32>
    %68 = vector.shape_cast %67 : vector<1x8x128xf32> to vector<8x128xf32>
    %69 = vector.shape_cast %65 : vector<8x128xf32> to vector<1x8x128xf32>
    tpu.vector_store %arg5[%66, %c0_26, %c0_27], %69 {strides = array<i32>} : memref<8x8x128xf32, #tpu.memory_space<vmem>>, vector<1x8x128xf32>,
    %c1_i32 = arith.constant 1 : i32
    %c2_i32_28 = arith.constant 2 : i32
    %70 = arith.muli %c2_i32_28, %c1_i32 : i32
    %c7_i32_29 = arith.constant 7 : i32
    %71 = arith.subi %c7_i32_29, %70 : i32
    %72 = arith.muli %arg0, %71 : i32
    %73 = arith.addi %c1_i32, %72 : i32
    %74 = arith.index_cast %73 : i32 to index
    %c0_30 = arith.constant 0 : index
    %c0_31 = arith.constant 0 : index
    %75 = vector.load %arg2[%74, %c0_30, %c0_31] : memref<8x8x512xbf16, #tpu.memory_space<vmem>>, vector<1x8x512xbf16>
    %76 = vector.shape_cast %75 : vector<1x8x512xbf16> to vector<8x512xbf16>
    %77 = arith.extf %76 : vector<8x512xbf16> to vector<8x512xf32>
    %c0_32 = arith.constant 0 : index
    %c0_33 = arith.constant 0 : index
    %78 = vector.load %arg6[%c0_32, %c0_33] : memref<8x128xf32, #tpu.memory_space<vmem>>, vector<8x128xf32>
    %79 = arith.truncf %78 : vector<8x128xf32> to vector<8x128xbf16>
    %cst_34 = arith.constant dense<0.000000e+00> : vector<8x512xf32>
    %80 = tpu.matmul %79, %4, %cst_34 {dimension_numbers = #tpu.dot_dimension_numbers<[1], [0], [0], [1], [0, 0, 1, 1], [], []>} : vector<8x128xbf16>, vector<128x512xbf16>, vector<8x512xf32> -> vector<8x512xf32>
    %81 = arith.addf %77, %80 : vector<8x512xf32>
    %82 = vector.extract_strided_slice %81 {offsets = [0, 0], sizes = [8, 128], strides = [1, 1]} : vector<8x512xf32> to vector<8x128xf32>
    %83 = arith.negf %82 : vector<8x128xf32>
    %84 = math.exp %83 : vector<8x128xf32>
    %cst_35 = arith.constant 1.000000e+00 : f32
    %85 = vector.broadcast %cst_35 : f32 to vector<8x128xf32>
    %86 = arith.addf %85, %84 : vector<8x128xf32>
    %87 = arith.divf %85, %86 : vector<8x128xf32>
    %88 = vector.extract_strided_slice %81 {offsets = [0, 128], sizes = [8, 128], strides = [1, 1]} : vector<8x512xf32> to vector<8x128xf32>
    %89 = arith.negf %88 : vector<8x128xf32>
    %90 = math.exp %89 : vector<8x128xf32>
    %cst_36 = arith.constant 1.000000e+00 : f32
    %91 = vector.broadcast %cst_36 : f32 to vector<8x128xf32>
    %92 = arith.addf %91, %90 : vector<8x128xf32>
    %93 = arith.divf %91, %92 : vector<8x128xf32>
    %94 = vector.extract_strided_slice %81 {offsets = [0, 256], sizes = [8, 128], strides = [1, 1]} : vector<8x512xf32> to vector<8x128xf32>
    %95 = math.tanh %94 : vector<8x128xf32>
    %96 = vector.extract_strided_slice %81 {offsets = [0, 384], sizes = [8, 128], strides = [1, 1]} : vector<8x512xf32> to vector<8x128xf32>
    %97 = arith.negf %96 : vector<8x128xf32>
    %98 = math.exp %97 : vector<8x128xf32>
    %cst_37 = arith.constant 1.000000e+00 : f32
    %99 = vector.broadcast %cst_37 : f32 to vector<8x128xf32>
    %100 = arith.addf %99, %98 : vector<8x128xf32>
    %101 = arith.divf %99, %100 : vector<8x128xf32>
    %c0_38 = arith.constant 0 : index
    %c0_39 = arith.constant 0 : index
    %102 = vector.load %arg7[%c0_38, %c0_39] : memref<8x128xf32, #tpu.memory_space<vmem>>, vector<8x128xf32>
    %103 = arith.mulf %93, %102 : vector<8x128xf32>
    %104 = arith.mulf %87, %95 : vector<8x128xf32>
    %105 = arith.addf %103, %104 : vector<8x128xf32>
    %106 = math.tanh %105 : vector<8x128xf32>
    %107 = arith.mulf %101, %106 : vector<8x128xf32>
    %108 = arith.addi %10, %73 : i32
    %109 = vector.broadcast %108 : i32 to vector<8x1xi32>
    %110 = arith.cmpi slt, %109, %5 : vector<8x1xi32>
    %c0_40 = arith.constant 0 : index
    %c0_41 = arith.constant 0 : index
    %111 = vector.load %arg7[%c0_40, %c0_41] : memref<8x128xf32, #tpu.memory_space<vmem>>, vector<8x128xf32>
    %112 = vector.shape_cast %110 : vector<8x1xi1> to vector<8x1xi1>
    %113 = vector.broadcast %112 : vector<8x1xi1> to vector<8x128xi1>
    %114 = arith.select %113, %105, %111 : vector<8x128xi1>, vector<8x128xf32>
    %c0_42 = arith.constant 0 : index
    %c0_43 = arith.constant 0 : index
    %115 = vector.load %arg7[%c0_42, %c0_43] : memref<8x128xf32, #tpu.memory_space<vmem>>, vector<8x128xf32>
    tpu.vector_store %arg7[%c0_42, %c0_43], %114 {strides = array<i32>} : memref<8x128xf32, #tpu.memory_space<vmem>>, vector<8x128xf32>,
    %c0_44 = arith.constant 0 : index
    %c0_45 = arith.constant 0 : index
    %116 = vector.load %arg6[%c0_44, %c0_45] : memref<8x128xf32, #tpu.memory_space<vmem>>, vector<8x128xf32>
    %117 = vector.shape_cast %110 : vector<8x1xi1> to vector<8x1xi1>
    %118 = vector.broadcast %117 : vector<8x1xi1> to vector<8x128xi1>
    %119 = arith.select %118, %107, %116 : vector<8x128xi1>, vector<8x128xf32>
    %c0_46 = arith.constant 0 : index
    %c0_47 = arith.constant 0 : index
    %120 = vector.load %arg6[%c0_46, %c0_47] : memref<8x128xf32, #tpu.memory_space<vmem>>, vector<8x128xf32>
    tpu.vector_store %arg6[%c0_46, %c0_47], %119 {strides = array<i32>} : memref<8x128xf32, #tpu.memory_space<vmem>>, vector<8x128xf32>,
    %cst_48 = arith.constant 0.000000e+00 : f32
    %121 = vector.shape_cast %110 : vector<8x1xi1> to vector<8x1xi1>
    %122 = vector.broadcast %121 : vector<8x1xi1> to vector<8x128xi1>
    %123 = vector.broadcast %cst_48 : f32 to vector<8x128xf32>
    %124 = arith.select %122, %107, %123 : vector<8x128xi1>, vector<8x128xf32>
    %125 = arith.index_cast %73 : i32 to index
    %c0_49 = arith.constant 0 : index
    %c0_50 = arith.constant 0 : index
    %126 = vector.load %arg5[%125, %c0_49, %c0_50] : memref<8x8x128xf32, #tpu.memory_space<vmem>>, vector<1x8x128xf32>
    %127 = vector.shape_cast %126 : vector<1x8x128xf32> to vector<8x128xf32>
    %128 = vector.shape_cast %124 : vector<8x128xf32> to vector<1x8x128xf32>
    tpu.vector_store %arg5[%125, %c0_49, %c0_50], %128 {strides = array<i32>} : memref<8x8x128xf32, #tpu.memory_space<vmem>>, vector<1x8x128xf32>,
    %c2_i32_51 = arith.constant 2 : i32
    %c2_i32_52 = arith.constant 2 : i32
    %129 = arith.muli %c2_i32_52, %c2_i32_51 : i32
    %c7_i32_53 = arith.constant 7 : i32
    %130 = arith.subi %c7_i32_53, %129 : i32
    %131 = arith.muli %arg0, %130 : i32
    %132 = arith.addi %c2_i32_51, %131 : i32
    %133 = arith.index_cast %132 : i32 to index
    %c0_54 = arith.constant 0 : index
    %c0_55 = arith.constant 0 : index
    %134 = vector.load %arg2[%133, %c0_54, %c0_55] : memref<8x8x512xbf16, #tpu.memory_space<vmem>>, vector<1x8x512xbf16>
    %135 = vector.shape_cast %134 : vector<1x8x512xbf16> to vector<8x512xbf16>
    %136 = arith.extf %135 : vector<8x512xbf16> to vector<8x512xf32>
    %c0_56 = arith.constant 0 : index
    %c0_57 = arith.constant 0 : index
    %137 = vector.load %arg6[%c0_56, %c0_57] : memref<8x128xf32, #tpu.memory_space<vmem>>, vector<8x128xf32>
    %138 = arith.truncf %137 : vector<8x128xf32> to vector<8x128xbf16>
    %cst_58 = arith.constant dense<0.000000e+00> : vector<8x512xf32>
    %139 = tpu.matmul %138, %4, %cst_58 {dimension_numbers = #tpu.dot_dimension_numbers<[1], [0], [0], [1], [0, 0, 1, 1], [], []>} : vector<8x128xbf16>, vector<128x512xbf16>, vector<8x512xf32> -> vector<8x512xf32>
    %140 = arith.addf %136, %139 : vector<8x512xf32>
    %141 = vector.extract_strided_slice %140 {offsets = [0, 0], sizes = [8, 128], strides = [1, 1]} : vector<8x512xf32> to vector<8x128xf32>
    %142 = arith.negf %141 : vector<8x128xf32>
    %143 = math.exp %142 : vector<8x128xf32>
    %cst_59 = arith.constant 1.000000e+00 : f32
    %144 = vector.broadcast %cst_59 : f32 to vector<8x128xf32>
    %145 = arith.addf %144, %143 : vector<8x128xf32>
    %146 = arith.divf %144, %145 : vector<8x128xf32>
    %147 = vector.extract_strided_slice %140 {offsets = [0, 128], sizes = [8, 128], strides = [1, 1]} : vector<8x512xf32> to vector<8x128xf32>
    %148 = arith.negf %147 : vector<8x128xf32>
    %149 = math.exp %148 : vector<8x128xf32>
    %cst_60 = arith.constant 1.000000e+00 : f32
    %150 = vector.broadcast %cst_60 : f32 to vector<8x128xf32>
    %151 = arith.addf %150, %149 : vector<8x128xf32>
    %152 = arith.divf %150, %151 : vector<8x128xf32>
    %153 = vector.extract_strided_slice %140 {offsets = [0, 256], sizes = [8, 128], strides = [1, 1]} : vector<8x512xf32> to vector<8x128xf32>
    %154 = math.tanh %153 : vector<8x128xf32>
    %155 = vector.extract_strided_slice %140 {offsets = [0, 384], sizes = [8, 128], strides = [1, 1]} : vector<8x512xf32> to vector<8x128xf32>
    %156 = arith.negf %155 : vector<8x128xf32>
    %157 = math.exp %156 : vector<8x128xf32>
    %cst_61 = arith.constant 1.000000e+00 : f32
    %158 = vector.broadcast %cst_61 : f32 to vector<8x128xf32>
    %159 = arith.addf %158, %157 : vector<8x128xf32>
    %160 = arith.divf %158, %159 : vector<8x128xf32>
    %c0_62 = arith.constant 0 : index
    %c0_63 = arith.constant 0 : index
    %161 = vector.load %arg7[%c0_62, %c0_63] : memref<8x128xf32, #tpu.memory_space<vmem>>, vector<8x128xf32>
    %162 = arith.mulf %152, %161 : vector<8x128xf32>
    %163 = arith.mulf %146, %154 : vector<8x128xf32>
    %164 = arith.addf %162, %163 : vector<8x128xf32>
    %165 = math.tanh %164 : vector<8x128xf32>
    %166 = arith.mulf %160, %165 : vector<8x128xf32>
    %167 = arith.addi %10, %132 : i32
    %168 = vector.broadcast %167 : i32 to vector<8x1xi32>
    %169 = arith.cmpi slt, %168, %5 : vector<8x1xi32>
    %c0_64 = arith.constant 0 : index
    %c0_65 = arith.constant 0 : index
    %170 = vector.load %arg7[%c0_64, %c0_65] : memref<8x128xf32, #tpu.memory_space<vmem>>, vector<8x128xf32>
    %171 = vector.shape_cast %169 : vector<8x1xi1> to vector<8x1xi1>
    %172 = vector.broadcast %171 : vector<8x1xi1> to vector<8x128xi1>
    %173 = arith.select %172, %164, %170 : vector<8x128xi1>, vector<8x128xf32>
    %c0_66 = arith.constant 0 : index
    %c0_67 = arith.constant 0 : index
    %174 = vector.load %arg7[%c0_66, %c0_67] : memref<8x128xf32, #tpu.memory_space<vmem>>, vector<8x128xf32>
    tpu.vector_store %arg7[%c0_66, %c0_67], %173 {strides = array<i32>} : memref<8x128xf32, #tpu.memory_space<vmem>>, vector<8x128xf32>,
    %c0_68 = arith.constant 0 : index
    %c0_69 = arith.constant 0 : index
    %175 = vector.load %arg6[%c0_68, %c0_69] : memref<8x128xf32, #tpu.memory_space<vmem>>, vector<8x128xf32>
    %176 = vector.shape_cast %169 : vector<8x1xi1> to vector<8x1xi1>
    %177 = vector.broadcast %176 : vector<8x1xi1> to vector<8x128xi1>
    %178 = arith.select %177, %166, %175 : vector<8x128xi1>, vector<8x128xf32>
    %c0_70 = arith.constant 0 : index
    %c0_71 = arith.constant 0 : index
    %179 = vector.load %arg6[%c0_70, %c0_71] : memref<8x128xf32, #tpu.memory_space<vmem>>, vector<8x128xf32>
    tpu.vector_store %arg6[%c0_70, %c0_71], %178 {strides = array<i32>} : memref<8x128xf32, #tpu.memory_space<vmem>>, vector<8x128xf32>,
    %cst_72 = arith.constant 0.000000e+00 : f32
    %180 = vector.shape_cast %169 : vector<8x1xi1> to vector<8x1xi1>
    %181 = vector.broadcast %180 : vector<8x1xi1> to vector<8x128xi1>
    %182 = vector.broadcast %cst_72 : f32 to vector<8x128xf32>
    %183 = arith.select %181, %166, %182 : vector<8x128xi1>, vector<8x128xf32>
    %184 = arith.index_cast %132 : i32 to index
    %c0_73 = arith.constant 0 : index
    %c0_74 = arith.constant 0 : index
    %185 = vector.load %arg5[%184, %c0_73, %c0_74] : memref<8x8x128xf32, #tpu.memory_space<vmem>>, vector<1x8x128xf32>
    %186 = vector.shape_cast %185 : vector<1x8x128xf32> to vector<8x128xf32>
    %187 = vector.shape_cast %183 : vector<8x128xf32> to vector<1x8x128xf32>
    tpu.vector_store %arg5[%184, %c0_73, %c0_74], %187 {strides = array<i32>} : memref<8x8x128xf32, #tpu.memory_space<vmem>>, vector<1x8x128xf32>,
    %c3_i32 = arith.constant 3 : i32
    %c2_i32_75 = arith.constant 2 : i32
    %188 = arith.muli %c2_i32_75, %c3_i32 : i32
    %c7_i32_76 = arith.constant 7 : i32
    %189 = arith.subi %c7_i32_76, %188 : i32
    %190 = arith.muli %arg0, %189 : i32
    %191 = arith.addi %c3_i32, %190 : i32
    %192 = arith.index_cast %191 : i32 to index
    %c0_77 = arith.constant 0 : index
    %c0_78 = arith.constant 0 : index
    %193 = vector.load %arg2[%192, %c0_77, %c0_78] : memref<8x8x512xbf16, #tpu.memory_space<vmem>>, vector<1x8x512xbf16>
    %194 = vector.shape_cast %193 : vector<1x8x512xbf16> to vector<8x512xbf16>
    %195 = arith.extf %194 : vector<8x512xbf16> to vector<8x512xf32>
    %c0_79 = arith.constant 0 : index
    %c0_80 = arith.constant 0 : index
    %196 = vector.load %arg6[%c0_79, %c0_80] : memref<8x128xf32, #tpu.memory_space<vmem>>, vector<8x128xf32>
    %197 = arith.truncf %196 : vector<8x128xf32> to vector<8x128xbf16>
    %cst_81 = arith.constant dense<0.000000e+00> : vector<8x512xf32>
    %198 = tpu.matmul %197, %4, %cst_81 {dimension_numbers = #tpu.dot_dimension_numbers<[1], [0], [0], [1], [0, 0, 1, 1], [], []>} : vector<8x128xbf16>, vector<128x512xbf16>, vector<8x512xf32> -> vector<8x512xf32>
    %199 = arith.addf %195, %198 : vector<8x512xf32>
    %200 = vector.extract_strided_slice %199 {offsets = [0, 0], sizes = [8, 128], strides = [1, 1]} : vector<8x512xf32> to vector<8x128xf32>
    %201 = arith.negf %200 : vector<8x128xf32>
    %202 = math.exp %201 : vector<8x128xf32>
    %cst_82 = arith.constant 1.000000e+00 : f32
    %203 = vector.broadcast %cst_82 : f32 to vector<8x128xf32>
    %204 = arith.addf %203, %202 : vector<8x128xf32>
    %205 = arith.divf %203, %204 : vector<8x128xf32>
    %206 = vector.extract_strided_slice %199 {offsets = [0, 128], sizes = [8, 128], strides = [1, 1]} : vector<8x512xf32> to vector<8x128xf32>
    %207 = arith.negf %206 : vector<8x128xf32>
    %208 = math.exp %207 : vector<8x128xf32>
    %cst_83 = arith.constant 1.000000e+00 : f32
    %209 = vector.broadcast %cst_83 : f32 to vector<8x128xf32>
    %210 = arith.addf %209, %208 : vector<8x128xf32>
    %211 = arith.divf %209, %210 : vector<8x128xf32>
    %212 = vector.extract_strided_slice %199 {offsets = [0, 256], sizes = [8, 128], strides = [1, 1]} : vector<8x512xf32> to vector<8x128xf32>
    %213 = math.tanh %212 : vector<8x128xf32>
    %214 = vector.extract_strided_slice %199 {offsets = [0, 384], sizes = [8, 128], strides = [1, 1]} : vector<8x512xf32> to vector<8x128xf32>
    %215 = arith.negf %214 : vector<8x128xf32>
    %216 = math.exp %215 : vector<8x128xf32>
    %cst_84 = arith.constant 1.000000e+00 : f32
    %217 = vector.broadcast %cst_84 : f32 to vector<8x128xf32>
    %218 = arith.addf %217, %216 : vector<8x128xf32>
    %219 = arith.divf %217, %218 : vector<8x128xf32>
    %c0_85 = arith.constant 0 : index
    %c0_86 = arith.constant 0 : index
    %220 = vector.load %arg7[%c0_85, %c0_86] : memref<8x128xf32, #tpu.memory_space<vmem>>, vector<8x128xf32>
    %221 = arith.mulf %211, %220 : vector<8x128xf32>
    %222 = arith.mulf %205, %213 : vector<8x128xf32>
    %223 = arith.addf %221, %222 : vector<8x128xf32>
    %224 = math.tanh %223 : vector<8x128xf32>
    %225 = arith.mulf %219, %224 : vector<8x128xf32>
    %226 = arith.addi %10, %191 : i32
    %227 = vector.broadcast %226 : i32 to vector<8x1xi32>
    %228 = arith.cmpi slt, %227, %5 : vector<8x1xi32>
    %c0_87 = arith.constant 0 : index
    %c0_88 = arith.constant 0 : index
    %229 = vector.load %arg7[%c0_87, %c0_88] : memref<8x128xf32, #tpu.memory_space<vmem>>, vector<8x128xf32>
    %230 = vector.shape_cast %228 : vector<8x1xi1> to vector<8x1xi1>
    %231 = vector.broadcast %230 : vector<8x1xi1> to vector<8x128xi1>
    %232 = arith.select %231, %223, %229 : vector<8x128xi1>, vector<8x128xf32>
    %c0_89 = arith.constant 0 : index
    %c0_90 = arith.constant 0 : index
    %233 = vector.load %arg7[%c0_89, %c0_90] : memref<8x128xf32, #tpu.memory_space<vmem>>, vector<8x128xf32>
    tpu.vector_store %arg7[%c0_89, %c0_90], %232 {strides = array<i32>} : memref<8x128xf32, #tpu.memory_space<vmem>>, vector<8x128xf32>,
    %c0_91 = arith.constant 0 : index
    %c0_92 = arith.constant 0 : index
    %234 = vector.load %arg6[%c0_91, %c0_92] : memref<8x128xf32, #tpu.memory_space<vmem>>, vector<8x128xf32>
    %235 = vector.shape_cast %228 : vector<8x1xi1> to vector<8x1xi1>
    %236 = vector.broadcast %235 : vector<8x1xi1> to vector<8x128xi1>
    %237 = arith.select %236, %225, %234 : vector<8x128xi1>, vector<8x128xf32>
    %c0_93 = arith.constant 0 : index
    %c0_94 = arith.constant 0 : index
    %238 = vector.load %arg6[%c0_93, %c0_94] : memref<8x128xf32, #tpu.memory_space<vmem>>, vector<8x128xf32>
    tpu.vector_store %arg6[%c0_93, %c0_94], %237 {strides = array<i32>} : memref<8x128xf32, #tpu.memory_space<vmem>>, vector<8x128xf32>,
    %cst_95 = arith.constant 0.000000e+00 : f32
    %239 = vector.shape_cast %228 : vector<8x1xi1> to vector<8x1xi1>
    %240 = vector.broadcast %239 : vector<8x1xi1> to vector<8x128xi1>
    %241 = vector.broadcast %cst_95 : f32 to vector<8x128xf32>
    %242 = arith.select %240, %225, %241 : vector<8x128xi1>, vector<8x128xf32>
    %243 = arith.index_cast %191 : i32 to index
    %c0_96 = arith.constant 0 : index
    %c0_97 = arith.constant 0 : index
    %244 = vector.load %arg5[%243, %c0_96, %c0_97] : memref<8x8x128xf32, #tpu.memory_space<vmem>>, vector<1x8x128xf32>
    %245 = vector.shape_cast %244 : vector<1x8x128xf32> to vector<8x128xf32>
    %246 = vector.shape_cast %242 : vector<8x128xf32> to vector<1x8x128xf32>
    tpu.vector_store %arg5[%243, %c0_96, %c0_97], %246 {strides = array<i32>} : memref<8x8x128xf32, #tpu.memory_space<vmem>>, vector<1x8x128xf32>,
    %c4_i32 = arith.constant 4 : i32
    %c2_i32_98 = arith.constant 2 : i32
    %247 = arith.muli %c2_i32_98, %c4_i32 : i32
    %c7_i32_99 = arith.constant 7 : i32
    %248 = arith.subi %c7_i32_99, %247 : i32
    %249 = arith.muli %arg0, %248 : i32
    %250 = arith.addi %c4_i32, %249 : i32
    %251 = arith.index_cast %250 : i32 to index
    %c0_100 = arith.constant 0 : index
    %c0_101 = arith.constant 0 : index
    %252 = vector.load %arg2[%251, %c0_100, %c0_101] : memref<8x8x512xbf16, #tpu.memory_space<vmem>>, vector<1x8x512xbf16>
    %253 = vector.shape_cast %252 : vector<1x8x512xbf16> to vector<8x512xbf16>
    %254 = arith.extf %253 : vector<8x512xbf16> to vector<8x512xf32>
    %c0_102 = arith.constant 0 : index
    %c0_103 = arith.constant 0 : index
    %255 = vector.load %arg6[%c0_102, %c0_103] : memref<8x128xf32, #tpu.memory_space<vmem>>, vector<8x128xf32>
    %256 = arith.truncf %255 : vector<8x128xf32> to vector<8x128xbf16>
    %cst_104 = arith.constant dense<0.000000e+00> : vector<8x512xf32>
    %257 = tpu.matmul %256, %4, %cst_104 {dimension_numbers = #tpu.dot_dimension_numbers<[1], [0], [0], [1], [0, 0, 1, 1], [], []>} : vector<8x128xbf16>, vector<128x512xbf16>, vector<8x512xf32> -> vector<8x512xf32>
    %258 = arith.addf %254, %257 : vector<8x512xf32>
    %259 = vector.extract_strided_slice %258 {offsets = [0, 0], sizes = [8, 128], strides = [1, 1]} : vector<8x512xf32> to vector<8x128xf32>
    %260 = arith.negf %259 : vector<8x128xf32>
    %261 = math.exp %260 : vector<8x128xf32>
    %cst_105 = arith.constant 1.000000e+00 : f32
    %262 = vector.broadcast %cst_105 : f32 to vector<8x128xf32>
    %263 = arith.addf %262, %261 : vector<8x128xf32>
    %264 = arith.divf %262, %263 : vector<8x128xf32>
    %265 = vector.extract_strided_slice %258 {offsets = [0, 128], sizes = [8, 128], strides = [1, 1]} : vector<8x512xf32> to vector<8x128xf32>
    %266 = arith.negf %265 : vector<8x128xf32>
    %267 = math.exp %266 : vector<8x128xf32>
    %cst_106 = arith.constant 1.000000e+00 : f32
    %268 = vector.broadcast %cst_106 : f32 to vector<8x128xf32>
    %269 = arith.addf %268, %267 : vector<8x128xf32>
    %270 = arith.divf %268, %269 : vector<8x128xf32>
    %271 = vector.extract_strided_slice %258 {offsets = [0, 256], sizes = [8, 128], strides = [1, 1]} : vector<8x512xf32> to vector<8x128xf32>
    %272 = math.tanh %271 : vector<8x128xf32>
    %273 = vector.extract_strided_slice %258 {offsets = [0, 384], sizes = [8, 128], strides = [1, 1]} : vector<8x512xf32> to vector<8x128xf32>
    %274 = arith.negf %273 : vector<8x128xf32>
    %275 = math.exp %274 : vector<8x128xf32>
    %cst_107 = arith.constant 1.000000e+00 : f32
    %276 = vector.broadcast %cst_107 : f32 to vector<8x128xf32>
    %277 = arith.addf %276, %275 : vector<8x128xf32>
    %278 = arith.divf %276, %277 : vector<8x128xf32>
    %c0_108 = arith.constant 0 : index
    %c0_109 = arith.constant 0 : index
    %279 = vector.load %arg7[%c0_108, %c0_109] : memref<8x128xf32, #tpu.memory_space<vmem>>, vector<8x128xf32>
    %280 = arith.mulf %270, %279 : vector<8x128xf32>
    %281 = arith.mulf %264, %272 : vector<8x128xf32>
    %282 = arith.addf %280, %281 : vector<8x128xf32>
    %283 = math.tanh %282 : vector<8x128xf32>
    %284 = arith.mulf %278, %283 : vector<8x128xf32>
    %285 = arith.addi %10, %250 : i32
    %286 = vector.broadcast %285 : i32 to vector<8x1xi32>
    %287 = arith.cmpi slt, %286, %5 : vector<8x1xi32>
    %c0_110 = arith.constant 0 : index
    %c0_111 = arith.constant 0 : index
    %288 = vector.load %arg7[%c0_110, %c0_111] : memref<8x128xf32, #tpu.memory_space<vmem>>, vector<8x128xf32>
    %289 = vector.shape_cast %287 : vector<8x1xi1> to vector<8x1xi1>
    %290 = vector.broadcast %289 : vector<8x1xi1> to vector<8x128xi1>
    %291 = arith.select %290, %282, %288 : vector<8x128xi1>, vector<8x128xf32>
    %c0_112 = arith.constant 0 : index
    %c0_113 = arith.constant 0 : index
    %292 = vector.load %arg7[%c0_112, %c0_113] : memref<8x128xf32, #tpu.memory_space<vmem>>, vector<8x128xf32>
    tpu.vector_store %arg7[%c0_112, %c0_113], %291 {strides = array<i32>} : memref<8x128xf32, #tpu.memory_space<vmem>>, vector<8x128xf32>,
    %c0_114 = arith.constant 0 : index
    %c0_115 = arith.constant 0 : index
    %293 = vector.load %arg6[%c0_114, %c0_115] : memref<8x128xf32, #tpu.memory_space<vmem>>, vector<8x128xf32>
    %294 = vector.shape_cast %287 : vector<8x1xi1> to vector<8x1xi1>
    %295 = vector.broadcast %294 : vector<8x1xi1> to vector<8x128xi1>
    %296 = arith.select %295, %284, %293 : vector<8x128xi1>, vector<8x128xf32>
    %c0_116 = arith.constant 0 : index
    %c0_117 = arith.constant 0 : index
    %297 = vector.load %arg6[%c0_116, %c0_117] : memref<8x128xf32, #tpu.memory_space<vmem>>, vector<8x128xf32>
    tpu.vector_store %arg6[%c0_116, %c0_117], %296 {strides = array<i32>} : memref<8x128xf32, #tpu.memory_space<vmem>>, vector<8x128xf32>,
    %cst_118 = arith.constant 0.000000e+00 : f32
    %298 = vector.shape_cast %287 : vector<8x1xi1> to vector<8x1xi1>
    %299 = vector.broadcast %298 : vector<8x1xi1> to vector<8x128xi1>
    %300 = vector.broadcast %cst_118 : f32 to vector<8x128xf32>
    %301 = arith.select %299, %284, %300 : vector<8x128xi1>, vector<8x128xf32>
    %302 = arith.index_cast %250 : i32 to index
    %c0_119 = arith.constant 0 : index
    %c0_120 = arith.constant 0 : index
    %303 = vector.load %arg5[%302, %c0_119, %c0_120] : memref<8x8x128xf32, #tpu.memory_space<vmem>>, vector<1x8x128xf32>
    %304 = vector.shape_cast %303 : vector<1x8x128xf32> to vector<8x128xf32>
    %305 = vector.shape_cast %301 : vector<8x128xf32> to vector<1x8x128xf32>
    tpu.vector_store %arg5[%302, %c0_119, %c0_120], %305 {strides = array<i32>} : memref<8x8x128xf32, #tpu.memory_space<vmem>>, vector<1x8x128xf32>,
    %c5_i32 = arith.constant 5 : i32
    %c2_i32_121 = arith.constant 2 : i32
    %306 = arith.muli %c2_i32_121, %c5_i32 : i32
    %c7_i32_122 = arith.constant 7 : i32
    %307 = arith.subi %c7_i32_122, %306 : i32
    %308 = arith.muli %arg0, %307 : i32
    %309 = arith.addi %c5_i32, %308 : i32
    %310 = arith.index_cast %309 : i32 to index
    %c0_123 = arith.constant 0 : index
    %c0_124 = arith.constant 0 : index
    %311 = vector.load %arg2[%310, %c0_123, %c0_124] : memref<8x8x512xbf16, #tpu.memory_space<vmem>>, vector<1x8x512xbf16>
    %312 = vector.shape_cast %311 : vector<1x8x512xbf16> to vector<8x512xbf16>
    %313 = arith.extf %312 : vector<8x512xbf16> to vector<8x512xf32>
    %c0_125 = arith.constant 0 : index
    %c0_126 = arith.constant 0 : index
    %314 = vector.load %arg6[%c0_125, %c0_126] : memref<8x128xf32, #tpu.memory_space<vmem>>, vector<8x128xf32>
    %315 = arith.truncf %314 : vector<8x128xf32> to vector<8x128xbf16>
    %cst_127 = arith.constant dense<0.000000e+00> : vector<8x512xf32>
    %316 = tpu.matmul %315, %4, %cst_127 {dimension_numbers = #tpu.dot_dimension_numbers<[1], [0], [0], [1], [0, 0, 1, 1], [], []>} : vector<8x128xbf16>, vector<128x512xbf16>, vector<8x512xf32> -> vector<8x512xf32>
    %317 = arith.addf %313, %316 : vector<8x512xf32>
    %318 = vector.extract_strided_slice %317 {offsets = [0, 0], sizes = [8, 128], strides = [1, 1]} : vector<8x512xf32> to vector<8x128xf32>
    %319 = arith.negf %318 : vector<8x128xf32>
    %320 = math.exp %319 : vector<8x128xf32>
    %cst_128 = arith.constant 1.000000e+00 : f32
    %321 = vector.broadcast %cst_128 : f32 to vector<8x128xf32>
    %322 = arith.addf %321, %320 : vector<8x128xf32>
    %323 = arith.divf %321, %322 : vector<8x128xf32>
    %324 = vector.extract_strided_slice %317 {offsets = [0, 128], sizes = [8, 128], strides = [1, 1]} : vector<8x512xf32> to vector<8x128xf32>
    %325 = arith.negf %324 : vector<8x128xf32>
    %326 = math.exp %325 : vector<8x128xf32>
    %cst_129 = arith.constant 1.000000e+00 : f32
    %327 = vector.broadcast %cst_129 : f32 to vector<8x128xf32>
    %328 = arith.addf %327, %326 : vector<8x128xf32>
    %329 = arith.divf %327, %328 : vector<8x128xf32>
    %330 = vector.extract_strided_slice %317 {offsets = [0, 256], sizes = [8, 128], strides = [1, 1]} : vector<8x512xf32> to vector<8x128xf32>
    %331 = math.tanh %330 : vector<8x128xf32>
    %332 = vector.extract_strided_slice %317 {offsets = [0, 384], sizes = [8, 128], strides = [1, 1]} : vector<8x512xf32> to vector<8x128xf32>
    %333 = arith.negf %332 : vector<8x128xf32>
    %334 = math.exp %333 : vector<8x128xf32>
    %cst_130 = arith.constant 1.000000e+00 : f32
    %335 = vector.broadcast %cst_130 : f32 to vector<8x128xf32>
    %336 = arith.addf %335, %334 : vector<8x128xf32>
    %337 = arith.divf %335, %336 : vector<8x128xf32>
    %c0_131 = arith.constant 0 : index
    %c0_132 = arith.constant 0 : index
    %338 = vector.load %arg7[%c0_131, %c0_132] : memref<8x128xf32, #tpu.memory_space<vmem>>, vector<8x128xf32>
    %339 = arith.mulf %329, %338 : vector<8x128xf32>
    %340 = arith.mulf %323, %331 : vector<8x128xf32>
    %341 = arith.addf %339, %340 : vector<8x128xf32>
    %342 = math.tanh %341 : vector<8x128xf32>
    %343 = arith.mulf %337, %342 : vector<8x128xf32>
    %344 = arith.addi %10, %309 : i32
    %345 = vector.broadcast %344 : i32 to vector<8x1xi32>
    %346 = arith.cmpi slt, %345, %5 : vector<8x1xi32>
    %c0_133 = arith.constant 0 : index
    %c0_134 = arith.constant 0 : index
    %347 = vector.load %arg7[%c0_133, %c0_134] : memref<8x128xf32, #tpu.memory_space<vmem>>, vector<8x128xf32>
    %348 = vector.shape_cast %346 : vector<8x1xi1> to vector<8x1xi1>
    %349 = vector.broadcast %348 : vector<8x1xi1> to vector<8x128xi1>
    %350 = arith.select %349, %341, %347 : vector<8x128xi1>, vector<8x128xf32>
    %c0_135 = arith.constant 0 : index
    %c0_136 = arith.constant 0 : index
    %351 = vector.load %arg7[%c0_135, %c0_136] : memref<8x128xf32, #tpu.memory_space<vmem>>, vector<8x128xf32>
    tpu.vector_store %arg7[%c0_135, %c0_136], %350 {strides = array<i32>} : memref<8x128xf32, #tpu.memory_space<vmem>>, vector<8x128xf32>,
    %c0_137 = arith.constant 0 : index
    %c0_138 = arith.constant 0 : index
    %352 = vector.load %arg6[%c0_137, %c0_138] : memref<8x128xf32, #tpu.memory_space<vmem>>, vector<8x128xf32>
    %353 = vector.shape_cast %346 : vector<8x1xi1> to vector<8x1xi1>
    %354 = vector.broadcast %353 : vector<8x1xi1> to vector<8x128xi1>
    %355 = arith.select %354, %343, %352 : vector<8x128xi1>, vector<8x128xf32>
    %c0_139 = arith.constant 0 : index
    %c0_140 = arith.constant 0 : index
    %356 = vector.load %arg6[%c0_139, %c0_140] : memref<8x128xf32, #tpu.memory_space<vmem>>, vector<8x128xf32>
    tpu.vector_store %arg6[%c0_139, %c0_140], %355 {strides = array<i32>} : memref<8x128xf32, #tpu.memory_space<vmem>>, vector<8x128xf32>,
    %cst_141 = arith.constant 0.000000e+00 : f32
    %357 = vector.shape_cast %346 : vector<8x1xi1> to vector<8x1xi1>
    %358 = vector.broadcast %357 : vector<8x1xi1> to vector<8x128xi1>
    %359 = vector.broadcast %cst_141 : f32 to vector<8x128xf32>
    %360 = arith.select %358, %343, %359 : vector<8x128xi1>, vector<8x128xf32>
    %361 = arith.index_cast %309 : i32 to index
    %c0_142 = arith.constant 0 : index
    %c0_143 = arith.constant 0 : index
    %362 = vector.load %arg5[%361, %c0_142, %c0_143] : memref<8x8x128xf32, #tpu.memory_space<vmem>>, vector<1x8x128xf32>
    %363 = vector.shape_cast %362 : vector<1x8x128xf32> to vector<8x128xf32>
    %364 = vector.shape_cast %360 : vector<8x128xf32> to vector<1x8x128xf32>
    tpu.vector_store %arg5[%361, %c0_142, %c0_143], %364 {strides = array<i32>} : memref<8x8x128xf32, #tpu.memory_space<vmem>>, vector<1x8x128xf32>,
    %c6_i32 = arith.constant 6 : i32
    %c2_i32_144 = arith.constant 2 : i32
    %365 = arith.muli %c2_i32_144, %c6_i32 : i32
    %c7_i32_145 = arith.constant 7 : i32
    %366 = arith.subi %c7_i32_145, %365 : i32
    %367 = arith.muli %arg0, %366 : i32
    %368 = arith.addi %c6_i32, %367 : i32
    %369 = arith.index_cast %368 : i32 to index
    %c0_146 = arith.constant 0 : index
    %c0_147 = arith.constant 0 : index
    %370 = vector.load %arg2[%369, %c0_146, %c0_147] : memref<8x8x512xbf16, #tpu.memory_space<vmem>>, vector<1x8x512xbf16>
    %371 = vector.shape_cast %370 : vector<1x8x512xbf16> to vector<8x512xbf16>
    %372 = arith.extf %371 : vector<8x512xbf16> to vector<8x512xf32>
    %c0_148 = arith.constant 0 : index
    %c0_149 = arith.constant 0 : index
    %373 = vector.load %arg6[%c0_148, %c0_149] : memref<8x128xf32, #tpu.memory_space<vmem>>, vector<8x128xf32>
    %374 = arith.truncf %373 : vector<8x128xf32> to vector<8x128xbf16>
    %cst_150 = arith.constant dense<0.000000e+00> : vector<8x512xf32>
    %375 = tpu.matmul %374, %4, %cst_150 {dimension_numbers = #tpu.dot_dimension_numbers<[1], [0], [0], [1], [0, 0, 1, 1], [], []>} : vector<8x128xbf16>, vector<128x512xbf16>, vector<8x512xf32> -> vector<8x512xf32>
    %376 = arith.addf %372, %375 : vector<8x512xf32>
    %377 = vector.extract_strided_slice %376 {offsets = [0, 0], sizes = [8, 128], strides = [1, 1]} : vector<8x512xf32> to vector<8x128xf32>
    %378 = arith.negf %377 : vector<8x128xf32>
    %379 = math.exp %378 : vector<8x128xf32>
    %cst_151 = arith.constant 1.000000e+00 : f32
    %380 = vector.broadcast %cst_151 : f32 to vector<8x128xf32>
    %381 = arith.addf %380, %379 : vector<8x128xf32>
    %382 = arith.divf %380, %381 : vector<8x128xf32>
    %383 = vector.extract_strided_slice %376 {offsets = [0, 128], sizes = [8, 128], strides = [1, 1]} : vector<8x512xf32> to vector<8x128xf32>
    %384 = arith.negf %383 : vector<8x128xf32>
    %385 = math.exp %384 : vector<8x128xf32>
    %cst_152 = arith.constant 1.000000e+00 : f32
    %386 = vector.broadcast %cst_152 : f32 to vector<8x128xf32>
    %387 = arith.addf %386, %385 : vector<8x128xf32>
    %388 = arith.divf %386, %387 : vector<8x128xf32>
    %389 = vector.extract_strided_slice %376 {offsets = [0, 256], sizes = [8, 128], strides = [1, 1]} : vector<8x512xf32> to vector<8x128xf32>
    %390 = math.tanh %389 : vector<8x128xf32>
    %391 = vector.extract_strided_slice %376 {offsets = [0, 384], sizes = [8, 128], strides = [1, 1]} : vector<8x512xf32> to vector<8x128xf32>
    %392 = arith.negf %391 : vector<8x128xf32>
    %393 = math.exp %392 : vector<8x128xf32>
    %cst_153 = arith.constant 1.000000e+00 : f32
    %394 = vector.broadcast %cst_153 : f32 to vector<8x128xf32>
    %395 = arith.addf %394, %393 : vector<8x128xf32>
    %396 = arith.divf %394, %395 : vector<8x128xf32>
    %c0_154 = arith.constant 0 : index
    %c0_155 = arith.constant 0 : index
    %397 = vector.load %arg7[%c0_154, %c0_155] : memref<8x128xf32, #tpu.memory_space<vmem>>, vector<8x128xf32>
    %398 = arith.mulf %388, %397 : vector<8x128xf32>
    %399 = arith.mulf %382, %390 : vector<8x128xf32>
    %400 = arith.addf %398, %399 : vector<8x128xf32>
    %401 = math.tanh %400 : vector<8x128xf32>
    %402 = arith.mulf %396, %401 : vector<8x128xf32>
    %403 = arith.addi %10, %368 : i32
    %404 = vector.broadcast %403 : i32 to vector<8x1xi32>
    %405 = arith.cmpi slt, %404, %5 : vector<8x1xi32>
    %c0_156 = arith.constant 0 : index
    %c0_157 = arith.constant 0 : index
    %406 = vector.load %arg7[%c0_156, %c0_157] : memref<8x128xf32, #tpu.memory_space<vmem>>, vector<8x128xf32>
    %407 = vector.shape_cast %405 : vector<8x1xi1> to vector<8x1xi1>
    %408 = vector.broadcast %407 : vector<8x1xi1> to vector<8x128xi1>
    %409 = arith.select %408, %400, %406 : vector<8x128xi1>, vector<8x128xf32>
    %c0_158 = arith.constant 0 : index
    %c0_159 = arith.constant 0 : index
    %410 = vector.load %arg7[%c0_158, %c0_159] : memref<8x128xf32, #tpu.memory_space<vmem>>, vector<8x128xf32>
    tpu.vector_store %arg7[%c0_158, %c0_159], %409 {strides = array<i32>} : memref<8x128xf32, #tpu.memory_space<vmem>>, vector<8x128xf32>,
    %c0_160 = arith.constant 0 : index
    %c0_161 = arith.constant 0 : index
    %411 = vector.load %arg6[%c0_160, %c0_161] : memref<8x128xf32, #tpu.memory_space<vmem>>, vector<8x128xf32>
    %412 = vector.shape_cast %405 : vector<8x1xi1> to vector<8x1xi1>
    %413 = vector.broadcast %412 : vector<8x1xi1> to vector<8x128xi1>
    %414 = arith.select %413, %402, %411 : vector<8x128xi1>, vector<8x128xf32>
    %c0_162 = arith.constant 0 : index
    %c0_163 = arith.constant 0 : index
    %415 = vector.load %arg6[%c0_162, %c0_163] : memref<8x128xf32, #tpu.memory_space<vmem>>, vector<8x128xf32>
    tpu.vector_store %arg6[%c0_162, %c0_163], %414 {strides = array<i32>} : memref<8x128xf32, #tpu.memory_space<vmem>>, vector<8x128xf32>,
    %cst_164 = arith.constant 0.000000e+00 : f32
    %416 = vector.shape_cast %405 : vector<8x1xi1> to vector<8x1xi1>
    %417 = vector.broadcast %416 : vector<8x1xi1> to vector<8x128xi1>
    %418 = vector.broadcast %cst_164 : f32 to vector<8x128xf32>
    %419 = arith.select %417, %402, %418 : vector<8x128xi1>, vector<8x128xf32>
    %420 = arith.index_cast %368 : i32 to index
    %c0_165 = arith.constant 0 : index
    %c0_166 = arith.constant 0 : index
    %421 = vector.load %arg5[%420, %c0_165, %c0_166] : memref<8x8x128xf32, #tpu.memory_space<vmem>>, vector<1x8x128xf32>
    %422 = vector.shape_cast %421 : vector<1x8x128xf32> to vector<8x128xf32>
    %423 = vector.shape_cast %419 : vector<8x128xf32> to vector<1x8x128xf32>
    tpu.vector_store %arg5[%420, %c0_165, %c0_166], %423 {strides = array<i32>} : memref<8x8x128xf32, #tpu.memory_space<vmem>>, vector<1x8x128xf32>,
    %c7_i32_167 = arith.constant 7 : i32
    %c2_i32_168 = arith.constant 2 : i32
    %424 = arith.muli %c2_i32_168, %c7_i32_167 : i32
    %c7_i32_169 = arith.constant 7 : i32
    %425 = arith.subi %c7_i32_169, %424 : i32
    %426 = arith.muli %arg0, %425 : i32
    %427 = arith.addi %c7_i32_167, %426 : i32
    %428 = arith.index_cast %427 : i32 to index
    %c0_170 = arith.constant 0 : index
    %c0_171 = arith.constant 0 : index
    %429 = vector.load %arg2[%428, %c0_170, %c0_171] : memref<8x8x512xbf16, #tpu.memory_space<vmem>>, vector<1x8x512xbf16>
    %430 = vector.shape_cast %429 : vector<1x8x512xbf16> to vector<8x512xbf16>
    %431 = arith.extf %430 : vector<8x512xbf16> to vector<8x512xf32>
    %c0_172 = arith.constant 0 : index
    %c0_173 = arith.constant 0 : index
    %432 = vector.load %arg6[%c0_172, %c0_173] : memref<8x128xf32, #tpu.memory_space<vmem>>, vector<8x128xf32>
    %433 = arith.truncf %432 : vector<8x128xf32> to vector<8x128xbf16>
    %cst_174 = arith.constant dense<0.000000e+00> : vector<8x512xf32>
    %434 = tpu.matmul %433, %4, %cst_174 {dimension_numbers = #tpu.dot_dimension_numbers<[1], [0], [0], [1], [0, 0, 1, 1], [], []>} : vector<8x128xbf16>, vector<128x512xbf16>, vector<8x512xf32> -> vector<8x512xf32>
    %435 = arith.addf %431, %434 : vector<8x512xf32>
    %436 = vector.extract_strided_slice %435 {offsets = [0, 0], sizes = [8, 128], strides = [1, 1]} : vector<8x512xf32> to vector<8x128xf32>
    %437 = arith.negf %436 : vector<8x128xf32>
    %438 = math.exp %437 : vector<8x128xf32>
    %cst_175 = arith.constant 1.000000e+00 : f32
    %439 = vector.broadcast %cst_175 : f32 to vector<8x128xf32>
    %440 = arith.addf %439, %438 : vector<8x128xf32>
    %441 = arith.divf %439, %440 : vector<8x128xf32>
    %442 = vector.extract_strided_slice %435 {offsets = [0, 128], sizes = [8, 128], strides = [1, 1]} : vector<8x512xf32> to vector<8x128xf32>
    %443 = arith.negf %442 : vector<8x128xf32>
    %444 = math.exp %443 : vector<8x128xf32>
    %cst_176 = arith.constant 1.000000e+00 : f32
    %445 = vector.broadcast %cst_176 : f32 to vector<8x128xf32>
    %446 = arith.addf %445, %444 : vector<8x128xf32>
    %447 = arith.divf %445, %446 : vector<8x128xf32>
    %448 = vector.extract_strided_slice %435 {offsets = [0, 256], sizes = [8, 128], strides = [1, 1]} : vector<8x512xf32> to vector<8x128xf32>
    %449 = math.tanh %448 : vector<8x128xf32>
    %450 = vector.extract_strided_slice %435 {offsets = [0, 384], sizes = [8, 128], strides = [1, 1]} : vector<8x512xf32> to vector<8x128xf32>
    %451 = arith.negf %450 : vector<8x128xf32>
    %452 = math.exp %451 : vector<8x128xf32>
    %cst_177 = arith.constant 1.000000e+00 : f32
    %453 = vector.broadcast %cst_177 : f32 to vector<8x128xf32>
    %454 = arith.addf %453, %452 : vector<8x128xf32>
    %455 = arith.divf %453, %454 : vector<8x128xf32>
    %c0_178 = arith.constant 0 : index
    %c0_179 = arith.constant 0 : index
    %456 = vector.load %arg7[%c0_178, %c0_179] : memref<8x128xf32, #tpu.memory_space<vmem>>, vector<8x128xf32>
    %457 = arith.mulf %447, %456 : vector<8x128xf32>
    %458 = arith.mulf %441, %449 : vector<8x128xf32>
    %459 = arith.addf %457, %458 : vector<8x128xf32>
    %460 = math.tanh %459 : vector<8x128xf32>
    %461 = arith.mulf %455, %460 : vector<8x128xf32>
    %462 = arith.addi %10, %427 : i32
    %463 = vector.broadcast %462 : i32 to vector<8x1xi32>
    %464 = arith.cmpi slt, %463, %5 : vector<8x1xi32>
    %c0_180 = arith.constant 0 : index
    %c0_181 = arith.constant 0 : index
    %465 = vector.load %arg7[%c0_180, %c0_181] : memref<8x128xf32, #tpu.memory_space<vmem>>, vector<8x128xf32>
    %466 = vector.shape_cast %464 : vector<8x1xi1> to vector<8x1xi1>
    %467 = vector.broadcast %466 : vector<8x1xi1> to vector<8x128xi1>
    %468 = arith.select %467, %459, %465 : vector<8x128xi1>, vector<8x128xf32>
    %c0_182 = arith.constant 0 : index
    %c0_183 = arith.constant 0 : index
    %469 = vector.load %arg7[%c0_182, %c0_183] : memref<8x128xf32, #tpu.memory_space<vmem>>, vector<8x128xf32>
    tpu.vector_store %arg7[%c0_182, %c0_183], %468 {strides = array<i32>} : memref<8x128xf32, #tpu.memory_space<vmem>>, vector<8x128xf32>,
    %c0_184 = arith.constant 0 : index
    %c0_185 = arith.constant 0 : index
    %470 = vector.load %arg6[%c0_184, %c0_185] : memref<8x128xf32, #tpu.memory_space<vmem>>, vector<8x128xf32>
    %471 = vector.shape_cast %464 : vector<8x1xi1> to vector<8x1xi1>
    %472 = vector.broadcast %471 : vector<8x1xi1> to vector<8x128xi1>
    %473 = arith.select %472, %461, %470 : vector<8x128xi1>, vector<8x128xf32>
    %c0_186 = arith.constant 0 : index
    %c0_187 = arith.constant 0 : index
    %474 = vector.load %arg6[%c0_186, %c0_187] : memref<8x128xf32, #tpu.memory_space<vmem>>, vector<8x128xf32>
    tpu.vector_store %arg6[%c0_186, %c0_187], %473 {strides = array<i32>} : memref<8x128xf32, #tpu.memory_space<vmem>>, vector<8x128xf32>,
    %cst_188 = arith.constant 0.000000e+00 : f32
    %475 = vector.shape_cast %464 : vector<8x1xi1> to vector<8x1xi1>
    %476 = vector.broadcast %475 : vector<8x1xi1> to vector<8x128xi1>
    %477 = vector.broadcast %cst_188 : f32 to vector<8x128xf32>
    %478 = arith.select %476, %461, %477 : vector<8x128xi1>, vector<8x128xf32>
    %479 = arith.index_cast %427 : i32 to index
    %c0_189 = arith.constant 0 : index
    %c0_190 = arith.constant 0 : index
    %480 = vector.load %arg5[%479, %c0_189, %c0_190] : memref<8x8x128xf32, #tpu.memory_space<vmem>>, vector<1x8x128xf32>
    %481 = vector.shape_cast %480 : vector<1x8x128xf32> to vector<8x128xf32>
    %482 = vector.shape_cast %478 : vector<8x128xf32> to vector<1x8x128xf32>
    tpu.vector_store %arg5[%479, %c0_189, %c0_190], %482 {strides = array<i32>} : memref<8x8x128xf32, #tpu.memory_space<vmem>>, vector<1x8x128xf32>,
    %c8_i32_191 = arith.constant 8 : i32
    return
  }
  func.func @transform_0(%arg0: i32, %arg1: i32) -> (i32, i32, i32) {
    %c2_i32 = arith.constant 2 : i32
    %0 = arith.muli %c2_i32, %arg1 : i32
    %c0_i32 = arith.constant 0 : i32
    %1 = arith.subi %c0_i32, %0 : i32
    %2 = arith.muli %arg0, %1 : i32
    %3 = arith.addi %arg1, %2 : i32
    %c0_i32_0 = arith.constant 0 : i32
    %c0_i32_1 = arith.constant 0 : i32
    return %3, %c0_i32_0, %arg0 : i32, i32, i32
  }
  func.func @transform_1(%arg0: i32, %arg1: i32) -> (i32, i32, i32) {
    %c0_i32 = arith.constant 0 : i32
    %c0_i32_0 = arith.constant 0 : i32
    %c0_i32_1 = arith.constant 0 : i32
    return %arg0, %c0_i32, %c0_i32_0 : i32, i32, i32
  }
  func.func @transform_2(%arg0: i32, %arg1: i32) -> (i32, i32) {
    %c0_i32 = arith.constant 0 : i32
    %c0_i32_0 = arith.constant 0 : i32
    %c0_i32_1 = arith.constant 0 : i32
    return %c0_i32, %c0_i32_0 : i32, i32
  }
  func.func @transform_3(%arg0: i32, %arg1: i32) -> (i32, i32, i32) {
    %c2_i32 = arith.constant 2 : i32
    %0 = arith.muli %c2_i32, %arg1 : i32
    %c0_i32 = arith.constant 0 : i32
    %1 = arith.subi %c0_i32, %0 : i32
    %2 = arith.muli %arg0, %1 : i32
    %3 = arith.addi %arg1, %2 : i32
    %c0_i32_0 = arith.constant 0 : i32
    %c0_i32_1 = arith.constant 0 : i32
    return %3, %c0_i32_0, %arg0 : i32, i32, i32
  }
}

</mosaic_0001>

<bundles_post_ra>
// kernel: tpu_custom_call.1
= control target key start
LH: loop header
LB: loop body
LE: loop exit
PB: predicated region body
PF: predicated region fallthrough
CT: control target
= control target key end

     0   :  { %s3202_s0 = inlined_call_operand.hbm [shape: bf16[8,8,1024], index: 0, kind: input, shape index: {}]   ;;  %s3203_s1 = inlined_call_operand.hbm [shape: bf16[2,128,512], index: 1, kind: input, shape index: {}]   ;;  %s3204_s2 = inlined_call_operand.vmem [shape: s32[8,1], index: 2, kind: input, shape index: {}]   ;;  %s3205_s3 = inlined_call_operand.hbm [shape: f32[8,8,256], index: 3, kind: output, shape index: {}]  }
   0x1   :  { %3206 = sst [smem:[#allocation13_spill]] %s3202_s0 }
   0x2   :  { %8 = vsyncpa [#allocation5], 0 }
   0x3   :  { %10 = vsyncpa [#allocation5 + $0x1], 0 }
   0x4   :  { %11 = vsyncpa [#allocation8], 0 }
   0x5   :  { %13 = vsyncpa [#allocation8 + $0x1], 0 }
   0x6   :  { %14 = vsyncpa [#allocation6], 0 }
   0x7   :  { %16 = vsyncpa [#allocation6 + $0x1], 0  ;;  %s2508_s12 = smov 0   ;;  %s2510_s13 = smov 0  }
   0x8   :  { %s2512_s14 = smov 0   ;;  %s2514_s15 = smov 0  }
   0x9   :  { %s2516_s16 = smov 0   ;;  %s2518_s17 = smov 0  }
   0xa LB: > { %s1871_s18 = sadd.s32 4294967295, %s2478_s17   ;;  %s1872_s19 = sadd.s32 4294967294, %s2478_s17   ;;  %s2478_s17 = sphi %s2518_s17, %s22_s17   ;;  %s2474_s16 = sphi %s2516_s16, %s3217_s16   ;;  %s2470_s15 = sphi %s2514_s15, %s3216_s15   ;;  %s2466_s14 = sphi %s2512_s14, %s3215_s14   ;;  %s2462_s13 = sphi %s2510_s13, %s3214_s13   ;;  %s2458_s12 = sphi %s2508_s12, %s3213_s12  }
   0xb   : > { %s34_s20 = sadd.s32 1, %s2474_s16  ;;  %s51_s21 = sadd.s32 1, %s2466_s14 }
   0xc   : > { %p36_p0 = scmp.ge.s32.totalorder %s34_s20, 2  ;;  %p58_p1 = scmp.ne.s32.totalorder %s2466_s14, %s2462_s13 }
   0xd   : > { %p59_p2 = scmp.eq.s32.totalorder %s2478_s17, 0  ;;  %p64_p3 = scmp.ne.s32.totalorder %s2462_s13, %s2458_s12 }
   0xe   : > { %s3219_s20 = smov (%p36_p0, %s34_s20), 0  ;;  %p65_p5 = scmp.eq.s32.totalorder %s1871_s18, 0 }
   0xf   : > { %p2549_p4 = por %p59_p2, %p58_p1  ;;  %s47_s23 = ssub.s32 %s2474_s16, %s3219_s20 }
  0x10   : > { %p145_p6 = scmp.eq.s32.totalorder %s1871_s18, 1  ;;  %p49_p7 = scmp.eq.s32.totalorder %s47_s23, 0 }
  0x11   : > { %p2555_p8 = por %p65_p5, %p64_p3  ;;  %p151_p10 = scmp.eq.s32.totalorder %s1872_s19, 1 }
  0x12   : > { %p2559_p9 = por %p145_p6, %p58_p1  ;;  %p1874_p12 = scmp.ge.s32.totalorder %s2478_s17, 2 }
  0x13   : > { %s2564_s26 = scalar_select %p49_p7, %s2466_s14, %s51_s21  }
  0x14   : > { %p2566_p11 = por %p151_p10, %p64_p3  ;;  %p2142_p13 = scmp.lt.s32.totalorder %s2478_s17, 2 }
  0x15   : > { %s2573_s28 = sand.u32 1, %s2466_s14   ;;  %s2077_s30 = sshll.u32 %s2474_s16, 4 }
  0x16   : > { %s1875_s29 = sshll.u32 %s2573_s28, 7  ;;  %s3211_s0 = sld [smem:[#allocation13_spill]] }
  0x17   : > { %s178_s7 = scalar_lea.vmem [#allocation4], %s1875_s29  ;;  %p2582_p0 = pnand %p2142_p13, %p2549_p4 }
  0x18   : > { %s193_s8 = sshll.u32 %s178_s7, 4  ;;  %s175_s11 = scalar_lea.sflag [#allocation5], %s2573_s28  ;;  %s194_s8 = int_to_ptr.vmem [resolvable:$true] %s193_s8 }
  0x19   : > { %s2480_s18 = smov 512   ;;  %s2481_s19 = smov 256  }
  0x1a   : > { %s2482_s21 = smov 16   ;;  %p1881_p1 = scmp.ge.s32.totalorder %s2478_s17, 1 }
  0x1b   : > { %p223_p2 = scmp.lt.s32.totalorder %s2478_s17, 3  ;;  %s1878_s23 = sshll.u32 %s2573_s28, 8 }
  0x1c   : > { %s190_s6 = scalar_lea.hbm %s3211_s0, %s2077_s30  ;;  %s2078_s29 = sshll.u32 %s2474_s16, 8 }
  0x1d   : > { %s191_s9 = sshll.u32 %s190_s6, 4  ;;  %p224_p3 = pnand %p1881_p1, %p223_p2  ;;  %s192_s9 = int_to_ptr.hbm [resolvable:$true] %s191_s9 }
  0x1e   : > { %2134 = dma.hbm_to_vmem [thread:$0]  (!%p2582_p0), %s192_s9, 2048, %s194_s8, %s175_s11, %s2480_s18, %s2481_s19, %s2482_s21  }
  0x1f   : > { %s207_s30 = scalar_lea.vmem [#allocation7], %s1878_s23  ;;  %s212_s6 = scalar_lea.hbm %s3203_s1, %s2078_s29 }
  0x20   : > { %s215_s22 = sshll.u32 %s207_s30, 4  ;;  %s213_s7 = sshll.u32 %s212_s6, 4  ;;  %s216_s22 = int_to_ptr.vmem [resolvable:$true] %s215_s22  ;;  %s214_s7 = int_to_ptr.hbm [resolvable:$true] %s213_s7 }
  0x21   : > { %s204_s0 = scalar_lea.sflag [#allocation8], %s2573_s28  ;;  %227 = sbr.rel (%p224_p3) target bundleno = 1462 (0x5b6), region = 32 }
  0x22   : > { %2137 = dma.hbm_to_vmem [thread:$0]  (!%p2582_p0), %s214_s7, 4096, %s216_s22, %s204_s0, %s2481_s19, %s2481_s19, %s2482_s21  }
  0x23   : > { %s2600_s8 = sand.u32 (!%p224_p3), 1, %s2462_s13  }
  0x24   : > { %s1882_s9 = sshll.u32 (!%p224_p3), %s2600_s8, 7  ;;  %s230_s11 = scalar_lea.sflag (!%p224_p3), [#allocation5], %s2600_s8 }
  0x25   : > { %s2604_s18 = scalar_lea.vmem (!%p224_p3), [#allocation4], %s1882_s9 }
  0x26   : > { %2445 = dma.done.wait (%p2555_p8), %s230_s11, 2048  }
  0x27   : > { %2447 = vsyncadd (%p2555_p8), %s230_s11, 4294965248  ;;  %s1883_s0 = sshll.u32 %s2600_s8, 8  ;;  %s240_s28 = scalar_lea.sflag [#allocation8], %s2600_s8 }
  0x28   : > { %s2612_s10 = scalar_lea.vmem [#allocation7], %s1883_s0 }
  0x29   : > { %2449 = dma.done.wait (%p2555_p8), %s240_s28, 4096  }
  0x2a   : > { %2451 = vsyncadd (%p2555_p8), %s240_s28, 4294963200  ;;  %v2001_v0 = vld [vmem:[%s2612_s10 + $0xe0] sm:$0xf]  ;;  %v2109_v1 = vld [vmem:[%s2612_s10 + $0xec] sm:$0xf0]  ;;  %s327_s24 = smul.u32 7, %s2470_s15 }
  0x2b   : > { %v2107_v2 = vld [vmem:[%s2612_s10 + $0xe4] sm:$0xf]  ;;  %v2621_v3 = vor.u32 %v2109_v1, %v2001_v0  ;;  %v2003_v4 = vld [vmem:[%s2612_s10 + $0xf0] sm:$0xf0]  ;;  %v2108_v5 = vld [vmem:[%s2612_s10 + $0xec] sm:$0xf] }
  0x2c   : > { %v2011_v6 = vld [vmem:[%s2612_s10 + $0xf8] sm:$0xf0]  ;;  %v2626_v7 = vor.u32 %v2107_v2, %v2003_v4  ;;  %v1985_v9 = vld [vmem:[%s2612_s10 + $0xc0] sm:$0xf]  ;;  %v2105_v10 = vld [vmem:[%s2612_s10 + $0xcc] sm:$0xf0] }
  0x2d   : > { %v2628_v8 = vor.u32 %v2108_v5, %v2011_v6  ;;  %v2103_v11 = vld [vmem:[%s2612_s10 + $0xc4] sm:$0xf]  ;;  %499 = vmatpush.bf16.msra.mxu0 %v2621_v3  ;;  %v2634_v12 = vor.u32 %v2105_v10, %v1985_v9  ;;  %v1987_v13 = vld [vmem:[%s2612_s10 + $0xd0] sm:$0xf0]  ;;  %v2104_v14 = vld [vmem:[%s2612_s10 + $0xcc] sm:$0xf]  ;;  %v620_v10 = vstv %s327_s24 }
  0x2e   : > { %v1995_v15 = vld [vmem:[%s2612_s10 + $0xd8] sm:$0xf0]  ;;  %512 = vmatpush.bf16.msra.mxu1 %v2626_v7  ;;  %v2641_v16 = vor.u32 %v2103_v11, %v1987_v13  ;;  %v2009_v18 = vld [vmem:[%s2612_s10 + $0xe8] sm:$0xf]  ;;  %v2110_v19 = vld [vmem:[%s2612_s10 + $0xf4] sm:$0xf0] }
  0x2f   : > { %538 = vmatpush.bf16.msra.mxu3 %v2628_v8  ;;  %v2643_v17 = vor.u32 %v2104_v14, %v1995_v15  ;;  %v1969_v20 = vld [vmem:[%s2612_s10 + $0xa0] sm:$0xf]  ;;  %v2648_v21 = vor.u32 %v2110_v19, %v2009_v18  ;;  %v2101_v22 = vld [vmem:[%s2612_s10 + $0xac] sm:$0xf0]  ;;  %v2099_v23 = vld [vmem:[%s2612_s10 + $0xa4] sm:$0xf] }
  0x30   : > { %v1971_v24 = vld [vmem:[%s2612_s10 + $0xb0] sm:$0xf0]  ;;  %v2100_v25 = vld [vmem:[%s2612_s10 + $0xac] sm:$0xf]  ;;  %v1979_v26 = vld [vmem:[%s2612_s10 + $0xb8] sm:$0xf0]  ;;  %v2658_v28 = vor.u32 %v2101_v22, %v1969_v20 }
  0x31   : > { %v1993_v27 = vld [vmem:[%s2612_s10 + $0xc8] sm:$0xf]  ;;  %500 = vmatpush.bf16.msra.mxu0 %v2634_v12  ;;  %525 = vmatpush.bf16.msra.mxu2 %v2648_v21  ;;  %v2106_v29 = vld [vmem:[%s2612_s10 + $0xd4] sm:$0xf0]  ;;  %v1953_v30 = vld [vmem:[%s2612_s10 + $0x80] sm:$0xf]  ;;  %v2665_v32 = vor.u32 %v2099_v23, %v1971_v24  ;;  %v2667_v33 = vor.u32 %v2100_v25, %v1979_v26 }
  0x32   : > { %v2097_v31 = vld [vmem:[%s2612_s10 + $0x8c] sm:$0xf0]  ;;  %513 = vmatpush.bf16.msra.mxu1 %v2641_v16  ;;  %v2669_v34 = vor.u32 %v2106_v29, %v1993_v27  ;;  %v2095_v35 = vld [vmem:[%s2612_s10 + $0x84] sm:$0xf]  ;;  %v1955_v36 = vld [vmem:[%s2612_s10 + $0x90] sm:$0xf0] }
  0x33   : > { %539 = vmatpush.bf16.msra.mxu3 %v2643_v17  ;;  %v2096_v37 = vld [vmem:[%s2612_s10 + $0x8c] sm:$0xf]  ;;  %v1963_v38 = vld [vmem:[%s2612_s10 + $0x98] sm:$0xf0]  ;;  %v1977_v39 = vld [vmem:[%s2612_s10 + $0xa8] sm:$0xf]  ;;  %v2679_v41 = vor.u32 %v2097_v31, %v1953_v30  ;;  %v2687_v45 = vor.u32 %v2095_v35, %v1955_v36 }
  0x34   : > { %v2102_v40 = vld [vmem:[%s2612_s10 + $0xb4] sm:$0xf0]  ;;  %v1937_v43 = vld [vmem:[%s2612_s10 + $0x60] sm:$0xf]  ;;  %v2093_v44 = vld [vmem:[%s2612_s10 + $0x6c] sm:$0xf0]  ;;  %v2689_v46 = vor.u32 %v2096_v37, %v1963_v38 }
  0x35   : > { %501 = vmatpush.bf16.msra.mxu0 %v2658_v28  ;;  %526 = vmatpush.bf16.msra.mxu2 %v2669_v34  ;;  %v2681_v42 = vor.u32 %v2102_v40, %v1977_v39  ;;  %v2091_v47 = vld [vmem:[%s2612_s10 + $0x64] sm:$0xf]  ;;  %v1961_v48 = vld [vmem:[%s2612_s10 + $0x88] sm:$0xf]  ;;  %v2098_v49 = vld [vmem:[%s2612_s10 + $0x94] sm:$0xf0]  ;;  %v2700_v53 = vor.u32 %v2093_v44, %v1937_v43 }
  0x36   : > { %514 = vmatpush.bf16.msra.mxu1 %v2665_v32  ;;  %v1939_v50 = vld [vmem:[%s2612_s10 + $0x70] sm:$0xf0]  ;;  %v2092_v51 = vld [vmem:[%s2612_s10 + $0x6c] sm:$0xf]  ;;  %v1947_v52 = vld [vmem:[%s2612_s10 + $0x78] sm:$0xf0]  ;;  %v2702_v54 = vor.u32 %v2098_v49, %v1961_v48 }
  0x37   : > { %540 = vmatpush.bf16.msra.mxu3 %v2667_v33  ;;  %v1921_v55 = vld [vmem:[%s2612_s10 + $0x40] sm:$0xf]  ;;  %v2089_v56 = vld [vmem:[%s2612_s10 + $0x4c] sm:$0xf0]  ;;  %s636_s19 = smul.u32 5, %s2470_s15  ;;  %v2709_v57 = vor.u32 %v2091_v47, %v1939_v50  ;;  %v2711_v58 = vor.u32 %v2092_v51, %v1947_v52  ;;  %v2483_v20 = vmov 0  }
  0x38   : > { %v2087_v59 = vld [vmem:[%s2612_s10 + $0x44] sm:$0xf]  ;;  %v1945_v60 = vld [vmem:[%s2612_s10 + $0x68] sm:$0xf]  ;;  %v2094_v61 = vld [vmem:[%s2612_s10 + $0x74] sm:$0xf0]  ;;  %v2722_v2 = vor.u32 %v2089_v56, %v1921_v55  ;;  %2200 = vset.pattern.permute.xlu0 %v2483_v20  ;;  %2201 = vset.pattern.permute.xlu1 %v2483_v20 }
  0x39   : > { %502 = vmatpush.bf16.msra.mxu0 %v2679_v41  ;;  %527 = vmatpush.bf16.msra.mxu2 %v2681_v42  ;;  %v1923_v62 = vld [vmem:[%s2612_s10 + $0x50] sm:$0xf0]  ;;  %v2088_v63 = vld [vmem:[%s2612_s10 + $0x4c] sm:$0xf]  ;;  %v1931_v0 = vld [vmem:[%s2612_s10 + $0x58] sm:$0xf0]  ;;  %v2724_v4 = vor.u32 %v2094_v61, %v1945_v60 }
  0x3a   : > { %515 = vmatpush.bf16.msra.mxu1 %v2687_v45  ;;  %v1905_v1 = vld [vmem:[%s2612_s10 + $0x20] sm:$0xf]  ;;  %v2085_v5 = vld [vmem:[%s2612_s10 + $0x2c] sm:$0xf0]  ;;  %v2083_v6 = vld [vmem:[%s2612_s10 + $0x24] sm:$0xf]  ;;  %v2731_v11 = vor.u32 %v2087_v59, %v1923_v62  ;;  %v2733_v13 = vor.u32 %v2088_v63, %v1931_v0  ;;  %2202 = vset.pattern.permute.xlu2 %v2483_v20 }
  0x3b   : > { %541 = vmatpush.bf16.msra.mxu3 %v2689_v46  ;;  %v1907_v9 = vld [vmem:[%s2612_s10 + $0x30] sm:$0xf0]  ;;  %v1929_v14 = vld [vmem:[%s2612_s10 + $0x48] sm:$0xf]  ;;  %v2090_v15 = vld [vmem:[%s2612_s10 + $0x54] sm:$0xf0]  ;;  %v2752_v23 = vor.u32 %v2085_v5, %v1905_v1 }
  0x3c   : > { %v2084_v18 = vld [vmem:[%s2612_s10 + $0x2c] sm:$0xf]  ;;  %v1915_v19 = vld [vmem:[%s2612_s10 + $0x38] sm:$0xf0]  ;;  %v2743_v22 = vld [vmem:[%s3204_s2] sm:$0xff]  ;;  %s637_s29 = sadd.s32 1, %s636_s19  ;;  %v2754_v24 = vor.u32 %v2090_v15, %v1929_v14  ;;  %v2762_v29 = vor.u32 %v2083_v6, %v1907_v9 }
  0x3d   : > { %503 = vmatpush.bf16.msra.mxu0 %v2700_v53  ;;  %528 = vmatpush.bf16.msra.mxu2 %v2702_v54  ;;  %vm621_vm0 = vcmp.lt.s32.totalorder %v620_v10, %v2743_v22  ;;  %v1889_v25 = vld [vmem:[%s2612_s10] sm:$0xf]  ;;  %v2081_v26 = vld [vmem:[%s2612_s10 + $0xc] sm:$0xf0]  ;;  %s1384_s30 = smul.u32 4294967291, %s2470_s15  ;;  %v2764_v30 = vor.u32 %v2084_v18, %v1915_v19  ;;  %v770_v37 = vstv %s637_s29  ;;  %v2484_v56 = vmov 0.0|0.0  }
  0x3e   : > { %516 = vmatpush.bf16.msra.mxu1 %v2709_v57  ;;  %v622_v27 = vsel %vm621_vm0, 1, %v2483_v20  ;;  %v2079_v31 = vld [vmem:[%s2612_s10 + $0x4] sm:$0xf]  ;;  %v1913_v35 = vld [vmem:[%s2612_s10 + $0x28] sm:$0xf]  ;;  %v2774_v43 = vor.u32 %v2081_v26, %v1889_v25  ;;  %vm771_vm1 = vcmp.lt.s32.totalorder %v770_v37, %v2743_v22  ;;  %s2111_s4 = smul.u32 112, %s2470_s15 }
  0x3f   : > { %542 = vmatpush.bf16.msra.mxu3 %v2711_v58  ;;  %v2086_v36 = vld [vmem:[%s2612_s10 + $0x34] sm:$0xf0]  ;;  %v1891_v38 = vld [vmem:[%s2612_s10 + $0x10] sm:$0xf0]  ;;  %v2080_v39 = vld [vmem:[%s2612_s10 + $0xc] sm:$0xf]  ;;  %624 = vperm.xlu0 %2200, %v622_v27  }
  0x40   : > { %v1899_v40 = vld [vmem:[%s2612_s10 + $0x18] sm:$0xf0]  ;;  %v2776_v44 = vor.u32 %v2086_v36, %v1913_v35  ;;  %v2781_v47 = vor.u32 %v2079_v31, %v1891_v38  ;;  %v1897_v49 = vld [vmem:[%s2612_s10 + $0x8] sm:$0xf]  ;;  %v2082_v50 = vld [vmem:[%s2612_s10 + $0x14] sm:$0xf0]  ;;  %s330_s5 = scalar_lea.vmem %s2604_s18, %s2111_s4 [#allocation4] }
  0x41   : > { %504 = vmatpush.bf16.msra.mxu0 %v2722_v2  ;;  %529 = vmatpush.bf16.msra.mxu2 %v2724_v4  ;;  %v2783_v48 = vor.u32 %v2080_v39, %v1899_v40  ;;  %s1385_s22 = sadd.s32 6, %s1384_s30  ;;  %v772_v51 = vsel %vm771_vm1, 1, %v2483_v20  ;;  %v2792_v52 = vor.u32 %v2082_v50, %v1897_v49  ;;  %v331_v60 = vld [vmem:[%s330_s5] sm:$0xff]  ;;  %v332_v5 = vld [vmem:[%s330_s5 + $0x8] sm:$0xff]  ;;  %s1884_s6 = sshll.u32 %s2600_s8, 6 }
  0x42   : > { %517 = vmatpush.bf16.msra.mxu1 %v2731_v11  ;;  %v1518_v55 = vstv %s1385_s22  ;;  %v333_v61 = vunpack.c.l.bf16 %v331_v60  ;;  %v334_v62 = vunpack.c.h.bf16 %v331_v60  ;;  %v336_v14 = vunpack.c.h.bf16 %v332_v5  ;;  %s2018_s7 = smul.u32 56, %s2470_s15  ;;  %s2868_s9 = scalar_lea.vmem [#allocation9], %s1884_s6 }
  0x43   : > { %543 = vmatpush.bf16.msra.mxu3 %v2733_v13  ;;  %vm1519_vm2 = vcmp.lt.s32.totalorder %v1518_v55, %v2743_v22  ;;  %v335_v38 = vunpack.c.l.bf16 %v332_v5  ;;  %s2019_s0 = smul.u32 80, %s2470_s15  ;;  %s936_s19 = sadd.s32 3, %s2470_s15 }
  0x44   : > { %v1520_v59 = vsel %vm1519_vm2, 1, %v2483_v20  ;;  %s634_s11 = scalar_lea.vmem %s2868_s9, %s2018_s7 [#allocation9]  ;;  %s786_s10 = smul.u32 3, %s2470_s15 }
  0x45   : > { %505 = vmatpush.bf16.msra.mxu0 %v2752_v23  ;;  %530 = vmatpush.bf16.msra.mxu2 %v2754_v24  ;;  %s1771_s28 = scalar_lea.vmem %s2604_s18, %s2019_s0 [#allocation4]  ;;  %s1534_s21 = smul.u32 4294967289, %s2470_s15 }
  0x46   : > { %518 = vmatpush.bf16.msra.mxu1 %v2762_v29  ;;  %s787_s24 = sadd.s32 2, %s786_s10  ;;  %s2025_s29 = smul.u32 40, %s2470_s15 }
  0x47   : > { %544 = vmatpush.bf16.msra.mxu3 %v2764_v30  ;;  %774 = vperm.xlu0 %2200, %v772_v51   ;;  %s1535_s23 = sadd.s32 7, %s1534_s21  ;;  %s2027_s22 = smul.u32 48, %s2470_s15 }
  0x48   : > { %s1775_s30 = scalar_lea.vmem %s2868_s9, %s2025_s29 [#allocation9]  ;;  %s2033_s5 = smul.u32 24, %s2470_s15 }
  0x49   : > { %506 = vmatpush.bf16.msra.mxu0 %v2774_v43  ;;  %531 = vmatpush.bf16.msra.mxu2 %v2776_v44  ;;  %s1779_s4 = scalar_lea.vmem %s2604_s18, %s2027_s22 [#allocation4]  ;;  %s2035_s7 = sshll.u32 %s2470_s15, 4 }
  0x4a   : > { %519 = vmatpush.bf16.msra.mxu1 %v2781_v47  ;;  %s1783_s6 = scalar_lea.vmem %s2868_s9, %s2033_s5 [#allocation9]  ;;  %s1234_s0 = smul.u32 4294967293, %s2470_s15 }
  0x4b   : > { %545 = vmatpush.bf16.msra.mxu3 %v2783_v48  ;;  %s2041_s21 = sshll.u32 %s2470_s15, 3  ;;  %s2049_s5 = smul.u32 4294967248, %s2470_s15 }
  0x4c   : > { %507 = vmatmul.bf16.vlgmr.msra.gmra.mxu0 %v2484_v56  ;;  %s1235_s10 = sadd.s32 5, %s1234_s0  ;;  %s2057_s0 = smul.u32 4294967216, %s2470_s15 }
  0x4d   : > { %649 = vmatpush.bf16.msrb.mxu0 %v2621_v3  ;;  %520 = vmatmul.bf16.vlgmr.msra.gmra.mxu1 %v2484_v56 }
  0x4e   : > { %662 = vmatpush.bf16.msrb.mxu1 %v2626_v7  ;;  %546 = vmatmul.bf16.vlgmr.msra.gmra.mxu3 %v2484_v56 }
  0x4f   : > { %532 = vmatpush.bf16.msra.mxu2 %v2792_v52  ;;  %688 = vmatpush.bf16.msrb.mxu3 %v2628_v8 }
  0x50   : > { %1522 = vperm.xlu0 %2200, %v1520_v59  }
  0x51   : > { %650 = vmatpush.bf16.msrb.mxu0 %v2634_v12 }
  0x52   : > { %663 = vmatpush.bf16.msrb.mxu1 %v2641_v16  ;;  %533 = vmatmul.bf16.vlgmr.msra.gmra.mxu2 %v2484_v56 }
  0x53   : > { %675 = vmatpush.bf16.msrb.mxu2 %v2648_v21  ;;  %689 = vmatpush.bf16.msrb.mxu3 %v2643_v17 }
  0x55   : > { %651 = vmatpush.bf16.msrb.mxu0 %v2658_v28 }
  0x56   : > { %664 = vmatpush.bf16.msrb.mxu1 %v2665_v32 }
  0x57   : > { %676 = vmatpush.bf16.msrb.mxu2 %v2669_v34  ;;  %690 = vmatpush.bf16.msrb.mxu3 %v2667_v33 }
  0x59   : > { %652 = vmatpush.bf16.msrb.mxu0 %v2679_v41 }
  0x5a   : > { %665 = vmatpush.bf16.msrb.mxu1 %v2687_v45 }
  0x5b   : > { %677 = vmatpush.bf16.msrb.mxu2 %v2681_v42  ;;  %691 = vmatpush.bf16.msrb.mxu3 %v2689_v46 }
  0x5d   : > { %653 = vmatpush.bf16.msrb.mxu0 %v2700_v53 }
  0x5e   : > { %666 = vmatpush.bf16.msrb.mxu1 %v2709_v57 }
  0x5f   : > { %678 = vmatpush.bf16.msrb.mxu2 %v2702_v54  ;;  %692 = vmatpush.bf16.msrb.mxu3 %v2711_v58 }
  0x61   : > { %654 = vmatpush.bf16.msrb.mxu0 %v2722_v2 }
  0x62   : > { %667 = vmatpush.bf16.msrb.mxu1 %v2731_v11 }
  0x63   : > { %679 = vmatpush.bf16.msrb.mxu2 %v2724_v4  ;;  %693 = vmatpush.bf16.msrb.mxu3 %v2733_v13 }
  0x65   : > { %655 = vmatpush.bf16.msrb.mxu0 %v2752_v23 }
  0x66   : > { %668 = vmatpush.bf16.msrb.mxu1 %v2762_v29 }
  0x67   : > { %680 = vmatpush.bf16.msrb.mxu2 %v2754_v24  ;;  %694 = vmatpush.bf16.msrb.mxu3 %v2764_v30 }
  0x69   : > { %656 = vmatpush.bf16.msrb.mxu0 %v2774_v43 }
  0x6a   : > { %669 = vmatpush.bf16.msrb.mxu1 %v2781_v47 }
  0x6b   : > { %681 = vmatpush.bf16.msrb.mxu2 %v2776_v44  ;;  %695 = vmatpush.bf16.msrb.mxu3 %v2783_v48 }
  0x6d   : > { %799 = vmatpush.bf16.msra.mxu0 %v2621_v3 }
  0x6e   : > { %812 = vmatpush.bf16.msra.mxu1 %v2626_v7 }
  0x6f   : > { %682 = vmatpush.bf16.msrb.mxu2 %v2792_v52  ;;  %838 = vmatpush.bf16.msra.mxu3 %v2628_v8 }
  0x71   : > { %800 = vmatpush.bf16.msra.mxu0 %v2634_v12 }
  0x72   : > { %813 = vmatpush.bf16.msra.mxu1 %v2641_v16 }
  0x73   : > { %825 = vmatpush.bf16.msra.mxu2 %v2648_v21  ;;  %839 = vmatpush.bf16.msra.mxu3 %v2643_v17 }
  0x75   : > { %801 = vmatpush.bf16.msra.mxu0 %v2658_v28 }
  0x76   : > { %814 = vmatpush.bf16.msra.mxu1 %v2665_v32 }
  0x77   : > { %826 = vmatpush.bf16.msra.mxu2 %v2669_v34  ;;  %840 = vmatpush.bf16.msra.mxu3 %v2667_v33 }
  0x79   : > { %802 = vmatpush.bf16.msra.mxu0 %v2679_v41 }
  0x7a   : > { %815 = vmatpush.bf16.msra.mxu1 %v2687_v45 }
  0x7b   : > { %827 = vmatpush.bf16.msra.mxu2 %v2681_v42  ;;  %841 = vmatpush.bf16.msra.mxu3 %v2689_v46 }
  0x7d   : > { %803 = vmatpush.bf16.msra.mxu0 %v2700_v53 }
  0x7e   : > { %816 = vmatpush.bf16.msra.mxu1 %v2709_v57 }
  0x7f   : > { %828 = vmatpush.bf16.msra.mxu2 %v2702_v54  ;;  %842 = vmatpush.bf16.msra.mxu3 %v2711_v58 }
  0x81   : > { %804 = vmatpush.bf16.msra.mxu0 %v2722_v2 }
  0x82   : > { %817 = vmatpush.bf16.msra.mxu1 %v2731_v11 }
  0x83   : > { %829 = vmatpush.bf16.msra.mxu2 %v2724_v4  ;;  %843 = vmatpush.bf16.msra.mxu3 %v2733_v13 }
  0x85   : > { %805 = vmatpush.bf16.msra.mxu0 %v2752_v23 }
  0x86   : > { %818 = vmatpush.bf16.msra.mxu1 %v2762_v29 }
  0x87   : > { %830 = vmatpush.bf16.msra.mxu2 %v2754_v24  ;;  %844 = vmatpush.bf16.msra.mxu3 %v2764_v30 }
  0x89   : > { %806 = vmatpush.bf16.msra.mxu0 %v2774_v43 }
  0x8a   : > { %819 = vmatpush.bf16.msra.mxu1 %v2781_v47 }
  0x8b   : > { %831 = vmatpush.bf16.msra.mxu2 %v2776_v44  ;;  %845 = vmatpush.bf16.msra.mxu3 %v2783_v48 }
  0x8f   : > { %832 = vmatpush.bf16.msra.mxu2 %v2792_v52 }
  0xc9   : > { %v508_v63 = vpop.f32.mrf.mxu0 }
  0xca   : > { %v551_v0 = vadd.f32 %v508_v63, %v333_v61  ;;  %v521_v1 = vpop.f32.mrf.mxu1 }
  0xcb   : > { %v552_v6 = vadd.f32 %v521_v1, %v334_v62 }
  0xcc   : > { %v2015_v9 = vmul.f32 -1.442695, %v551_v0 }
  0xcd   : > { %v2016_v10 = vmul.f32 -1.442695, %v552_v6 }
  0xce   : > { %2203 = vpow2.f32 %v2015_v9 }
  0xcf   : > { %2205 = vpow2.f32 %v2016_v10 }
  0xd1   : > { %v547_v15 = vpop.f32.mrf.mxu3  ;;  %v510_v19 = vpop.f32.mrf.mxu0 }
  0xd2   : > { %v554_v18 = vadd.f32 %v547_v15, %v336_v14  ;;  %v523_v25 = vpop.f32.mrf.mxu1 }
  0xd4   : > { %v2017_v26 = vmul.f32 -1.442695, %v554_v18  ;;  %v2204_v27 = vpop.eup %2203 }
  0xd5   : > { %v534_v31 = vpop.f32.mrf.mxu2  ;;  %v2206_v35 = vpop.eup %2205  ;;  %v558_v36 = vadd.f32 1.0, %v2204_v27 }
  0xd6   : > { %2207 = vpow2.f32 %v2017_v26  ;;  %v577_v37 = vadd.f32 1.0, %v2206_v35  ;;  %v553_v49 = vadd.f32 %v534_v31, %v335_v38 }
  0xd7   : > { %2209 = vrcp.f32 %v558_v36  ;;  %v570_v63 = vand.u32 2147483648, %v558_v36  ;;  %v568_v1 = vand.u32 2147483647, %v558_v36  ;;  %vm564_vm5 = vweird.f32 %v558_v36 }
  0xd8   : > { %2211 = vrcp.f32 %v577_v37  ;;  %v589_v6 = vand.u32 2147483648, %v577_v37  ;;  %v587_v9 = vand.u32 2147483647, %v577_v37  ;;  %vm583_vm7 = vweird.f32 %v577_v37 }
  0xd9   : > { %v549_v39 = vpop.f32.mrf.mxu3  ;;  %v571_v19 = vor.u32 1.1754944e-38, %v570_v63  ;;  %vm569_vm8 = vcmp.eq.f32.partialorder %v568_v1, 8.507059e+37 }
  0xda   : > { %v590_v27 = vor.u32 1.1754944e-38, %v589_v6  ;;  %vm588_vm10 = vcmp.eq.f32.partialorder %v587_v9, 8.507059e+37 }
  0xdc   : > { %v2208_v40 = vpop.eup %2207 }
  0xdd   : > { %v597_v50 = vadd.f32 1.0, %v2208_v40  ;;  %v536_v51 = vpop.f32.mrf.mxu2  ;;  %v2210_v55 = vpop.eup %2209 }
  0xde   : > { %v2212_v56 = vpop.eup %2211  ;;  %v560_v59 = vmul.f32 %v2210_v55, %v558_v36  ;;  %vm565_vm3 = vweird.f32 %v2210_v55 }
  0xdf   : > { %2213 = vrcp.f32 %v597_v50  ;;  %v579_v60 = vmul.f32 %v2212_v56, %v577_v37  ;;  %vm584_vm4 = vweird.f32 %v2212_v56  ;;  %vm566_vm6 = vmor %vm564_vm5, %vm565_vm3  ;;  %v609_v37 = vand.u32 2147483648, %v597_v50 }
  0xe0   : > { %2215 = vtanh.f32 %v553_v49  ;;  %v561_v61 = vsub.f32 1.0, %v560_v59  ;;  %vm585_vm9 = vmor %vm583_vm7, %vm584_vm4  ;;  %v625_v49 = vpop.permute.xlu0 %624  ;;  %vm603_vm13 = vweird.f32 %v597_v50 }
  0xe1   : > { %v580_v62 = vsub.f32 1.0, %v579_v60  ;;  %vm626_vm11 = vcmp.eq.s32.totalorder %v625_v49, 1 }
  0xe2   : > { %v562_v0 = vmul.f32 %v2210_v55, %v561_v61  ;;  %v607_v61 = vand.u32 2147483647, %v597_v50  ;;  %vm2113_vm0 = vmpackc.low %vm626_vm11, %vm626_vm11 }
  0xe3   : > { %v581_v5 = vmul.f32 %v2212_v56, %v580_v62  ;;  %v610_v62 = vor.u32 1.1754944e-38, %v609_v37 }
  0xe4   : > { %v563_v14 = vadd.f32 %v2210_v55, %v562_v0  ;;  %vm608_vm15 = vcmp.eq.f32.partialorder %v607_v61, 8.507059e+37 }
  0xe5   : > { %v2214_v10 = vpop.eup %2213  ;;  %v582_v25 = vadd.f32 %v2212_v56, %v581_v5 }
  0xe6   : > { %v2216_v15 = vpop.eup %2215  ;;  %v599_v18 = vmul.f32 %v2214_v10, %v597_v50  ;;  %v567_v26 = vsel %vm566_vm6, %v2210_v55, %v563_v14  ;;  %vm604_vm12 = vweird.f32 %v2214_v10  ;;  %v2020_v50 = vld [vmem:[%s1771_s28 + $0x10] sm:$0xff] }
  0xe7   : > { %v572_v35 = vsel %vm569_vm8, %v571_v19, %v567_v26  ;;  %v586_v38 = vsel %vm585_vm9, %v2212_v56, %v582_v25  ;;  %vm605_vm14 = vmor %vm603_vm13, %vm604_vm12  ;;  %v643_v9 = vunpack.c.l.bf16 %v2020_v50  ;;  %v2021_v25 = vld [vmem:[%s1771_s28 + $0x18] sm:$0xff]  ;;  %s3025_s28 = ssub.s32 4, %s2470_s15 }
  0xe8   : > { %v600_v31 = vsub.f32 1.0, %v599_v18  ;;  %v591_v39 = vsel %vm588_vm10, %v590_v27, %v586_v38  ;;  %v615_v40 = vmul.f32 %v2216_v15, %v572_v35  ;;  %v645_v61 = vunpack.c.l.bf16 %v2021_v25  ;;  %s2112_s29 = sshll.u32 %s3025_s28, 4  ;;  %s2048_s22 = sshll.u32 %s3025_s28, 3 }
  0xe9   : > { %v614_v51 = vmul.f32 0.0, %v591_v39 }
  0xea   : > { %v601_v36 = vmul.f32 %v2214_v10, %v600_v31  ;;  %v646_v31 = vunpack.c.h.bf16 %v2021_v25 }
  0xeb   : > { %v616_v59 = vadd.f32 %v615_v40, %v614_v51 }
  0xec   : > { %v602_v60 = vadd.f32 %v2214_v10, %v601_v36 }
  0xed   : > { %2217 = vtanh.f32 %v616_v59  ;;  %v2864_v55 = vsel %vm626_vm11, %v616_v59, 0.0 }
  0xee   : > { %v606_v56 = vsel %vm605_vm14, %v2214_v10, %v602_v60  ;;  %v644_v10 = vunpack.c.h.bf16 %v2020_v50 }
  0xef   : > { %v611_v0 = vsel %vm608_vm15, %v610_v62, %v606_v56 }
  0xf3   : > { %v2218_v63 = vpop.eup %2217 }
  0xf4   : > { %v618_v1 = vmul.f32 %v2218_v63, %v611_v0  ;;  %v920_v63 = vstv %s787_s24 }
  0xf5   : > { %vm921_vm1 = vcmp.lt.s32.totalorder %v920_v63, %v2743_v22 }
  0xf6   : > { %v2874_v6 = vsel %vm626_vm11, %v618_v1, 0.0  ;;  %v2114_v5 = vpack.c.bf16 %v618_v1, %v618_v1  ;;  %v922_v50 = vsel %vm921_vm1, 1, %v2483_v20 }
  0xf7   : > { %635 = vst [vmem:[%s634_s11] sm:$0xff] %v2874_v6  ;;  %924 = vperm.xlu1 %2201, %v922_v50   ;;  %s1786_s11 = scalar_lea.vmem %s2604_s18, %s2035_s7 [#allocation4]  ;;  %s2055_s7 = smul.u32 4294967272, %s2470_s15 }
  0xf8   : > { %2115 = vmatmul.msk.bf16.vlgmr.msrb.gmra.mxu0 %vm2113_vm0, %v2114_v5  ;;  %2118 = vmatmul.msk.bf16.vlgmr.msrb.gmra.mxu1 %vm2113_vm0, %v2114_v5 }
  0xf9   : > { %2121 = vmatmul.msk.bf16.vlgmr.msrb.gmra.mxu2 %vm2113_vm0, %v2114_v5  ;;  %2124 = vmatmul.msk.bf16.vlgmr.msrb.gmra.mxu3 %vm2113_vm0, %v2114_v5 }
  0xfa   : > { %948 = vmatpush.bf16.msrb.mxu0 %v2621_v3  ;;  %961 = vmatpush.bf16.msrb.mxu1 %v2626_v7 }
  0xfb   : > { %974 = vmatpush.bf16.msrb.mxu2 %v2648_v21  ;;  %987 = vmatpush.bf16.msrb.mxu3 %v2628_v8 }
  0xfe   : > { %949 = vmatpush.bf16.msrb.mxu0 %v2634_v12  ;;  %962 = vmatpush.bf16.msrb.mxu1 %v2641_v16 }
  0xff   : > { %975 = vmatpush.bf16.msrb.mxu2 %v2669_v34  ;;  %988 = vmatpush.bf16.msrb.mxu3 %v2643_v17 }
 0x102   : > { %950 = vmatpush.bf16.msrb.mxu0 %v2658_v28  ;;  %963 = vmatpush.bf16.msrb.mxu1 %v2665_v32 }
 0x103   : > { %976 = vmatpush.bf16.msrb.mxu2 %v2681_v42  ;;  %989 = vmatpush.bf16.msrb.mxu3 %v2667_v33 }
 0x106   : > { %951 = vmatpush.bf16.msrb.mxu0 %v2679_v41  ;;  %964 = vmatpush.bf16.msrb.mxu1 %v2687_v45 }
 0x107   : > { %977 = vmatpush.bf16.msrb.mxu2 %v2702_v54  ;;  %990 = vmatpush.bf16.msrb.mxu3 %v2689_v46 }
 0x10a   : > { %952 = vmatpush.bf16.msrb.mxu0 %v2700_v53  ;;  %965 = vmatpush.bf16.msrb.mxu1 %v2709_v57 }
 0x10b   : > { %978 = vmatpush.bf16.msrb.mxu2 %v2724_v4  ;;  %991 = vmatpush.bf16.msrb.mxu3 %v2711_v58 }
 0x10e   : > { %953 = vmatpush.bf16.msrb.mxu0 %v2722_v2  ;;  %966 = vmatpush.bf16.msrb.mxu1 %v2731_v11 }
 0x10f   : > { %979 = vmatpush.bf16.msrb.mxu2 %v2754_v24  ;;  %992 = vmatpush.bf16.msrb.mxu3 %v2733_v13 }
 0x112   : > { %954 = vmatpush.bf16.msrb.mxu0 %v2752_v23  ;;  %967 = vmatpush.bf16.msrb.mxu1 %v2762_v29 }
 0x113   : > { %980 = vmatpush.bf16.msrb.mxu2 %v2776_v44  ;;  %993 = vmatpush.bf16.msrb.mxu3 %v2764_v30 }
 0x116   : > { %955 = vmatpush.bf16.msrb.mxu0 %v2774_v43  ;;  %968 = vmatpush.bf16.msrb.mxu1 %v2781_v47 }
 0x117   : > { %981 = vmatpush.bf16.msrb.mxu2 %v2792_v52  ;;  %994 = vmatpush.bf16.msrb.mxu3 %v2783_v48 }
 0x175   : > { %v658_v14 = vpop.f32.mrf.mxu0  ;;  %v671_v15 = vpop.f32.mrf.mxu1 }
 0x176   : > { %v701_v18 = vadd.f32 %v658_v14, %v643_v9  ;;  %v702_v19 = vadd.f32 %v671_v15, %v644_v10  ;;  %v1069_v9 = vstv %s936_s19  ;;  %s2065_s19 = smul.u32 4294967184, %s2470_s15 }
 0x177   : > { %vm1070_vm2 = vcmp.lt.s32.totalorder %v1069_v9, %v2743_v22 }
 0x178   : > { %v2022_v26 = vmul.f32 -1.442695, %v701_v18  ;;  %v2023_v27 = vmul.f32 -1.442695, %v702_v19 }
 0x17a   : > { %2219 = vpow2.f32 %v2022_v26 }
 0x17b   : > { %2221 = vpow2.f32 %v2023_v27 }
 0x17c   : > { %v684_v35 = vpop.f32.mrf.mxu2  ;;  %v697_v38 = vpop.f32.mrf.mxu3 }
 0x17d   : > { %v704_v39 = vadd.f32 %v697_v38, %v646_v31  ;;  %v660_v40 = vpop.f32.mrf.mxu0  ;;  %v673_v49 = vpop.f32.mrf.mxu1  ;;  %v703_v1 = vadd.f32 %v684_v35, %v645_v61 }
 0x17f   : > { %v2024_v36 = vmul.f32 -1.442695, %v704_v39  ;;  %v1071_v39 = vsel %vm1070_vm2, 1, %v2483_v20 }
 0x180   : > { %v2220_v51 = vpop.eup %2219  ;;  %1073 = vperm.xlu1 %2201, %v1071_v39  }
 0x181   : > { %v2222_v59 = vpop.eup %2221  ;;  %v708_v60 = vadd.f32 1.0, %v2220_v51  ;;  %2223 = vpow2.f32 %v2024_v36  ;;  %v1668_v51 = vstv %s1535_s23  ;;  %s1789_s23 = scalar_lea.vmem %s2868_s9, %s2041_s21 [#allocation9] }
 0x182   : > { %v727_v37 = vadd.f32 1.0, %v2222_v59  ;;  %vm1669_vm11 = vcmp.lt.s32.totalorder %v1668_v51, %v2743_v22 }
 0x183   : > { %2225 = vrcp.f32 %v708_v60  ;;  %v718_v27 = vand.u32 2147483647, %v708_v60  ;;  %v720_v31 = vand.u32 2147483648, %v708_v60  ;;  %vm714_vm5 = vweird.f32 %v708_v60 }
 0x184   : > { %2227 = vrcp.f32 %v727_v37  ;;  %v686_v56 = vpop.f32.mrf.mxu2  ;;  %v699_v62 = vpop.f32.mrf.mxu3  ;;  %v739_v26 = vand.u32 2147483648, %v727_v37  ;;  %v737_v38 = vand.u32 2147483647, %v727_v37  ;;  %vm733_vm6 = vweird.f32 %v727_v37 }
 0x185   : > { %v721_v59 = vor.u32 1.1754944e-38, %v720_v31  ;;  %vm719_vm9 = vcmp.eq.f32.partialorder %v718_v27, 8.507059e+37 }
 0x186   : > { %v740_v63 = vor.u32 1.1754944e-38, %v739_v26  ;;  %vm738_vm10 = vcmp.eq.f32.partialorder %v737_v38, 8.507059e+37 }
 0x187   : > { %v2224_v0 = vpop.eup %2223 }
 0x188   : > { %v2914_v5 = vadd.f32 1.0, %v2224_v0 }
 0x189   : > { %v2226_v10 = vpop.eup %2225 }
 0x18a   : > { %v2228_v14 = vpop.eup %2227  ;;  %v710_v15 = vmul.f32 %v2226_v10, %v708_v60  ;;  %2229 = vrcp.f32 %v2914_v5  ;;  %vm715_vm3 = vweird.f32 %v2226_v10  ;;  %vm753_vm14 = vweird.f32 %v2914_v5 }
 0x18b   : > { %v729_v18 = vmul.f32 %v2228_v14, %v727_v37  ;;  %2231 = vtanh.f32 %v703_v1  ;;  %vm734_vm4 = vweird.f32 %v2228_v14  ;;  %vm716_vm7 = vmor %vm714_vm5, %vm715_vm3 }
 0x18c   : > { %v711_v19 = vsub.f32 1.0, %v710_v15  ;;  %vm735_vm8 = vmor %vm733_vm6, %vm734_vm4 }
 0x18d   : > { %v730_v25 = vsub.f32 1.0, %v729_v18 }
 0x18e   : > { %v712_v35 = vmul.f32 %v2226_v10, %v711_v19  ;;  %v1670_v19 = vsel %vm1669_vm11, 1, %v2483_v20 }
 0x18f   : > { %v731_v40 = vmul.f32 %v2228_v14, %v730_v25  ;;  %v775_v25 = vpop.permute.xlu0 %774  ;;  %1672 = vperm.xlu1 %2201, %v1670_v19  }
 0x190   : > { %v2230_v49 = vpop.eup %2229  ;;  %v713_v36 = vadd.f32 %v2226_v10, %v712_v35  ;;  %vm776_vm12 = vcmp.eq.s32.totalorder %v775_v25, 1 }
 0x191   : > { %v732_v61 = vadd.f32 %v2228_v14, %v731_v40  ;;  %v749_v56 = vmul.f32 %v2230_v49, %v2914_v5  ;;  %v2232_v62 = vpop.eup %2231  ;;  %vm754_vm13 = vweird.f32 %v2230_v49 }
 0x192   : > { %v717_v0 = vsel %vm716_vm7, %v2226_v10, %v713_v36  ;;  %v759_v10 = vand.u32 2147483648, %v2914_v5  ;;  %vm755_vm15 = vmor %vm753_vm14, %vm754_vm13 }
 0x193   : > { %v722_v1 = vsel %vm719_vm9, %v721_v59, %v717_v0  ;;  %v736_v50 = vsel %vm735_vm8, %v2228_v14, %v732_v61  ;;  %v750_v9 = vsub.f32 1.0, %v749_v56  ;;  %v757_v14 = vand.u32 2147483647, %v2914_v5 }
 0x194   : > { %v741_v60 = vsel %vm738_vm10, %v740_v63, %v736_v50  ;;  %v765_v15 = vmul.f32 %v2232_v62, %v722_v1  ;;  %v760_v35 = vor.u32 1.1754944e-38, %v759_v10  ;;  %v2029_v63 = vld [vmem:[%s1779_s4 + $0x28] sm:$0xff] }
 0x195   : > { %v764_v37 = vmul.f32 %v741_v60, %v2864_v55  ;;  %v751_v18 = vmul.f32 %v2230_v49, %v750_v9  ;;  %vm758_vm0 = vcmp.eq.f32.partialorder %v757_v14, 8.507059e+37  ;;  %v796_v50 = vunpack.c.h.bf16 %v2029_v63 }
 0x197   : > { %v766_v31 = vadd.f32 %v765_v15, %v764_v37  ;;  %v752_v26 = vadd.f32 %v2230_v49, %v751_v18 }
 0x199   : > { %2233 = vtanh.f32 %v766_v31  ;;  %v2928_v22 = vsel %vm776_vm12, %v766_v31, %v2864_v55  ;;  %v756_v27 = vsel %vm755_vm15, %v2230_v49, %v752_v26 }
 0x19a   : > { %v761_v39 = vsel %vm758_vm0, %v760_v35, %v756_v27  ;;  %v795_v35 = vunpack.c.l.bf16 %v2029_v63 }
 0x19f   : > { %v2234_v38 = vpop.eup %2233 }
 0x1a0   : > { %v768_v40 = vmul.f32 %v2234_v38, %v761_v39 }
 0x1a2   : > { %v2936_v36 = vsel %vm776_vm12, %v768_v40, %v2874_v6  ;;  %v782_v55 = vsel %vm776_vm12, %v768_v40, 0.0  ;;  %v2028_v6 = vld [vmem:[%s1779_s4 + $0x20] sm:$0xff]  ;;  %s1232_s4 = scalar_lea.vmem %s2868_s9, %s2048_s22 [#allocation9]  ;;  %s2071_s22 = smul.u32 4294967240, %s2470_s15 }
 0x1a3   : > { %2026 = vst [vmem:[%s1775_s30 + $0x8] sm:$0xff] %v782_v55  ;;  %v798_v51 = vpack.c.bf16 %v2936_v36, %v2936_v36  ;;  %v793_v5 = vunpack.c.l.bf16 %v2028_v6  ;;  %v794_v49 = vunpack.c.h.bf16 %v2028_v6  ;;  %s1088_s30 = scalar_lea.vmem %s2604_s18, %s2112_s29 [#allocation4] }
 0x1a5   : > { %807 = vmatmul.bf16.vlgmr.msra.gmra.mxu0 %v798_v51  ;;  %820 = vmatmul.bf16.vlgmr.msra.gmra.mxu1 %v798_v51 }
 0x1a6   : > { %833 = vmatmul.bf16.vlgmr.msra.gmra.mxu2 %v798_v51  ;;  %846 = vmatmul.bf16.vlgmr.msra.gmra.mxu3 %v798_v51 }
 0x1a7   : > { %1097 = vmatpush.bf16.msra.mxu0 %v2621_v3  ;;  %1110 = vmatpush.bf16.msra.mxu1 %v2626_v7 }
 0x1a8   : > { %1123 = vmatpush.bf16.msra.mxu2 %v2648_v21  ;;  %1136 = vmatpush.bf16.msra.mxu3 %v2628_v8 }
 0x1ab   : > { %1098 = vmatpush.bf16.msra.mxu0 %v2634_v12  ;;  %1111 = vmatpush.bf16.msra.mxu1 %v2641_v16 }
 0x1ac   : > { %1124 = vmatpush.bf16.msra.mxu2 %v2669_v34  ;;  %1137 = vmatpush.bf16.msra.mxu3 %v2643_v17 }
 0x1af   : > { %1099 = vmatpush.bf16.msra.mxu0 %v2658_v28  ;;  %1112 = vmatpush.bf16.msra.mxu1 %v2665_v32 }
 0x1b0   : > { %1125 = vmatpush.bf16.msra.mxu2 %v2681_v42  ;;  %1138 = vmatpush.bf16.msra.mxu3 %v2667_v33 }
 0x1b3   : > { %1100 = vmatpush.bf16.msra.mxu0 %v2679_v41  ;;  %1113 = vmatpush.bf16.msra.mxu1 %v2687_v45 }
 0x1b4   : > { %1126 = vmatpush.bf16.msra.mxu2 %v2702_v54  ;;  %1139 = vmatpush.bf16.msra.mxu3 %v2689_v46 }
 0x1b7   : > { %1101 = vmatpush.bf16.msra.mxu0 %v2700_v53  ;;  %1114 = vmatpush.bf16.msra.mxu1 %v2709_v57 }
 0x1b8   : > { %1127 = vmatpush.bf16.msra.mxu2 %v2724_v4  ;;  %1140 = vmatpush.bf16.msra.mxu3 %v2711_v58 }
 0x1bb   : > { %1102 = vmatpush.bf16.msra.mxu0 %v2722_v2  ;;  %1115 = vmatpush.bf16.msra.mxu1 %v2731_v11 }
 0x1bc   : > { %1128 = vmatpush.bf16.msra.mxu2 %v2754_v24  ;;  %1141 = vmatpush.bf16.msra.mxu3 %v2733_v13 }
 0x1bf   : > { %1103 = vmatpush.bf16.msra.mxu0 %v2752_v23  ;;  %1116 = vmatpush.bf16.msra.mxu1 %v2762_v29 }
 0x1c0   : > { %1129 = vmatpush.bf16.msra.mxu2 %v2776_v44  ;;  %1142 = vmatpush.bf16.msra.mxu3 %v2764_v30 }
 0x1c3   : > { %1104 = vmatpush.bf16.msra.mxu0 %v2774_v43  ;;  %1117 = vmatpush.bf16.msra.mxu1 %v2781_v47 }
 0x1c4   : > { %1130 = vmatpush.bf16.msra.mxu2 %v2792_v52  ;;  %1143 = vmatpush.bf16.msra.mxu3 %v2783_v48 }
 0x222   : > { %v808_v59 = vpop.f32.mrf.mxu0  ;;  %v821_v61 = vpop.f32.mrf.mxu1 }
 0x223   : > { %v851_v56 = vadd.f32 %v808_v59, %v793_v5  ;;  %v852_v62 = vadd.f32 %v821_v61, %v794_v49 }
 0x225   : > { %v2030_v0 = vmul.f32 -1.442695, %v851_v56  ;;  %v2031_v1 = vmul.f32 -1.442695, %v852_v62 }
 0x227   : > { %2235 = vpow2.f32 %v2030_v0 }
 0x228   : > { %2237 = vpow2.f32 %v2031_v1 }
 0x229   : > { %v834_v9 = vpop.f32.mrf.mxu2  ;;  %v847_v60 = vpop.f32.mrf.mxu3 }
 0x22a   : > { %v854_v15 = vadd.f32 %v847_v60, %v796_v50  ;;  %v810_v37 = vpop.f32.mrf.mxu0  ;;  %v823_v18 = vpop.f32.mrf.mxu1  ;;  %v853_v55 = vadd.f32 %v834_v9, %v795_v35 }
 0x22c   : > { %v2032_v19 = vmul.f32 -1.442695, %v854_v15 }
 0x22d   : > { %v2236_v25 = vpop.eup %2235 }
 0x22e   : > { %v2238_v31 = vpop.eup %2237  ;;  %v858_v26 = vadd.f32 1.0, %v2236_v25  ;;  %2239 = vpow2.f32 %v2032_v19 }
 0x22f   : > { %v877_v10 = vadd.f32 1.0, %v2238_v31 }
 0x230   : > { %2241 = vrcp.f32 %v858_v26  ;;  %v870_v61 = vand.u32 2147483648, %v858_v26  ;;  %v868_v62 = vand.u32 2147483647, %v858_v26  ;;  %vm864_vm3 = vweird.f32 %v858_v26 }
 0x231   : > { %2243 = vrcp.f32 %v877_v10  ;;  %v836_v14 = vpop.f32.mrf.mxu2  ;;  %v849_v27 = vpop.f32.mrf.mxu3  ;;  %v889_v0 = vand.u32 2147483648, %v877_v10  ;;  %v887_v50 = vand.u32 2147483647, %v877_v10  ;;  %vm883_vm5 = vweird.f32 %v877_v10 }
 0x232   : > { %v871_v9 = vor.u32 1.1754944e-38, %v870_v61  ;;  %vm869_vm6 = vcmp.eq.f32.partialorder %v868_v62, 8.507059e+37 }
 0x233   : > { %v890_v19 = vor.u32 1.1754944e-38, %v889_v0  ;;  %vm888_vm8 = vcmp.eq.f32.partialorder %v887_v50, 8.507059e+37 }
 0x234   : > { %v2240_v38 = vpop.eup %2239 }
 0x235   : > { %v897_v39 = vadd.f32 1.0, %v2240_v38 }
 0x236   : > { %v2242_v40 = vpop.eup %2241 }
 0x237   : > { %v2244_v51 = vpop.eup %2243  ;;  %v860_v6 = vmul.f32 %v2242_v40, %v858_v26  ;;  %2245 = vrcp.f32 %v897_v39  ;;  %vm865_vm1 = vweird.f32 %v2242_v40  ;;  %vm903_vm11 = vweird.f32 %v897_v39 }
 0x238   : > { %v879_v5 = vmul.f32 %v2244_v51, %v877_v10  ;;  %2247 = vtanh.f32 %v853_v55  ;;  %vm884_vm2 = vweird.f32 %v2244_v51  ;;  %vm866_vm4 = vmor %vm864_vm3, %vm865_vm1  ;;  %v925_v55 = vpop.permute.xlu1 %924 }
 0x239   : > { %v861_v49 = vsub.f32 1.0, %v860_v6  ;;  %vm885_vm7 = vmor %vm883_vm5, %vm884_vm2  ;;  %vm926_vm9 = vcmp.eq.s32.totalorder %v925_v55, 1 }
 0x23a   : > { %v880_v59 = vsub.f32 1.0, %v879_v5 }
 0x23b   : > { %v862_v56 = vmul.f32 %v2242_v40, %v861_v49 }
 0x23c   : > { %v881_v1 = vmul.f32 %v2244_v51, %v880_v59 }
 0x23d   : > { %v2246_v63 = vpop.eup %2245  ;;  %v863_v60 = vadd.f32 %v2242_v40, %v862_v56 }
 0x23e   : > { %v899_v15 = vmul.f32 %v2246_v63, %v897_v39  ;;  %v882_v37 = vadd.f32 %v2244_v51, %v881_v1  ;;  %v2248_v25 = vpop.eup %2247  ;;  %vm904_vm10 = vweird.f32 %v2246_v63 }
 0x23f   : > { %v867_v18 = vsel %vm866_vm4, %v2242_v40, %v863_v60  ;;  %v909_v40 = vand.u32 2147483648, %v897_v39  ;;  %vm905_vm12 = vmor %vm903_vm11, %vm904_vm10 }
 0x240   : > { %v872_v31 = vsel %vm869_vm6, %v871_v9, %v867_v18  ;;  %v900_v14 = vsub.f32 1.0, %v899_v15  ;;  %v886_v27 = vsel %vm885_vm7, %v2244_v51, %v882_v37  ;;  %v907_v51 = vand.u32 2147483647, %v897_v39  ;;  %v2037_v18 = vld [vmem:[%s1786_s11 + $0x38] sm:$0xff] }
 0x241   : > { %v915_v35 = vmul.f32 %v2248_v25, %v872_v31  ;;  %v891_v38 = vsel %vm888_vm8, %v890_v19, %v886_v27  ;;  %v910_v61 = vor.u32 1.1754944e-38, %v909_v40  ;;  %v945_v31 = vunpack.c.h.bf16 %v2037_v18 }
 0x242   : > { %v901_v6 = vmul.f32 %v2246_v63, %v900_v14  ;;  %v914_v26 = vmul.f32 %v891_v38, %v2928_v22  ;;  %vm908_vm13 = vcmp.eq.f32.partialorder %v907_v51, 8.507059e+37 }
 0x244   : > { %v916_v5 = vadd.f32 %v915_v35, %v914_v26  ;;  %v902_v10 = vadd.f32 %v2246_v63, %v901_v6 }
 0x246   : > { %2249 = vtanh.f32 %v916_v5  ;;  %v2978_v49 = vsel %vm926_vm9, %v916_v5, %v2928_v22  ;;  %v906_v59 = vsel %vm905_vm12, %v2246_v63, %v902_v10 }
 0x247   : > { %v911_v62 = vsel %vm908_vm13, %v910_v61, %v906_v59  ;;  %v944_v61 = vunpack.c.l.bf16 %v2037_v18 }
 0x24c   : > { %v2250_v56 = vpop.eup %2249 }
 0x24d   : > { %v918_v0 = vmul.f32 %v2250_v56, %v911_v62  ;;  %v1218_v56 = vstv %s3025_s28  ;;  %s1805_s28 = scalar_lea.vmem %s2604_s18, %s2057_s0 [#allocation4]  ;;  %s2412_s0 = scalar_lea.hbm %s3205_s3, 128 }
 0x24f   : > { %v2984_v1 = vsel %vm926_vm9, %v918_v0, %v2936_v36  ;;  %v932_v50 = vsel %vm926_vm9, %v918_v0, 0.0  ;;  %v2036_v36 = vld [vmem:[%s1786_s11 + $0x30] sm:$0xff]  ;;  %v2331_v0 = vld [vmem:[%s3204_s2] sm:$0xff]  ;;  %s1801_s11 = scalar_lea.vmem %s2868_s9, %s2055_s7 [#allocation9] }
 0x250   : > { %2034 = vst [vmem:[%s1783_s6 + $0x10] sm:$0xff] %v932_v50  ;;  %v947_v22 = vpack.c.bf16 %v2984_v1, %v2984_v1  ;;  %v942_v39 = vunpack.c.l.bf16 %v2036_v36  ;;  %v943_v63 = vunpack.c.h.bf16 %v2036_v36  ;;  %vm1219_vm14 = vcmp.lt.s32.totalorder %v1218_v56, %v2331_v0  ;;  %s1797_s6 = scalar_lea.vmem %s2604_s18, %s2049_s5 [#allocation4] }
 0x251   : > { %v1368_v36 = vstv %s1235_s10  ;;  %s2063_s10 = smul.u32 4294967256, %s2470_s15  ;;  %s1685_s15 = scalar_lea.sflag [#allocation6], %s2600_s8 }
 0x252   : > { %956 = vmatmul.bf16.vlgmr.msrb.gmra.mxu0 %v947_v22  ;;  %969 = vmatmul.bf16.vlgmr.msrb.gmra.mxu1 %v947_v22  ;;  %vm1369_vm15 = vcmp.lt.s32.totalorder %v1368_v36, %v2331_v0 }
 0x253   : > { %982 = vmatmul.bf16.vlgmr.msrb.gmra.mxu2 %v947_v22  ;;  %995 = vmatmul.bf16.vlgmr.msrb.gmra.mxu3 %v947_v22  ;;  %v1220_v22 = vsel %vm1219_vm14, 1, %v2483_v20  ;;  %s1809_s24 = scalar_lea.vmem %s2868_s9, %s2063_s10 [#allocation9] }
 0x254   : > { %1247 = vmatpush.bf16.msrb.mxu0 %v2621_v3  ;;  %1260 = vmatpush.bf16.msrb.mxu1 %v2626_v7 }
 0x255   : > { %1273 = vmatpush.bf16.msrb.mxu2 %v2648_v21  ;;  %1286 = vmatpush.bf16.msrb.mxu3 %v2628_v8 }
 0x256   : > { %1222 = vperm.xlu2 %2202, %v1220_v22  }
 0x258   : > { %1248 = vmatpush.bf16.msrb.mxu0 %v2634_v12  ;;  %1261 = vmatpush.bf16.msrb.mxu1 %v2641_v16 }
 0x259   : > { %1274 = vmatpush.bf16.msrb.mxu2 %v2669_v34  ;;  %1287 = vmatpush.bf16.msrb.mxu3 %v2643_v17 }
 0x25c   : > { %1249 = vmatpush.bf16.msrb.mxu0 %v2658_v28  ;;  %1262 = vmatpush.bf16.msrb.mxu1 %v2665_v32 }
 0x25d   : > { %1275 = vmatpush.bf16.msrb.mxu2 %v2681_v42  ;;  %1288 = vmatpush.bf16.msrb.mxu3 %v2667_v33 }
 0x260   : > { %1250 = vmatpush.bf16.msrb.mxu0 %v2679_v41  ;;  %1263 = vmatpush.bf16.msrb.mxu1 %v2687_v45 }
 0x261   : > { %1276 = vmatpush.bf16.msrb.mxu2 %v2702_v54  ;;  %1289 = vmatpush.bf16.msrb.mxu3 %v2689_v46 }
 0x264   : > { %1251 = vmatpush.bf16.msrb.mxu0 %v2700_v53  ;;  %1264 = vmatpush.bf16.msrb.mxu1 %v2709_v57 }
 0x265   : > { %1277 = vmatpush.bf16.msrb.mxu2 %v2724_v4  ;;  %1290 = vmatpush.bf16.msrb.mxu3 %v2711_v58 }
 0x268   : > { %1252 = vmatpush.bf16.msrb.mxu0 %v2722_v2  ;;  %1265 = vmatpush.bf16.msrb.mxu1 %v2731_v11 }
 0x269   : > { %1278 = vmatpush.bf16.msrb.mxu2 %v2754_v24  ;;  %1291 = vmatpush.bf16.msrb.mxu3 %v2733_v13 }
 0x26c   : > { %1253 = vmatpush.bf16.msrb.mxu0 %v2752_v23  ;;  %1266 = vmatpush.bf16.msrb.mxu1 %v2762_v29 }
 0x26d   : > { %1279 = vmatpush.bf16.msrb.mxu2 %v2776_v44  ;;  %1292 = vmatpush.bf16.msrb.mxu3 %v2764_v30 }
 0x270   : > { %1254 = vmatpush.bf16.msrb.mxu0 %v2774_v43  ;;  %1267 = vmatpush.bf16.msrb.mxu1 %v2781_v47 }
 0x271   : > { %1280 = vmatpush.bf16.msrb.mxu2 %v2792_v52  ;;  %1293 = vmatpush.bf16.msrb.mxu3 %v2783_v48 }
 0x2cf   : > { %v957_v60 = vpop.f32.mrf.mxu0  ;;  %v970_v9 = vpop.f32.mrf.mxu1 }
 0x2d0   : > { %v1000_v15 = vadd.f32 %v957_v60, %v942_v39  ;;  %v1001_v37 = vadd.f32 %v970_v9, %v943_v63 }
 0x2d2   : > { %v2038_v19 = vmul.f32 -1.442695, %v1000_v15  ;;  %v2039_v25 = vmul.f32 -1.442695, %v1001_v37 }
 0x2d4   : > { %2251 = vpow2.f32 %v2038_v19 }
 0x2d5   : > { %2253 = vpow2.f32 %v2039_v25 }
 0x2d6   : > { %v983_v14 = vpop.f32.mrf.mxu2  ;;  %v996_v27 = vpop.f32.mrf.mxu3 }
 0x2d7   : > { %v1003_v35 = vadd.f32 %v996_v27, %v945_v31  ;;  %v959_v38 = vpop.f32.mrf.mxu0  ;;  %v972_v55 = vpop.f32.mrf.mxu1  ;;  %v1002_v63 = vadd.f32 %v983_v14, %v944_v61 }
 0x2d9   : > { %v2040_v6 = vmul.f32 -1.442695, %v1003_v35  ;;  %v1370_v35 = vsel %vm1369_vm15, 1, %v2483_v20 }
 0x2da   : > { %v2252_v26 = vpop.eup %2251  ;;  %1372 = vperm.xlu2 %2202, %v1370_v35  }
 0x2db   : > { %v2254_v5 = vpop.eup %2253  ;;  %v1007_v10 = vadd.f32 1.0, %v2252_v26  ;;  %2255 = vpow2.f32 %v2040_v6 }
 0x2dc   : > { %v1026_v40 = vadd.f32 1.0, %v2254_v5 }
 0x2dd   : > { %2257 = vrcp.f32 %v1007_v10  ;;  %v1017_v19 = vand.u32 2147483647, %v1007_v10  ;;  %v1019_v25 = vand.u32 2147483648, %v1007_v10  ;;  %vm1013_vm2 = vweird.f32 %v1007_v10 }
 0x2de   : > { %2259 = vrcp.f32 %v1026_v40  ;;  %v985_v51 = vpop.f32.mrf.mxu2  ;;  %v998_v59 = vpop.f32.mrf.mxu3  ;;  %v1038_v31 = vand.u32 2147483648, %v1026_v40  ;;  %v1036_v55 = vand.u32 2147483647, %v1026_v40  ;;  %vm1032_vm3 = vweird.f32 %v1026_v40 }
 0x2df   : > { %v1020_v26 = vor.u32 1.1754944e-38, %v1019_v25  ;;  %vm1018_vm6 = vcmp.eq.f32.partialorder %v1017_v19, 8.507059e+37 }
 0x2e0   : > { %v1039_v59 = vor.u32 1.1754944e-38, %v1038_v31  ;;  %vm1037_vm7 = vcmp.eq.f32.partialorder %v1036_v55, 8.507059e+37 }
 0x2e1   : > { %v2256_v62 = vpop.eup %2255 }
 0x2e2   : > { %v1046_v50 = vadd.f32 1.0, %v2256_v62 }
 0x2e3   : > { %v2258_v39 = vpop.eup %2257 }
 0x2e4   : > { %v2260_v60 = vpop.eup %2259  ;;  %v1009_v9 = vmul.f32 %v2258_v39, %v1007_v10  ;;  %2261 = vrcp.f32 %v1046_v50  ;;  %vm1014_vm0 = vweird.f32 %v2258_v39  ;;  %vm1052_vm10 = vweird.f32 %v1046_v50 }
 0x2e5   : > { %v1028_v15 = vmul.f32 %v2260_v60, %v1026_v40  ;;  %2263 = vtanh.f32 %v1002_v63  ;;  %vm1033_vm1 = vweird.f32 %v2260_v60  ;;  %vm1015_vm4 = vmor %vm1013_vm2, %vm1014_vm0  ;;  %v1074_v63 = vpop.permute.xlu1 %1073 }
 0x2e6   : > { %v1010_v37 = vsub.f32 1.0, %v1009_v9  ;;  %vm1034_vm5 = vmor %vm1032_vm3, %vm1033_vm1  ;;  %vm1075_vm8 = vcmp.eq.s32.totalorder %v1074_v63, 1 }
 0x2e7   : > { %v1029_v18 = vsub.f32 1.0, %v1028_v15 }
 0x2e8   : > { %v1011_v27 = vmul.f32 %v2258_v39, %v1010_v37  ;;  %v1056_v37 = vand.u32 2147483647, %v1046_v50 }
 0x2e9   : > { %v1030_v38 = vmul.f32 %v2260_v60, %v1029_v18 }
 0x2ea   : > { %v2262_v14 = vpop.eup %2261  ;;  %v1012_v6 = vadd.f32 %v2258_v39, %v1011_v27  ;;  %vm1057_vm12 = vcmp.eq.f32.partialorder %v1056_v37, 8.507059e+37 }
 0x2eb   : > { %v1031_v5 = vadd.f32 %v2260_v60, %v1030_v38  ;;  %v1048_v51 = vmul.f32 %v2262_v14, %v1046_v50  ;;  %v2264_v56 = vpop.eup %2263  ;;  %vm1053_vm9 = vweird.f32 %v2262_v14 }
 0x2ec   : > { %v1016_v61 = vsel %vm1015_vm4, %v2258_v39, %v1012_v6  ;;  %v1058_v39 = vand.u32 2147483648, %v1046_v50  ;;  %vm1054_vm11 = vmor %vm1052_vm10, %vm1053_vm9 }
 0x2ed   : > { %v1021_v62 = vsel %vm1018_vm6, %v1020_v26, %v1016_v61  ;;  %v1035_v0 = vsel %vm1034_vm5, %v2260_v60, %v1031_v5  ;;  %v1049_v20 = vsub.f32 1.0, %v1048_v51  ;;  %v1090_v51 = vld [vmem:[%s1088_s30 + $0x8] sm:$0xff] }
 0x2ee   : > { %v1040_v22 = vsel %vm1037_vm7, %v1039_v59, %v1035_v0  ;;  %v1064_v36 = vmul.f32 %v2264_v56, %v1021_v62  ;;  %v1059_v19 = vor.u32 1.1754944e-38, %v1058_v39  ;;  %v1094_v56 = vunpack.c.h.bf16 %v1090_v51 }
 0x2ef   : > { %v1063_v10 = vmul.f32 %v1040_v22, %v2978_v49  ;;  %v1050_v40 = vmul.f32 %v2262_v14, %v1049_v20 }
 0x2f1   : > { %v1065_v9 = vadd.f32 %v1064_v36, %v1063_v10  ;;  %v1051_v15 = vadd.f32 %v2262_v14, %v1050_v40 }
 0x2f3   : > { %2265 = vtanh.f32 %v1065_v9  ;;  %v3036_v60 = vsel %vm1075_vm8, %v1065_v9, %v2978_v49  ;;  %v1055_v18 = vsel %vm1054_vm11, %v2262_v14, %v1051_v15 }
 0x2f4   : > { %v1060_v31 = vsel %vm1057_vm12, %v1059_v19, %v1055_v18  ;;  %v1093_v18 = vunpack.c.l.bf16 %v1090_v51 }
 0x2f9   : > { %v2266_v25 = vpop.eup %2265 }
 0x2fa   : > { %v1067_v27 = vmul.f32 %v2266_v25, %v1060_v31 }
 0x2fc   : > { %v3044_v35 = vsel %vm1075_vm8, %v1067_v27, %v2984_v1  ;;  %v1081_v38 = vsel %vm1075_vm8, %v1067_v27, 0.0  ;;  %v1089_v1 = vld [vmem:[%s1088_s30] sm:$0xff]  ;;  %s1702_s30 = scalar_lea.hbm %s3205_s3, %s2041_s21 }
 0x2fd   : > { %2042 = vst [vmem:[%s1789_s23 + $0x18] sm:$0xff] %v1081_v38  ;;  %v1096_v49 = vpack.c.bf16 %v3044_v35, %v3044_v35  ;;  %v1091_v50 = vunpack.c.l.bf16 %v1089_v1  ;;  %v1092_v55 = vunpack.c.h.bf16 %v1089_v1  ;;  %s1813_s23 = scalar_lea.vmem %s2604_s18, %s2065_s19 [#allocation4]  ;;  %s1705_s5 = sshll.u32 %s1702_s30, 4  ;;  %s1706_s5 = int_to_ptr.hbm [resolvable:$true] %s1705_s5 }
 0x2fe   : > { %s2406_s21 = sshra.s32 %s1706_s5, 4  ;;  %s2407_s21 = int_to_ptr.hbm [resolvable:$true] %s2406_s21 }
 0x2ff   : > { %1105 = vmatmul.bf16.vlgmr.msra.gmra.mxu0 %v1096_v49  ;;  %1118 = vmatmul.bf16.vlgmr.msra.gmra.mxu1 %v1096_v49  ;;  %s2408_s7 = scalar_lea.hbm %s2407_s21, 64  ;;  %p2413_p7 = scmp.lt.s32.totalorder %s2407_s21, %s3205_s3 }
 0x300   : > { %1131 = vmatmul.bf16.vlgmr.msra.gmra.mxu2 %v1096_v49  ;;  %1144 = vmatmul.bf16.vlgmr.msra.gmra.mxu3 %v1096_v49  ;;  %p2409_p4 = scmp.ne.s32.totalorder %s2407_s21, %s2408_s7  ;;  %p2414_p8 = scmp.lt.s32.totalorder %s2412_s0, %s2408_s7 }
 0x301   : > { %1397 = vmatpush.bf16.msra.mxu0 %v2621_v3  ;;  %1410 = vmatpush.bf16.msra.mxu1 %v2626_v7 }
 0x302   : > { %1423 = vmatpush.bf16.msra.mxu2 %v2648_v21  ;;  %1436 = vmatpush.bf16.msra.mxu3 %v2628_v8  ;;  %p2410_p5 = pnand %p2409_p4, %p2559_p9  ;;  %p2415_p10 = por %p2414_p8, %p2413_p7 }
 0x304   : > { %p2411_p6 = pneg %p2410_p5 }
 0x305   : > { %1398 = vmatpush.bf16.msra.mxu0 %v2634_v12  ;;  %1411 = vmatpush.bf16.msra.mxu1 %v2641_v16 }
 0x306   : > { %1424 = vmatpush.bf16.msra.mxu2 %v2669_v34  ;;  %1437 = vmatpush.bf16.msra.mxu3 %v2643_v17  ;;  %p2416_p13 = pnand %p2415_p10, %p2411_p6 }
 0x309   : > { %1399 = vmatpush.bf16.msra.mxu0 %v2658_v28  ;;  %1412 = vmatpush.bf16.msra.mxu1 %v2665_v32 }
 0x30a   : > { %1425 = vmatpush.bf16.msra.mxu2 %v2681_v42  ;;  %1438 = vmatpush.bf16.msra.mxu3 %v2667_v33 }
 0x30d   : > { %1400 = vmatpush.bf16.msra.mxu0 %v2679_v41  ;;  %1413 = vmatpush.bf16.msra.mxu1 %v2687_v45 }
 0x30e   : > { %1426 = vmatpush.bf16.msra.mxu2 %v2702_v54  ;;  %1439 = vmatpush.bf16.msra.mxu3 %v2689_v46 }
 0x311   : > { %1401 = vmatpush.bf16.msra.mxu0 %v2700_v53  ;;  %1414 = vmatpush.bf16.msra.mxu1 %v2709_v57 }
 0x312   : > { %1427 = vmatpush.bf16.msra.mxu2 %v2724_v4  ;;  %1440 = vmatpush.bf16.msra.mxu3 %v2711_v58 }
 0x315   : > { %1402 = vmatpush.bf16.msra.mxu0 %v2722_v2  ;;  %1415 = vmatpush.bf16.msra.mxu1 %v2731_v11 }
 0x316   : > { %1428 = vmatpush.bf16.msra.mxu2 %v2754_v24  ;;  %1441 = vmatpush.bf16.msra.mxu3 %v2733_v13 }
 0x319   : > { %1403 = vmatpush.bf16.msra.mxu0 %v2752_v23  ;;  %1416 = vmatpush.bf16.msra.mxu1 %v2762_v29 }
 0x31a   : > { %1429 = vmatpush.bf16.msra.mxu2 %v2776_v44  ;;  %1442 = vmatpush.bf16.msra.mxu3 %v2764_v30 }
 0x31d   : > { %1404 = vmatpush.bf16.msra.mxu0 %v2774_v43  ;;  %1417 = vmatpush.bf16.msra.mxu1 %v2781_v47 }
 0x31e   : > { %1430 = vmatpush.bf16.msra.mxu2 %v2792_v52  ;;  %1443 = vmatpush.bf16.msra.mxu3 %v2783_v48 }
 0x37c   : > { %v1106_v14 = vpop.f32.mrf.mxu0  ;;  %v1119_v6 = vpop.f32.mrf.mxu1 }
 0x37d   : > { %v1149_v26 = vadd.f32 %v1106_v14, %v1091_v50  ;;  %v1150_v5 = vadd.f32 %v1119_v6, %v1092_v55 }
 0x37f   : > { %v2045_v59 = vmul.f32 -1.442695, %v1149_v26  ;;  %v2046_v61 = vmul.f32 -1.442695, %v1150_v5 }
 0x381   : > { %2267 = vpow2.f32 %v2045_v59 }
 0x382   : > { %2269 = vpow2.f32 %v2046_v61 }
 0x383   : > { %v1132_v62 = vpop.f32.mrf.mxu2  ;;  %v1145_v0 = vpop.f32.mrf.mxu3 }
 0x384   : > { %v1152_v20 = vadd.f32 %v1145_v0, %v1094_v56  ;;  %v1108_v22 = vpop.f32.mrf.mxu0  ;;  %v1121_v36 = vpop.f32.mrf.mxu1  ;;  %v1151_v27 = vadd.f32 %v1132_v62, %v1093_v18 }
 0x386   : > { %v2047_v10 = vmul.f32 -1.442695, %v1152_v20 }
 0x387   : > { %v2268_v40 = vpop.eup %2267 }
 0x388   : > { %v2270_v63 = vpop.eup %2269  ;;  %v1156_v9 = vadd.f32 1.0, %v2268_v40  ;;  %2271 = vpow2.f32 %v2047_v10 }
 0x389   : > { %v1175_v15 = vadd.f32 1.0, %v2270_v63 }
 0x38a   : > { %2273 = vrcp.f32 %v1156_v9  ;;  %v1168_v14 = vand.u32 2147483648, %v1156_v9  ;;  %v1166_v26 = vand.u32 2147483647, %v1156_v9  ;;  %vm1162_vm15 = vweird.f32 %v1156_v9 }
 0x38b   : > { %2275 = vrcp.f32 %v1175_v15  ;;  %v1134_v39 = vpop.f32.mrf.mxu2  ;;  %v1147_v37 = vpop.f32.mrf.mxu3  ;;  %v1187_v5 = vand.u32 2147483648, %v1175_v15  ;;  %v1185_v61 = vand.u32 2147483647, %v1175_v15  ;;  %vm1181_vm1 = vweird.f32 %v1175_v15 }
 0x38c   : > { %v1169_v62 = vor.u32 1.1754944e-38, %v1168_v14  ;;  %vm1167_vm2 = vcmp.eq.f32.partialorder %v1166_v26, 8.507059e+37  ;;  %v1223_v39 = vpop.permute.xlu2 %1222 }
 0x38d   : > { %v1188_v36 = vor.u32 1.1754944e-38, %v1187_v5  ;;  %vm1186_vm4 = vcmp.eq.f32.partialorder %v1185_v61, 8.507059e+37  ;;  %vm1224_vm5 = vcmp.eq.s32.totalorder %v1223_v39, 1 }
 0x38e   : > { %v2272_v19 = vpop.eup %2271 }
 0x38f   : > { %v1195_v25 = vadd.f32 1.0, %v2272_v19 }
 0x390   : > { %v2274_v31 = vpop.eup %2273 }
 0x391   : > { %v2276_v38 = vpop.eup %2275  ;;  %v1158_v49 = vmul.f32 %v2274_v31, %v1156_v9  ;;  %2277 = vrcp.f32 %v1195_v25  ;;  %vm1163_vm13 = vweird.f32 %v2274_v31  ;;  %vm1201_vm7 = vweird.f32 %v1195_v25 }
 0x392   : > { %v1177_v1 = vmul.f32 %v2276_v38, %v1175_v15  ;;  %2279 = vtanh.f32 %v1151_v27  ;;  %vm1182_vm14 = vweird.f32 %v2276_v38  ;;  %vm1164_vm0 = vmor %vm1162_vm15, %vm1163_vm13 }
 0x393   : > { %v1159_v50 = vsub.f32 1.0, %v1158_v49  ;;  %vm1183_vm3 = vmor %vm1181_vm1, %vm1182_vm14 }
 0x394   : > { %v1178_v55 = vsub.f32 1.0, %v1177_v1 }
 0x395   : > { %v1160_v6 = vmul.f32 %v2274_v31, %v1159_v50 }
 0x396   : > { %v1179_v59 = vmul.f32 %v2276_v38, %v1178_v55 }
 0x397   : > { %v2278_v51 = vpop.eup %2277  ;;  %v1161_v56 = vadd.f32 %v2274_v31, %v1160_v6 }
 0x398   : > { %v1197_v0 = vmul.f32 %v2278_v51, %v1195_v25  ;;  %v1180_v20 = vadd.f32 %v2276_v38, %v1179_v59  ;;  %v2280_v10 = vpop.eup %2279  ;;  %vm1202_vm6 = vweird.f32 %v2278_v51 }
 0x399   : > { %v1165_v22 = vsel %vm1164_vm0, %v2274_v31, %v1161_v56  ;;  %v1207_v31 = vand.u32 2147483648, %v1195_v25  ;;  %vm1203_vm8 = vmor %vm1201_vm7, %vm1202_vm6 }
 0x39a   : > { %v1170_v40 = vsel %vm1167_vm2, %v1169_v62, %v1165_v22  ;;  %v1198_v63 = vsub.f32 1.0, %v1197_v0  ;;  %v1184_v37 = vsel %vm1183_vm3, %v2276_v38, %v1180_v20  ;;  %v1205_v38 = vand.u32 2147483647, %v1195_v25 }
 0x39b   : > { %v1213_v18 = vmul.f32 %v2280_v10, %v1170_v40  ;;  %v1189_v19 = vsel %vm1186_vm4, %v1188_v36, %v1184_v37  ;;  %v1208_v55 = vor.u32 1.1754944e-38, %v1207_v31 }
 0x39c   : > { %v1199_v27 = vmul.f32 %v2278_v51, %v1198_v63  ;;  %v1212_v9 = vmul.f32 %v1189_v19, %v3036_v60  ;;  %vm1206_vm9 = vcmp.eq.f32.partialorder %v1205_v38, 8.507059e+37 }
 0x39e   : > { %v1214_v49 = vadd.f32 %v1213_v18, %v1212_v9  ;;  %v1200_v15 = vadd.f32 %v2278_v51, %v1199_v27 }
 0x3a0   : > { %2281 = vtanh.f32 %v1214_v49  ;;  %v3086_v1 = vsel %vm1224_vm5, %v1214_v49, %v3036_v60  ;;  %v1204_v50 = vsel %vm1203_vm8, %v2278_v51, %v1200_v15  ;;  %v1373_v15 = vpop.permute.xlu2 %1372 }
 0x3a1   : > { %v1209_v6 = vsel %vm1206_vm9, %v1208_v55, %v1204_v50  ;;  %vm1374_vm2 = vcmp.eq.s32.totalorder %v1373_v15, 1 }
 0x3a6   : > { %v2282_v14 = vpop.eup %2281 }
 0x3a7   : > { %v1216_v26 = vmul.f32 %v2282_v14, %v1209_v6 }
 0x3a9   : > { %v3092_v5 = vsel %vm1224_vm5, %v1216_v26, %v3044_v35  ;;  %v1230_v59 = vsel %vm1224_vm5, %v1216_v26, 0.0 }
 0x3aa   : > { %1233 = vst [vmem:[%s1232_s4] sm:$0xff] %v1230_v59  ;;  %v1246_v60 = vpack.c.bf16 %v3092_v5, %v3092_v5  ;;  %s1703_s4 = sshll.u32 %s2868_s9, 4  ;;  %s1704_s4 = int_to_ptr.vmem [resolvable:$true] %s1703_s4 }
 0x3ac   : > { %1255 = vmatmul.bf16.vlgmr.msrb.gmra.mxu0 %v1246_v60  ;;  %1268 = vmatmul.bf16.vlgmr.msrb.gmra.mxu1 %v1246_v60 }
 0x3ad   : > { %1281 = vmatmul.bf16.vlgmr.msrb.gmra.mxu2 %v1246_v60  ;;  %1294 = vmatmul.bf16.vlgmr.msrb.gmra.mxu3 %v1246_v60 }
 0x3ae   : > { %1547 = vmatpush.bf16.msrb.mxu0 %v2621_v3  ;;  %1560 = vmatpush.bf16.msrb.mxu1 %v2626_v7  ;;  %v2050_v3 = vld [vmem:[%s1797_s6 + $0x50] sm:$0xff] }
 0x3af   : > { %1573 = vmatpush.bf16.msrb.mxu2 %v2648_v21  ;;  %1586 = vmatpush.bf16.msrb.mxu3 %v2628_v8  ;;  %v1241_v7 = vunpack.c.l.bf16 %v2050_v3  ;;  %v1242_v8 = vunpack.c.h.bf16 %v2050_v3 }
 0x3b2   : > { %1548 = vmatpush.bf16.msrb.mxu0 %v2634_v12  ;;  %1561 = vmatpush.bf16.msrb.mxu1 %v2641_v16 }
 0x3b3   : > { %1574 = vmatpush.bf16.msrb.mxu2 %v2669_v34  ;;  %1587 = vmatpush.bf16.msrb.mxu3 %v2643_v17 }
 0x3b6   : > { %1549 = vmatpush.bf16.msrb.mxu0 %v2658_v28  ;;  %1562 = vmatpush.bf16.msrb.mxu1 %v2665_v32  ;;  %v2051_v28 = vld [vmem:[%s1797_s6 + $0x58] sm:$0xff]  ;;  %s1817_s6 = scalar_lea.vmem %s2868_s9, %s2071_s22 [#allocation9] }
 0x3b7   : > { %1575 = vmatpush.bf16.msrb.mxu2 %v2681_v42  ;;  %1588 = vmatpush.bf16.msrb.mxu3 %v2667_v33  ;;  %v1244_v34 = vunpack.c.h.bf16 %v2051_v28 }
 0x3ba   : > { %1550 = vmatpush.bf16.msrb.mxu0 %v2679_v41  ;;  %1563 = vmatpush.bf16.msrb.mxu1 %v2687_v45 }
 0x3bb   : > { %1576 = vmatpush.bf16.msrb.mxu2 %v2702_v54  ;;  %1589 = vmatpush.bf16.msrb.mxu3 %v2689_v46 }
 0x3be   : > { %1551 = vmatpush.bf16.msrb.mxu0 %v2700_v53  ;;  %1564 = vmatpush.bf16.msrb.mxu1 %v2709_v57 }
 0x3bf   : > { %1577 = vmatpush.bf16.msrb.mxu2 %v2724_v4  ;;  %1590 = vmatpush.bf16.msrb.mxu3 %v2711_v58 }
 0x3c2   : > { %1552 = vmatpush.bf16.msrb.mxu0 %v2722_v2  ;;  %1565 = vmatpush.bf16.msrb.mxu1 %v2731_v11 }
 0x3c3   : > { %1578 = vmatpush.bf16.msrb.mxu2 %v2754_v24  ;;  %1591 = vmatpush.bf16.msrb.mxu3 %v2733_v13 }
 0x3c6   : > { %1553 = vmatpush.bf16.msrb.mxu0 %v2752_v23  ;;  %1566 = vmatpush.bf16.msrb.mxu1 %v2762_v29  ;;  %v1243_v23 = vunpack.c.l.bf16 %v2051_v28 }
 0x3c7   : > { %1579 = vmatpush.bf16.msrb.mxu2 %v2776_v44  ;;  %1592 = vmatpush.bf16.msrb.mxu3 %v2764_v30 }
 0x3ca   : > { %1554 = vmatpush.bf16.msrb.mxu0 %v2774_v43  ;;  %1567 = vmatpush.bf16.msrb.mxu1 %v2781_v47 }
 0x3cb   : > { %1580 = vmatpush.bf16.msrb.mxu2 %v2792_v52  ;;  %1593 = vmatpush.bf16.msrb.mxu3 %v2783_v48 }
 0x429   : > { %v1256_v12 = vpop.f32.mrf.mxu0  ;;  %v1269_v16 = vpop.f32.mrf.mxu1 }
 0x42a   : > { %v1299_v17 = vadd.f32 %v1256_v12, %v1241_v7  ;;  %v1300_v21 = vadd.f32 %v1269_v16, %v1242_v8 }
 0x42c   : > { %v2052_v32 = vmul.f32 -1.442695, %v1299_v17  ;;  %v2053_v33 = vmul.f32 -1.442695, %v1300_v21  ;;  %v2058_v17 = vld [vmem:[%s1805_s28 + $0x60] sm:$0xff] }
 0x42d   : > { %v1391_v21 = vunpack.c.l.bf16 %v2058_v17  ;;  %v1392_v28 = vunpack.c.h.bf16 %v2058_v17 }
 0x42e   : > { %2283 = vpow2.f32 %v2052_v32 }
 0x42f   : > { %2285 = vpow2.f32 %v2053_v33 }
 0x430   : > { %v1282_v41 = vpop.f32.mrf.mxu2  ;;  %v1295_v42 = vpop.f32.mrf.mxu3 }
 0x431   : > { %v1302_v45 = vadd.f32 %v1295_v42, %v1244_v34  ;;  %v1258_v46 = vpop.f32.mrf.mxu0  ;;  %v1271_v53 = vpop.f32.mrf.mxu1  ;;  %v1301_v43 = vadd.f32 %v1282_v41, %v1243_v23  ;;  %v2059_v41 = vld [vmem:[%s1805_s28 + $0x68] sm:$0xff] }
 0x432   : > { %v1394_v46 = vunpack.c.h.bf16 %v2059_v41 }
 0x433   : > { %v2054_v54 = vmul.f32 -1.442695, %v1302_v45 }
 0x434   : > { %v2284_v57 = vpop.eup %2283 }
 0x435   : > { %v2286_v58 = vpop.eup %2285  ;;  %v1306_v2 = vadd.f32 1.0, %v2284_v57  ;;  %2287 = vpow2.f32 %v2054_v54 }
 0x436   : > { %v1325_v4 = vadd.f32 1.0, %v2286_v58 }
 0x437   : > { %2289 = vrcp.f32 %v1306_v2  ;;  %v1318_v25 = vand.u32 2147483648, %v1306_v2  ;;  %v1316_v56 = vand.u32 2147483647, %v1306_v2  ;;  %vm1312_vm12 = vweird.f32 %v1306_v2 }
 0x438   : > { %2291 = vrcp.f32 %v1325_v4  ;;  %v1284_v11 = vpop.f32.mrf.mxu2  ;;  %v1297_v13 = vpop.f32.mrf.mxu3  ;;  %v1337_v61 = vand.u32 2147483648, %v1325_v4  ;;  %v1335_v0 = vand.u32 2147483647, %v1325_v4  ;;  %vm1331_vm13 = vweird.f32 %v1325_v4 }
 0x439   : > { %v1319_v36 = vor.u32 1.1754944e-38, %v1318_v25  ;;  %vm1317_vm0 = vcmp.eq.f32.partialorder %v1316_v56, 8.507059e+37 }
 0x43a   : > { %v1338_v63 = vor.u32 1.1754944e-38, %v1337_v61  ;;  %vm1336_vm1 = vcmp.eq.f32.partialorder %v1335_v0, 8.507059e+37 }
 0x43b   : > { %v2288_v24 = vpop.eup %2287 }
 0x43c   : > { %v1345_v29 = vadd.f32 1.0, %v2288_v24 }
 0x43d   : > { %v2290_v30 = vpop.eup %2289 }
 0x43e   : > { %v2292_v44 = vpop.eup %2291  ;;  %v1308_v47 = vmul.f32 %v2290_v30, %v1306_v2  ;;  %2293 = vrcp.f32 %v1345_v29  ;;  %vm1313_vm10 = vweird.f32 %v2290_v30  ;;  %v1357_v14 = vand.u32 2147483648, %v1345_v29 }
 0x43f   : > { %v1327_v48 = vmul.f32 %v2292_v44, %v1325_v4  ;;  %2295 = vtanh.f32 %v1301_v43  ;;  %vm1332_vm11 = vweird.f32 %v2292_v44  ;;  %vm1314_vm14 = vmor %vm1312_vm12, %vm1313_vm10  ;;  %vm1351_vm4 = vweird.f32 %v1345_v29 }
 0x440   : > { %v1309_v52 = vsub.f32 1.0, %v1308_v47  ;;  %vm1333_vm15 = vmor %vm1331_vm13, %vm1332_vm11  ;;  %v1355_v26 = vand.u32 2147483647, %v1345_v29  ;;  %v1358_v60 = vor.u32 1.1754944e-38, %v1357_v14  ;;  %v1393_v43 = vunpack.c.l.bf16 %v2059_v41 }
 0x441   : > { %v1328_v35 = vsub.f32 1.0, %v1327_v48 }
 0x442   : > { %v1310_v51 = vmul.f32 %v2290_v30, %v1309_v52  ;;  %vm1356_vm6 = vcmp.eq.f32.partialorder %v1355_v26, 8.507059e+37 }
 0x443   : > { %v1329_v62 = vmul.f32 %v2292_v44, %v1328_v35 }
 0x444   : > { %v2294_v20 = vpop.eup %2293  ;;  %v1311_v22 = vadd.f32 %v2290_v30, %v1310_v51 }
 0x445   : > { %v1330_v10 = vadd.f32 %v2292_v44, %v1329_v62  ;;  %v1347_v40 = vmul.f32 %v2294_v20, %v1345_v29  ;;  %v2296_v37 = vpop.eup %2295  ;;  %vm1352_vm3 = vweird.f32 %v2294_v20 }
 0x446   : > { %v1315_v39 = vsel %vm1314_vm14, %v2290_v30, %v1311_v22  ;;  %vm1353_vm5 = vmor %vm1351_vm4, %vm1352_vm3 }
 0x447   : > { %v1320_v18 = vsel %vm1317_vm0, %v1319_v36, %v1315_v39  ;;  %v1334_v19 = vsel %vm1333_vm15, %v2292_v44, %v1330_v10  ;;  %v1348_v27 = vsub.f32 1.0, %v1347_v40 }
 0x448   : > { %v1339_v9 = vsel %vm1336_vm1, %v1338_v63, %v1334_v19  ;;  %v1363_v49 = vmul.f32 %v2296_v37, %v1320_v18 }
 0x449   : > { %v1362_v31 = vmul.f32 %v1339_v9, %v3086_v1  ;;  %v1349_v38 = vmul.f32 %v2294_v20, %v1348_v27 }
 0x44b   : > { %v1364_v50 = vadd.f32 %v1363_v49, %v1362_v31  ;;  %v1350_v55 = vadd.f32 %v2294_v20, %v1349_v38 }
 0x44d   : > { %2297 = vtanh.f32 %v1364_v50  ;;  %v3134_v6 = vsel %vm1374_vm2, %v1364_v50, %v3086_v1  ;;  %v1354_v59 = vsel %vm1353_vm5, %v2294_v20, %v1350_v55  ;;  %v1523_v55 = vpop.permute.xlu0 %1522 }
 0x44e   : > { %v1359_v7 = vsel %vm1356_vm6, %v1358_v60, %v1354_v59  ;;  %vm1524_vm15 = vcmp.eq.s32.totalorder %v1523_v55, 1 }
 0x453   : > { %v2298_v3 = vpop.eup %2297 }
 0x454   : > { %v1366_v8 = vmul.f32 %v2298_v3, %v1359_v7 }
 0x456   : > { %v3140_v12 = vsel %vm1374_vm2, %v1366_v8, %v3092_v5  ;;  %v1380_v1 = vsel %vm1374_vm2, %v1366_v8, 0.0 }
 0x457   : > { %2056 = vst [vmem:[%s1801_s11 + $0x28] sm:$0xff] %v1380_v1  ;;  %v1396_v16 = vpack.c.bf16 %v3140_v12, %v3140_v12 }
 0x459   : > { %1405 = vmatmul.bf16.vlgmr.msra.gmra.mxu0 %v1396_v16  ;;  %1418 = vmatmul.bf16.vlgmr.msra.gmra.mxu1 %v1396_v16 }
 0x45a   : > { %1431 = vmatmul.bf16.vlgmr.msra.gmra.mxu2 %v1396_v16  ;;  %1444 = vmatmul.bf16.vlgmr.msra.gmra.mxu3 %v1396_v16 }
 0x4d6   : > { %v1406_v32 = vpop.f32.mrf.mxu0  ;;  %v1419_v33 = vpop.f32.mrf.mxu1 }
 0x4d7   : > { %v1449_v34 = vadd.f32 %v1406_v32, %v1391_v21  ;;  %v1450_v5 = vadd.f32 %v1419_v33, %v1392_v28 }
 0x4d9   : > { %v2060_v42 = vmul.f32 -1.442695, %v1449_v34  ;;  %v2061_v45 = vmul.f32 -1.442695, %v1450_v5  ;;  %v2066_v34 = vld [vmem:[%s1813_s23 + $0x70] sm:$0xff] }
 0x4da   : > { %v1541_v5 = vunpack.c.l.bf16 %v2066_v34  ;;  %v1542_v41 = vunpack.c.h.bf16 %v2066_v34 }
 0x4db   : > { %2299 = vpow2.f32 %v2060_v42 }
 0x4dc   : > { %2301 = vpow2.f32 %v2061_v45 }
 0x4dd   : > { %v1432_v53 = vpop.f32.mrf.mxu2  ;;  %v1445_v54 = vpop.f32.mrf.mxu3 }
 0x4de   : > { %v1452_v57 = vadd.f32 %v1445_v54, %v1394_v46  ;;  %v1408_v58 = vpop.f32.mrf.mxu0  ;;  %v1421_v2 = vpop.f32.mrf.mxu1  ;;  %v1451_v52 = vadd.f32 %v1432_v53, %v1393_v43  ;;  %v2067_v54 = vld [vmem:[%s1813_s23 + $0x78] sm:$0xff] }
 0x4df   : > { %v1544_v58 = vunpack.c.h.bf16 %v2067_v54 }
 0x4e0   : > { %v2062_v4 = vmul.f32 -1.442695, %v1452_v57 }
 0x4e1   : > { %v2300_v11 = vpop.eup %2299 }
 0x4e2   : > { %v2302_v13 = vpop.eup %2301  ;;  %v1456_v23 = vadd.f32 1.0, %v2300_v11  ;;  %2303 = vpow2.f32 %v2062_v4 }
 0x4e3   : > { %v1475_v24 = vadd.f32 1.0, %v2302_v13 }
 0x4e4   : > { %2305 = vrcp.f32 %v1456_v23  ;;  %v1468_v62 = vand.u32 2147483648, %v1456_v23  ;;  %v1466_v22 = vand.u32 2147483647, %v1456_v23  ;;  %vm1462_vm9 = vweird.f32 %v1456_v23 }
 0x4e5   : > { %2307 = vrcp.f32 %v1475_v24  ;;  %v1434_v29 = vpop.f32.mrf.mxu2  ;;  %v1447_v30 = vpop.f32.mrf.mxu3  ;;  %v1487_v0 = vand.u32 2147483648, %v1475_v24  ;;  %v1485_v10 = vand.u32 2147483647, %v1475_v24  ;;  %vm1481_vm10 = vweird.f32 %v1475_v24 }
 0x4e6   : > { %v1469_v39 = vor.u32 1.1754944e-38, %v1468_v62  ;;  %vm1467_vm13 = vcmp.eq.f32.partialorder %v1466_v22, 8.507059e+37 }
 0x4e7   : > { %v1488_v19 = vor.u32 1.1754944e-38, %v1487_v0  ;;  %vm1486_vm14 = vcmp.eq.f32.partialorder %v1485_v10, 8.507059e+37 }
 0x4e8   : > { %v2304_v44 = vpop.eup %2303 }
 0x4e9   : > { %v1495_v47 = vadd.f32 1.0, %v2304_v44 }
 0x4ea   : > { %v2306_v48 = vpop.eup %2305 }
 0x4eb   : > { %v2308_v35 = vpop.eup %2307  ;;  %v1458_v25 = vmul.f32 %v2306_v48, %v1456_v23  ;;  %2309 = vrcp.f32 %v1495_v47  ;;  %vm1463_vm7 = vweird.f32 %v2306_v48  ;;  %v1507_v3 = vand.u32 2147483648, %v1495_v47 }
 0x4ec   : > { %v1477_v61 = vmul.f32 %v2308_v35, %v1475_v24  ;;  %2311 = vtanh.f32 %v1451_v52  ;;  %vm1482_vm8 = vweird.f32 %v2308_v35  ;;  %vm1464_vm11 = vmor %vm1462_vm9, %vm1463_vm7  ;;  %vm1501_vm1 = vweird.f32 %v1495_v47 }
 0x4ed   : > { %v1459_v51 = vsub.f32 1.0, %v1458_v25  ;;  %vm1483_vm12 = vmor %vm1481_vm10, %vm1482_vm8  ;;  %v1505_v8 = vand.u32 2147483647, %v1495_v47  ;;  %v1508_v16 = vor.u32 1.1754944e-38, %v1507_v3  ;;  %v1543_v52 = vunpack.c.l.bf16 %v2067_v54 }
 0x4ee   : > { %v1478_v56 = vsub.f32 1.0, %v1477_v61 }
 0x4ef   : > { %v1460_v20 = vmul.f32 %v2306_v48, %v1459_v51  ;;  %vm1506_vm3 = vcmp.eq.f32.partialorder %v1505_v8, 8.507059e+37 }
 0x4f0   : > { %v1479_v36 = vmul.f32 %v2308_v35, %v1478_v56 }
 0x4f1   : > { %v2310_v40 = vpop.eup %2309  ;;  %v1461_v63 = vadd.f32 %v2306_v48, %v1460_v20 }
 0x4f2   : > { %v1480_v37 = vadd.f32 %v2308_v35, %v1479_v36  ;;  %v1497_v18 = vmul.f32 %v2310_v40, %v1495_v47  ;;  %v2312_v9 = vpop.eup %2311  ;;  %vm1502_vm0 = vweird.f32 %v2310_v40 }
 0x4f3   : > { %v1465_v27 = vsel %vm1464_vm11, %v2306_v48, %v1461_v63  ;;  %vm1503_vm2 = vmor %vm1501_vm1, %vm1502_vm0 }
 0x4f4   : > { %v1470_v49 = vsel %vm1467_vm13, %v1469_v39, %v1465_v27  ;;  %v1484_v15 = vsel %vm1483_vm12, %v2308_v35, %v1480_v37  ;;  %v1498_v31 = vsub.f32 1.0, %v1497_v18 }
 0x4f5   : > { %v1489_v38 = vsel %vm1486_vm14, %v1488_v19, %v1484_v15  ;;  %v1513_v50 = vmul.f32 %v2312_v9, %v1470_v49 }
 0x4f6   : > { %v1512_v14 = vmul.f32 %v1489_v38, %v3134_v6  ;;  %v1499_v26 = vmul.f32 %v2310_v40, %v1498_v31 }
 0x4f8   : > { %v1514_v59 = vadd.f32 %v1513_v50, %v1512_v14  ;;  %v1500_v60 = vadd.f32 %v2310_v40, %v1499_v26 }
 0x4fa   : > { %2313 = vtanh.f32 %v1514_v59  ;;  %v3150_v7 = vsel %vm1524_vm15, %v1514_v59, %v3134_v6  ;;  %v1504_v1 = vsel %vm1503_vm2, %v2310_v40, %v1500_v60 }
 0x4fb   : > { %v1509_v21 = vsel %vm1506_vm3, %v1508_v16, %v1504_v1 }
 0x500   : > { %v2314_v17 = vpop.eup %2313 }
 0x501   : > { %v1516_v28 = vmul.f32 %v2314_v17, %v1509_v21 }
 0x503   : > { %v1528_v32 = vsel %vm1524_vm15, %v1516_v28, %v3140_v12  ;;  %v1530_v33 = vsel %vm1524_vm15, %v1516_v28, 0.0  ;;  %v1673_v28 = vpop.permute.xlu1 %1672 }
 0x504   : > { %2064 = vst [vmem:[%s1809_s24 + $0x30] sm:$0xff] %v1530_v33  ;;  %v1546_v6 = vpack.c.bf16 %v1528_v32, %v1528_v32  ;;  %vm1674_vm0 = vcmp.eq.s32.totalorder %v1673_v28, 1 }
 0x506   : > { %1555 = vmatmul.bf16.vlgmr.msrb.gmra.mxu0 %v1546_v6  ;;  %1568 = vmatmul.bf16.vlgmr.msrb.gmra.mxu1 %v1546_v6 }
 0x507   : > { %1581 = vmatmul.bf16.vlgmr.msrb.gmra.mxu2 %v1546_v6  ;;  %1594 = vmatmul.bf16.vlgmr.msrb.gmra.mxu3 %v1546_v6 }
 0x583   : > { %v1556_v42 = vpop.f32.mrf.mxu0  ;;  %v1569_v45 = vpop.f32.mrf.mxu1 }
 0x584   : > { %v1599_v46 = vadd.f32 %v1556_v42, %v1541_v5  ;;  %v1600_v53 = vadd.f32 %v1569_v45, %v1542_v41 }
 0x586   : > { %v2068_v57 = vmul.f32 -1.442695, %v1599_v46  ;;  %v2069_v12 = vmul.f32 -1.442695, %v1600_v53 }
 0x588   : > { %2315 = vpow2.f32 %v2068_v57 }
 0x589   : > { %2317 = vpow2.f32 %v2069_v12 }
 0x58a   : > { %v1582_v2 = vpop.f32.mrf.mxu2  ;;  %v1595_v4 = vpop.f32.mrf.mxu3 }
 0x58b   : > { %v1602_v11 = vadd.f32 %v1595_v4, %v1544_v58  ;;  %v1558_v13 = vpop.f32.mrf.mxu0  ;;  %v1571_v23 = vpop.f32.mrf.mxu1  ;;  %v1601_v51 = vadd.f32 %v1582_v2, %v1543_v52 }
 0x58d   : > { %v2070_v24 = vmul.f32 -1.442695, %v1602_v11 }
 0x58e   : > { %v2316_v29 = vpop.eup %2315 }
 0x58f   : > { %v2318_v30 = vpop.eup %2317  ;;  %v1606_v43 = vadd.f32 1.0, %v2316_v29  ;;  %2319 = vpow2.f32 %v2070_v24 }
 0x590   : > { %v1625_v44 = vadd.f32 1.0, %v2318_v30 }
 0x591   : > { %2321 = vrcp.f32 %v1606_v43  ;;  %v1618_v36 = vand.u32 2147483648, %v1606_v43  ;;  %v1616_v63 = vand.u32 2147483647, %v1606_v43  ;;  %vm1612_vm6 = vweird.f32 %v1606_v43 }
 0x592   : > { %2323 = vrcp.f32 %v1625_v44  ;;  %v1584_v47 = vpop.f32.mrf.mxu2  ;;  %v1597_v48 = vpop.f32.mrf.mxu3  ;;  %v1637_v10 = vand.u32 2147483648, %v1625_v44  ;;  %v1635_v37 = vand.u32 2147483647, %v1625_v44  ;;  %vm1631_vm7 = vweird.f32 %v1625_v44 }
 0x593   : > { %v1619_v27 = vor.u32 1.1754944e-38, %v1618_v36  ;;  %vm1617_vm10 = vcmp.eq.f32.partialorder %v1616_v63, 8.507059e+37 }
 0x594   : > { %v1638_v15 = vor.u32 1.1754944e-38, %v1637_v10  ;;  %vm1636_vm11 = vcmp.eq.f32.partialorder %v1635_v37, 8.507059e+37 }
 0x595   : > { %v2320_v35 = vpop.eup %2319 }
 0x596   : > { %v1645_v25 = vadd.f32 1.0, %v2320_v35 }
 0x597   : > { %v2322_v61 = vpop.eup %2321 }
 0x598   : > { %v2324_v56 = vpop.eup %2323  ;;  %v1608_v62 = vmul.f32 %v2322_v61, %v1606_v43  ;;  %2325 = vrcp.f32 %v1645_v25  ;;  %vm1613_vm4 = vweird.f32 %v2322_v61  ;;  %v1657_v16 = vand.u32 2147483648, %v1645_v25 }
 0x599   : > { %v1627_v0 = vmul.f32 %v2324_v56, %v1625_v44  ;;  %2327 = vtanh.f32 %v1601_v51  ;;  %vm1632_vm5 = vweird.f32 %v2324_v56  ;;  %vm1614_vm8 = vmor %vm1612_vm6, %vm1613_vm4  ;;  %vm1651_vm13 = vweird.f32 %v1645_v25 }
 0x59a   : > { %v1609_v20 = vsub.f32 1.0, %v1608_v62  ;;  %vm1633_vm9 = vmor %vm1631_vm7, %vm1632_vm5  ;;  %v1655_v17 = vand.u32 2147483647, %v1645_v25  ;;  %v1658_v21 = vor.u32 1.1754944e-38, %v1657_v16 }
 0x59b   : > { %v1628_v22 = vsub.f32 1.0, %v1627_v0 }
 0x59c   : > { %v1610_v40 = vmul.f32 %v2322_v61, %v1609_v20  ;;  %vm1656_vm15 = vcmp.eq.f32.partialorder %v1655_v17, 8.507059e+37 }
 0x59d   : > { %v1629_v39 = vmul.f32 %v2324_v56, %v1628_v22 }
 0x59e   : > { %v2326_v18 = vpop.eup %2325  ;;  %v1611_v19 = vadd.f32 %v2322_v61, %v1610_v40 }
 0x59f   : > { %v1630_v9 = vadd.f32 %v2324_v56, %v1629_v39  ;;  %v1647_v49 = vmul.f32 %v2326_v18, %v1645_v25  ;;  %v2328_v38 = vpop.eup %2327  ;;  %vm1652_vm12 = vweird.f32 %v2326_v18 }
 0x5a0   : > { %v1615_v31 = vsel %vm1614_vm8, %v2322_v61, %v1611_v19  ;;  %vm1653_vm14 = vmor %vm1651_vm13, %vm1652_vm12 }
 0x5a1   : > { %v1620_v50 = vsel %vm1617_vm10, %v1619_v27, %v1615_v31  ;;  %v1634_v55 = vsel %vm1633_vm9, %v2324_v56, %v1630_v9  ;;  %v1648_v14 = vsub.f32 1.0, %v1647_v49 }
 0x5a2   : > { %v1639_v26 = vsel %vm1636_vm11, %v1638_v15, %v1634_v55  ;;  %v1663_v59 = vmul.f32 %v2328_v38, %v1620_v50 }
 0x5a3   : > { %v1662_v60 = vmul.f32 %v1639_v26, %v3150_v7  ;;  %v1649_v3 = vmul.f32 %v2326_v18, %v1648_v14 }
 0x5a5   : > { %v1664_v8 = vadd.f32 %v1663_v59, %v1662_v60  ;;  %v1650_v1 = vadd.f32 %v2326_v18, %v1649_v3 }
 0x5a7   : > { %2329 = vtanh.f32 %v1664_v8  ;;  %v1654_v7 = vsel %vm1653_vm14, %v2326_v18, %v1650_v1 }
 0x5a8   : > { %v1659_v33 = vsel %vm1656_vm15, %v1658_v21, %v1654_v7 }
 0x5ad   : > { %v2330_v32 = vpop.eup %2329 }
 0x5ae   : > { %v1666_v6 = vmul.f32 %v2330_v32, %v1659_v33 }
 0x5b0   : > { %v1680_v34 = vsel %vm1674_vm0, %v1666_v6, 0.0 }
 0x5b1   : > { %2072 = vst [vmem:[%s1817_s6 + $0x38] sm:$0xff] %v1680_v34 }
 0x5b2   : > { %2419 = shalt.err (!%p2416_p13)
}
 0x5b3   : > { %s2485_s8 = smov 128   ;;  %s2486_s24 = smov 256  }
 0x5b4   : > { %s2487_s19 = smov 8  }
 0x5b5   : > { %2129 = dma.vmem_to_hbm [thread:$0]  (%p2559_p9), %s1704_s4, 1024, %s1706_s5, %s1685_s15, %s2485_s8, %s2486_s24, %s2487_s19  }
 0x5b6 PF: > { %s1720_s23 = sand.u32 1, %s2458_s12   ;;  %p2139_p0 = pnand %p1874_p12, %p2566_p11 }
 0x5b7   : > { %s1721_s18 = scalar_lea.sflag [#allocation6], %s1720_s23 }
 0x5b8   : > { %p2140_p1 = pneg %p2139_p0 }
 0x5ba   : > { %2453 = dma.done.wait (%p2140_p1), %s1721_s18, 1024  }
 0x5bb   : > { %2455 = vsyncadd (%p2140_p1), %s1721_s18, 4294966272  ;;  %s22_s17 = sadd.s32 1, %s2478_s17   ;;  %s3213_s12 = smov %s2462_s13 }
 0x5bc   : > { %p19_p2 = scmp.ge.s32.totalorder %s22_s17, 4   ;;  %s3214_s13 = smov %s2466_s14 }
 0x5bd   : > { %s3215_s14 = smov %s2564_s26  ;;  %s3216_s15 = smov %s2474_s16 }
 0x5be   : > { %s3217_s16 = smov %s3219_s20  ;;  %21 = sbr.rel (!%p19_p2) target bundleno = 10 (0xa), region = 110 }
 0x5c3   :  { %1727 = vsyncpa [#allocation5], 1 }
 0x5c4   :  { %1729 = vsyncpa [#allocation5 + $0x1], 1 }
 0x5c5   :  { %1730 = vsyncpa [#allocation8], 1 }
 0x5c6   :  { %1732 = vsyncpa [#allocation8 + $0x1], 1 }
 0x5c7   :  { %1733 = vsyncpa [#allocation6], 1 }
 0x5c8   :  { %1735 = vsyncpa [#allocation6 + $0x1], 1 }

</bundles_post_ra>
